<compile_context>
chip_gen: v6e
topology: v6e:2x2x1
jax: 0.10.0
libtpu: 0.0.40
codegen_flags: <defaults>
</compile_context>

<pallas_src>
import functools
import math

import jax
import jax.numpy as jnp
from jax.experimental import pallas as pl
from jax.experimental.pallas import tpu as pltpu


_VMEM_LIMIT_BYTES = 32 * 1024 * 1024  # fits v5e/v6e (128 MiB) and v7x (64 MiB)
_MAX_SINGLE_K = 4096                  # padded K up to this -> single K step
_TM_DEFAULT = 512                     # M-tile rows (512-1024 row sweet spot)


def _round_up(x, m):
    return (x + m - 1) // m * m


def _pad_k(k):
    kp = _round_up(k, 128)
    return kp if kp <= _MAX_SINGLE_K else _round_up(k, 512)


def _tk_for(kp):
    return kp if kp <= _MAX_SINGLE_K else 512


# ----------------------------------------------------------------------------
# Pallas kernel: y = act(x @ w + b), K accumulated in a small f32 scratch.
# Output is bf16 (lane-dense slab) for conv/fc activations; the f32
# accumulator is only (tm, Np), so it stays tiny regardless of batch.
# ----------------------------------------------------------------------------
def _fused_linear_kernel(x_ref, w_ref, b_ref, o_ref, acc_ref, *, relu):
    k = pl.program_id(1)

    @pl.when(k == 0)
    def _():
        acc_ref[...] = jnp.zeros_like(acc_ref)

    acc_ref[...] += jnp.dot(x_ref[...], w_ref[...],
                            preferred_element_type=jnp.float32)

    @pl.when(k == pl.num_programs(1) - 1)
    def _():
        y = acc_ref[...] + b_ref[...]
        if relu:
            y = jnp.maximum(y, 0.0)
        o_ref[...] = y.astype(o_ref.dtype)


def fused_linear(x, w_packed, b_packed, *, relu, out_dtype, n_valid,
                 tm=_TM_DEFAULT):
    """y = act(x @ w + b).  x:(M,K) any float dtype; w_packed:(Kp,Np) bf16
    (pre-padded / pre-transposed); b_packed:(1,Np) f32.  Returns (M, n_valid)."""
    M, K = x.shape
    Kp, Np = w_packed.shape
    assert Kp >= K and Kp % 128 == 0 and Np % 128 == 0

    tm = min(tm, _round_up(M, 8))
    Mp = _round_up(M, tm)
    tk = _tk_for(Kp)
    assert Kp % tk == 0

    x = x.astype(jnp.bfloat16)
    if Mp > M or Kp > K:
        x = jnp.pad(x, ((0, Mp - M), (0, Kp - K)))

    kernel = functools.partial(_fused_linear_kernel, relu=relu)

    out = pl.pallas_call(
        kernel,
        out_shape=jax.ShapeDtypeStruct((Mp, Np), out_dtype),
        grid_spec=pltpu.PrefetchScalarGridSpec(
            num_scalar_prefetch=0,
            grid=(Mp // tm, Kp // tk),
            in_specs=[
                pl.BlockSpec((tm, tk), lambda m, k: (m, k)),
                pl.BlockSpec((tk, Np), lambda m, k: (k, 0)),
                pl.BlockSpec((1, Np), lambda m, k: (0, 0)),
            ],
            out_specs=pl.BlockSpec((tm, Np), lambda m, k: (m, 0)),
            scratch_shapes=[pltpu.VMEM((tm, Np), jnp.float32)],
        ),
        compiler_params=pltpu.CompilerParams(
            dimension_semantics=("parallel", "arbitrary"),
            vmem_limit_bytes=_VMEM_LIMIT_BYTES),
    )(x, w_packed, b_packed)
    return out[:M, :n_valid]


# ----------------------------------------------------------------------------
# Fused head kernel: qs = relu(x @ w0 + b0) @ w1 + b1.
# fc1 runs in the fc0 epilogue -- its padded (256 x 128) tile is too small to
# be worth a separate pallas_call + HBM round trip.
# ----------------------------------------------------------------------------
def _head_kernel(x_ref, w0_ref, b0_ref, w1_ref, b1_ref, o_ref, acc_ref):
    k = pl.program_id(1)

    @pl.when(k == 0)
    def _():
        acc_ref[...] = jnp.zeros_like(acc_ref)

    acc_ref[...] += jnp.dot(x_ref[...], w0_ref[...],
                            preferred_element_type=jnp.float32)

    @pl.when(k == pl.num_programs(1) - 1)
    def _():
        h = jnp.maximum(acc_ref[...] + b0_ref[...], 0.0)
        y = jnp.dot(h.astype(w1_ref.dtype), w1_ref[...],
                    preferred_element_type=jnp.float32) + b1_ref[...]
        o_ref[...] = y.astype(o_ref.dtype)


def fused_head(x, w0, b0, w1, b1, *, n_valid, tm=_TM_DEFAULT):
    M, K = x.shape
    Kp, N0p = w0.shape
    N0p2, N1p = w1.shape
    assert N0p == N0p2 and Kp >= K

    tm = min(tm, _round_up(M, 8))
    Mp = _round_up(M, tm)
    tk = _tk_for(Kp)
    assert Kp % tk == 0

    x = x.astype(jnp.bfloat16)
    if Mp > M or Kp > K:
        x = jnp.pad(x, ((0, Mp - M), (0, Kp - K)))

    out = pl.pallas_call(
        _head_kernel,
        out_shape=jax.ShapeDtypeStruct((Mp, N1p), jnp.float32),
        grid_spec=pltpu.PrefetchScalarGridSpec(
            num_scalar_prefetch=0,
            grid=(Mp // tm, Kp // tk),
            in_specs=[
                pl.BlockSpec((tm, tk), lambda m, k: (m, k)),
                pl.BlockSpec((tk, N0p), lambda m, k: (k, 0)),
                pl.BlockSpec((1, N0p), lambda m, k: (0, 0)),
                pl.BlockSpec((N0p, N1p), lambda m, k: (0, 0)),
                pl.BlockSpec((1, N1p), lambda m, k: (0, 0)),
            ],
            out_specs=pl.BlockSpec((tm, N1p), lambda m, k: (m, 0)),
            scratch_shapes=[pltpu.VMEM((tm, N0p), jnp.float32)],
        ),
        compiler_params=pltpu.CompilerParams(
            dimension_semantics=("parallel", "arbitrary"),
            vmem_limit_bytes=_VMEM_LIMIT_BYTES),
    )(x, w0, b0, w1, b1)
    return out[:M, :n_valid]


# ----------------------------------------------------------------------------
# Conv via im2col (JAX glue, bf16 patches) + fused Pallas GEMM.
# TODO(synk): patch extraction is still host-side im2col; an in-kernel strided
# patch gather (input resident in VMEM) would cut conv HBM traffic further.
# ----------------------------------------------------------------------------
def _im2col(x_nhwc, kh, kw, stride):
    B, H, W, C = x_nhwc.shape
    OH = (H - kh) // stride + 1
    OW = (W - kw) // stride + 1
    cols = []
    for i in range(kh):
        for j in range(kw):
            cols.append(
                x_nhwc[:, i:i + stride * OH:stride, j:j + stride * OW:stride, :])
    p = jnp.stack(cols, axis=3)  # (B, OH, OW, kh*kw, C)
    return p.reshape(B * OH * OW, kh * kw * C), (B, OH, OW)


def conv2d_relu(x_nhwc, w_packed, b_packed, *, kh, kw, stride, oc):
    patches, (B, OH, OW) = _im2col(x_nhwc, kh, kw, stride)
    y = fused_linear(patches, w_packed, b_packed, relu=True,
                     out_dtype=jnp.bfloat16, n_valid=oc)
    return y.reshape(B, OH, OW, oc)


# ----------------------------------------------------------------------------
# Parameter init (matches AtariNet.reset_parameters: xavier_uniform, zero bias)
# ----------------------------------------------------------------------------
def _xavier_uniform(key, shape, fan_in, fan_out):
    a = math.sqrt(6.0 / (fan_in + fan_out))
    return jax.random.uniform(key, shape, jnp.float32, -a, a)


def init_atari_net_params(key, action_no, input_ch=1, hist_len=4,
                          hidden_size=256):
    in_depth = hist_len * input_ch
    k = jax.random.split(key, 5)

    def conv_w(kk, oc, ic, ksz):
        return _xavier_uniform(kk, (oc, ic, ksz, ksz),
                               ic * ksz * ksz, oc * ksz * ksz)

    return {
        "c1_w": conv_w(k[0], 32, in_depth, 8),
        "c1_b": jnp.zeros((32,), jnp.float32),
        "c2_w": conv_w(k[1], 64, 32, 4),
        "c2_b": jnp.zeros((64,), jnp.float32),
        "c3_w": conv_w(k[2], 64, 64, 3),
        "c3_b": jnp.zeros((64,), jnp.float32),
        "fc0_w": _xavier_uniform(k[3], (hidden_size, 64 * 7 * 7),
                                 64 * 7 * 7, hidden_size),
        "fc0_b": jnp.zeros((hidden_size,), jnp.float32),
        "fc1_w": _xavier_uniform(k[4], (action_no, hidden_size),
                                 hidden_size, action_no),
        "fc1_b": jnp.zeros((action_no,), jnp.float32),
    }


# ----------------------------------------------------------------------------
# One-time weight packing: transpose to GEMM layout, zero-pad to (Kp, Np),
# cast to bf16.  The 1/255 input normalization is folded into the conv1
# weights here, so the hot path never multiplies by the scale.
# ----------------------------------------------------------------------------
def pack_atari_net_params(params):
    def pack_w(w_kn, scale=1.0):
        K, N = w_kn.shape
        Kp, Np = _pad_k(K), _round_up(N, 128)
        w = (w_kn.astype(jnp.float32) * jnp.float32(scale)).astype(jnp.bfloat16)
        return jnp.zeros((Kp, Np), jnp.bfloat16).at[:K, :N].set(w)

    def pack_b(b):
        N = b.shape[0]
        Np = _round_up(N, 128)
        return jnp.zeros((1, Np), jnp.float32).at[0, :N].set(
            b.astype(jnp.float32))

    def conv_w_mat(w_oihw):
        # im2col feature order is ((kh, kw), C) -> weight (KH, KW, IC, OC).
        OC, IC, KH, KW = w_oihw.shape
        return jnp.transpose(w_oihw, (2, 3, 1, 0)).reshape(KH * KW * IC, OC)

    return {
        "c1_w": pack_w(conv_w_mat(params["c1_w"]), scale=1.0 / 255.0),
        "c1_b": pack_b(params["c1_b"]),
        "c2_w": pack_w(conv_w_mat(params["c2_w"])),
        "c2_b": pack_b(params["c2_b"]),
        "c3_w": pack_w(conv_w_mat(params["c3_w"])),
        "c3_b": pack_b(params["c3_b"]),
        "fc0_w": pack_w(params["fc0_w"].T),
        "fc0_b": pack_b(params["fc0_b"]),
        "fc1_w": pack_w(params["fc1_w"].T),
        "fc1_b": pack_b(params["fc1_b"]),
    }


# ----------------------------------------------------------------------------
# Full forward pass (support=None path -> returns qs of shape (B, action_no)).
# ----------------------------------------------------------------------------
def atari_net_forward(packed, x_uint8_nchw, *, action_no):
    assert x_uint8_nchw.dtype == jnp.uint8, "the model expects uint8 states"
    # /255 is folded into the packed conv1 weights; uint8 values are exact
    # in bf16 (<= 256), so the cast loses nothing.
    x = x_uint8_nchw.astype(jnp.bfloat16)
    x = jnp.transpose(x, (0, 2, 3, 1))                       # NCHW -> NHWC

    x = conv2d_relu(x, packed["c1_w"], packed["c1_b"],
                    kh=8, kw=8, stride=4, oc=32)             # (B,20,20,32)
    x = conv2d_relu(x, packed["c2_w"], packed["c2_b"],
                    kh=4, kw=4, stride=2, oc=64)             # (B,9,9,64)
    x = conv2d_relu(x, packed["c3_w"], packed["c3_b"],
                    kh=3, kw=3, stride=1, oc=64)             # (B,7,7,64)

    B = x.shape[0]
    # match torch's NCHW flatten x.view(B, -1)
    x = jnp.transpose(x, (0, 3, 1, 2)).reshape(B, -1)        # (B, 3136)

    qs = fused_head(x, packed["fc0_w"], packed["fc0_b"],
                    packed["fc1_w"], packed["fc1_b"], n_valid=action_no)
    # TODO(synk): distributional head (support != None -> softmax over atoms)
    # and spectral-norm hooks are not exercised by the default config and are
    # not implemented.
    return qs


if __name__ == "__main__":
    key = jax.random.PRNGKey(0)
    k_params, k_x = jax.random.split(key)

    ACTION_NO = 6
    raw_params = init_atari_net_params(k_params, ACTION_NO)
    packed = pack_atari_net_params(raw_params)   # one-time weight packing

    # AtariNet hard-codes the 64*7*7 flatten -> spatial must be 84x84.
    x = jax.random.randint(k_x, (2, 4, 84, 84), 0, 256,
                           dtype=jnp.int32).astype(jnp.uint8)

    forward = jax.jit(functools.partial(atari_net_forward,
                                        action_no=ACTION_NO))
    qs = forward(packed, x)
    qs = jax.block_until_ready(qs)
    assert qs.shape == (2, ACTION_NO) and qs.dtype == jnp.float32
    print("KERNEL_OK")
</pallas_src>

<mosaic_0001>
module attributes {stable_mosaic.version = 11 : i64} {
  func.func @_fused_linear_kernel(%arg0: i32, %arg1: i32, %arg2: memref<512x256xbf16, #tpu.memory_space<vmem>>, %arg3: memref<256x128xbf16, #tpu.memory_space<vmem>>, %arg4: memref<1x128xf32, #tpu.memory_space<vmem>>, %arg5: memref<512x128xbf16, #tpu.memory_space<vmem>>, %arg6: memref<512x128xf32, #tpu.memory_space<vmem>>) attributes {dimension_semantics = [#tpu.dimension_semantics<parallel>, #tpu.dimension_semantics<arbitrary>], iteration_bounds = array<i64: 2, 1>, scalar_prefetch = 0 : i64, scratch_operands = 1 : i64, tpu.core_type = #tpu.core_type<tc>, window_params = [{transform_indices = @transform_0, window_bounds = array<i64: 512, 256>}, {transform_indices = @transform_1, window_bounds = array<i64: 256, 128>}, {pipeline_mode = #tpu.pipeline_mode<synchronous>, transform_indices = @transform_2, window_bounds = array<i64: 1, 128>}, {transform_indices = @transform_3, window_bounds = array<i64: 512, 128>}]} {
    %c0_i32 = arith.constant 0 : i32
    %0 = arith.cmpi eq, %arg1, %c0_i32 : i32
    %1 = arith.extui %0 : i1 to i32
    %c0_i32_0 = arith.constant 0 : i32
    %2 = arith.cmpi ne, %1, %c0_i32_0 : i32
    scf.if %2 {
      %cst_10 = arith.constant 0.000000e+00 : f32
      %12 = vector.broadcast %cst_10 : f32 to vector<512x128xf32>
      %c0_11 = arith.constant 0 : index
      %c0_12 = arith.constant 0 : index
      %13 = vector.load %arg6[%c0_11, %c0_12] : memref<512x128xf32, #tpu.memory_space<vmem>>, vector<512x128xf32>
      tpu.vector_store %arg6[%c0_11, %c0_12], %12 {strides = array<i32>} : memref<512x128xf32, #tpu.memory_space<vmem>>, vector<512x128xf32>,
    } else {
    }
    %c0 = arith.constant 0 : index
    %c0_1 = arith.constant 0 : index
    %3 = vector.load %arg6[%c0, %c0_1] : memref<512x128xf32, #tpu.memory_space<vmem>>, vector<512x128xf32>
    %c0_2 = arith.constant 0 : index
    %c0_3 = arith.constant 0 : index
    %4 = vector.load %arg2[%c0_2, %c0_3] : memref<512x256xbf16, #tpu.memory_space<vmem>>, vector<512x256xbf16>
    %c0_4 = arith.constant 0 : index
    %c0_5 = arith.constant 0 : index
    %5 = vector.load %arg3[%c0_4, %c0_5] : memref<256x128xbf16, #tpu.memory_space<vmem>>, vector<256x128xbf16>
    %cst = arith.constant dense<0.000000e+00> : vector<512x128xf32>
    %6 = tpu.matmul %4, %5, %cst {dimension_numbers = #tpu.dot_dimension_numbers<[1], [0], [0], [1], [0, 0, 1, 1], [], []>} : vector<512x256xbf16>, vector<256x128xbf16>, vector<512x128xf32> -> vector<512x128xf32>
    %7 = arith.addf %3, %6 : vector<512x128xf32>
    %c0_6 = arith.constant 0 : index
    %c0_7 = arith.constant 0 : index
    %8 = vector.load %arg6[%c0_6, %c0_7] : memref<512x128xf32, #tpu.memory_space<vmem>>, vector<512x128xf32>
    tpu.vector_store %arg6[%c0_6, %c0_7], %7 {strides = array<i32>} : memref<512x128xf32, #tpu.memory_space<vmem>>, vector<512x128xf32>,
    %c0_i32_8 = arith.constant 0 : i32
    %9 = arith.cmpi eq, %arg1, %c0_i32_8 : i32
    %10 = arith.extui %9 : i1 to i32
    %c0_i32_9 = arith.constant 0 : i32
    %11 = arith.cmpi ne, %10, %c0_i32_9 : i32
    scf.if %11 {
      %c0_10 = arith.constant 0 : index
      %c0_11 = arith.constant 0 : index
      %12 = vector.load %arg6[%c0_10, %c0_11] : memref<512x128xf32, #tpu.memory_space<vmem>>, vector<512x128xf32>
      %c0_12 = arith.constant 0 : index
      %c0_13 = arith.constant 0 : index
      %13 = vector.load %arg4[%c0_12, %c0_13] : memref<1x128xf32, #tpu.memory_space<vmem>>, vector<1x128xf32>
      %14 = vector.broadcast %13 : vector<1x128xf32> to vector<512x128xf32>
      %15 = arith.addf %12, %14 : vector<512x128xf32>
      %cst_14 = arith.constant 0.000000e+00 : f32
      %16 = vector.broadcast %cst_14 : f32 to vector<512x128xf32>
      %17 = arith.maximumf %15, %16 : vector<512x128xf32>
      %18 = arith.truncf %17 : vector<512x128xf32> to vector<512x128xbf16>
      %c0_15 = arith.constant 0 : index
      %c0_16 = arith.constant 0 : index
      %19 = vector.load %arg5[%c0_15, %c0_16] : memref<512x128xbf16, #tpu.memory_space<vmem>>, vector<512x128xbf16>
      tpu.vector_store %arg5[%c0_15, %c0_16], %18 {strides = array<i32>} : memref<512x128xbf16, #tpu.memory_space<vmem>>, vector<512x128xbf16>,
    } else {
    }
    return
  }
  func.func @transform_0(%arg0: i32, %arg1: i32) -> (i32, i32) {
    %c0_i32 = arith.constant 0 : i32
    return %arg0, %arg1 : i32, i32
  }
  func.func @transform_1(%arg0: i32, %arg1: i32) -> (i32, i32) {
    %c0_i32 = arith.constant 0 : i32
    %c0_i32_0 = arith.constant 0 : i32
    return %arg1, %c0_i32 : i32, i32
  }
  func.func @transform_2(%arg0: i32, %arg1: i32) -> (i32, i32) {
    %c0_i32 = arith.constant 0 : i32
    %c0_i32_0 = arith.constant 0 : i32
    %c0_i32_1 = arith.constant 0 : i32
    return %c0_i32, %c0_i32_0 : i32, i32
  }
  func.func @transform_3(%arg0: i32, %arg1: i32) -> (i32, i32) {
    %c0_i32 = arith.constant 0 : i32
    %c0_i32_0 = arith.constant 0 : i32
    return %arg0, %c0_i32 : i32, i32
  }
}

module attributes {stable_mosaic.version = 11 : i64} {
  func.func @_fused_linear_kernel(%arg0: i32, %arg1: i32, %arg2: memref<168x512xbf16, #tpu.memory_space<vmem>>, %arg3: memref<512x128xbf16, #tpu.memory_space<vmem>>, %arg4: memref<1x128xf32, #tpu.memory_space<vmem>>, %arg5: memref<168x128xbf16, #tpu.memory_space<vmem>>, %arg6: memref<168x128xf32, #tpu.memory_space<vmem>>) attributes {dimension_semantics = [#tpu.dimension_semantics<parallel>, #tpu.dimension_semantics<arbitrary>], iteration_bounds = array<i64: 1, 1>, scalar_prefetch = 0 : i64, scratch_operands = 1 : i64, tpu.core_type = #tpu.core_type<tc>, window_params = [{transform_indices = @transform_0, window_bounds = array<i64: 168, 512>}, {transform_indices = @transform_1, window_bounds = array<i64: 512, 128>}, {pipeline_mode = #tpu.pipeline_mode<synchronous>, transform_indices = @transform_2, window_bounds = array<i64: 1, 128>}, {transform_indices = @transform_3, window_bounds = array<i64: 168, 128>}]} {
    %c0_i32 = arith.constant 0 : i32
    %0 = arith.cmpi eq, %arg1, %c0_i32 : i32
    %1 = arith.extui %0 : i1 to i32
    %c0_i32_0 = arith.constant 0 : i32
    %2 = arith.cmpi ne, %1, %c0_i32_0 : i32
    scf.if %2 {
      %cst_10 = arith.constant 0.000000e+00 : f32
      %12 = vector.broadcast %cst_10 : f32 to vector<168x128xf32>
      %c0_11 = arith.constant 0 : index
      %c0_12 = arith.constant 0 : index
      %13 = vector.load %arg6[%c0_11, %c0_12] : memref<168x128xf32, #tpu.memory_space<vmem>>, vector<168x128xf32>
      tpu.vector_store %arg6[%c0_11, %c0_12], %12 {strides = array<i32>} : memref<168x128xf32, #tpu.memory_space<vmem>>, vector<168x128xf32>,
    } else {
    }
    %c0 = arith.constant 0 : index
    %c0_1 = arith.constant 0 : index
    %3 = vector.load %arg6[%c0, %c0_1] : memref<168x128xf32, #tpu.memory_space<vmem>>, vector<168x128xf32>
    %c0_2 = arith.constant 0 : index
    %c0_3 = arith.constant 0 : index
    %4 = vector.load %arg2[%c0_2, %c0_3] : memref<168x512xbf16, #tpu.memory_space<vmem>>, vector<168x512xbf16>
    %c0_4 = arith.constant 0 : index
    %c0_5 = arith.constant 0 : index
    %5 = vector.load %arg3[%c0_4, %c0_5] : memref<512x128xbf16, #tpu.memory_space<vmem>>, vector<512x128xbf16>
    %cst = arith.constant dense<0.000000e+00> : vector<168x128xf32>
    %6 = tpu.matmul %4, %5, %cst {dimension_numbers = #tpu.dot_dimension_numbers<[1], [0], [0], [1], [0, 0, 1, 1], [], []>} : vector<168x512xbf16>, vector<512x128xbf16>, vector<168x128xf32> -> vector<168x128xf32>
    %7 = arith.addf %3, %6 : vector<168x128xf32>
    %c0_6 = arith.constant 0 : index
    %c0_7 = arith.constant 0 : index
    %8 = vector.load %arg6[%c0_6, %c0_7] : memref<168x128xf32, #tpu.memory_space<vmem>>, vector<168x128xf32>
    tpu.vector_store %arg6[%c0_6, %c0_7], %7 {strides = array<i32>} : memref<168x128xf32, #tpu.memory_space<vmem>>, vector<168x128xf32>,
    %c0_i32_8 = arith.constant 0 : i32
    %9 = arith.cmpi eq, %arg1, %c0_i32_8 : i32
    %10 = arith.extui %9 : i1 to i32
    %c0_i32_9 = arith.constant 0 : i32
    %11 = arith.cmpi ne, %10, %c0_i32_9 : i32
    scf.if %11 {
      %c0_10 = arith.constant 0 : index
      %c0_11 = arith.constant 0 : index
      %12 = vector.load %arg6[%c0_10, %c0_11] : memref<168x128xf32, #tpu.memory_space<vmem>>, vector<168x128xf32>
      %c0_12 = arith.constant 0 : index
      %c0_13 = arith.constant 0 : index
      %13 = vector.load %arg4[%c0_12, %c0_13] : memref<1x128xf32, #tpu.memory_space<vmem>>, vector<1x128xf32>
      %14 = vector.broadcast %13 : vector<1x128xf32> to vector<168x128xf32>
      %15 = arith.addf %12, %14 : vector<168x128xf32>
      %cst_14 = arith.constant 0.000000e+00 : f32
      %16 = vector.broadcast %cst_14 : f32 to vector<168x128xf32>
      %17 = arith.maximumf %15, %16 : vector<168x128xf32>
      %18 = arith.truncf %17 : vector<168x128xf32> to vector<168x128xbf16>
      %c0_15 = arith.constant 0 : index
      %c0_16 = arith.constant 0 : index
      %19 = vector.load %arg5[%c0_15, %c0_16] : memref<168x128xbf16, #tpu.memory_space<vmem>>, vector<168x128xbf16>
      tpu.vector_store %arg5[%c0_15, %c0_16], %18 {strides = array<i32>} : memref<168x128xbf16, #tpu.memory_space<vmem>>, vector<168x128xbf16>,
    } else {
    }
    return
  }
  func.func @transform_0(%arg0: i32, %arg1: i32) -> (i32, i32) {
    %c0_i32 = arith.constant 0 : i32
    return %arg0, %arg1 : i32, i32
  }
  func.func @transform_1(%arg0: i32, %arg1: i32) -> (i32, i32) {
    %c0_i32 = arith.constant 0 : i32
    %c0_i32_0 = arith.constant 0 : i32
    return %arg1, %c0_i32 : i32, i32
  }
  func.func @transform_2(%arg0: i32, %arg1: i32) -> (i32, i32) {
    %c0_i32 = arith.constant 0 : i32
    %c0_i32_0 = arith.constant 0 : i32
    %c0_i32_1 = arith.constant 0 : i32
    return %c0_i32, %c0_i32_0 : i32, i32
  }
  func.func @transform_3(%arg0: i32, %arg1: i32) -> (i32, i32) {
    %c0_i32 = arith.constant 0 : i32
    %c0_i32_0 = arith.constant 0 : i32
    return %arg0, %c0_i32 : i32, i32
  }
}

module attributes {stable_mosaic.version = 11 : i64} {
  func.func @_fused_linear_kernel(%arg0: i32, %arg1: i32, %arg2: memref<104x640xbf16, #tpu.memory_space<vmem>>, %arg3: memref<640x128xbf16, #tpu.memory_space<vmem>>, %arg4: memref<1x128xf32, #tpu.memory_space<vmem>>, %arg5: memref<104x128xbf16, #tpu.memory_space<vmem>>, %arg6: memref<104x128xf32, #tpu.memory_space<vmem>>) attributes {dimension_semantics = [#tpu.dimension_semantics<parallel>, #tpu.dimension_semantics<arbitrary>], iteration_bounds = array<i64: 1, 1>, scalar_prefetch = 0 : i64, scratch_operands = 1 : i64, tpu.core_type = #tpu.core_type<tc>, window_params = [{transform_indices = @transform_0, window_bounds = array<i64: 104, 640>}, {transform_indices = @transform_1, window_bounds = array<i64: 640, 128>}, {pipeline_mode = #tpu.pipeline_mode<synchronous>, transform_indices = @transform_2, window_bounds = array<i64: 1, 128>}, {transform_indices = @transform_3, window_bounds = array<i64: 104, 128>}]} {
    %c0_i32 = arith.constant 0 : i32
    %0 = arith.cmpi eq, %arg1, %c0_i32 : i32
    %1 = arith.extui %0 : i1 to i32
    %c0_i32_0 = arith.constant 0 : i32
    %2 = arith.cmpi ne, %1, %c0_i32_0 : i32
    scf.if %2 {
      %cst_10 = arith.constant 0.000000e+00 : f32
      %12 = vector.broadcast %cst_10 : f32 to vector<104x128xf32>
      %c0_11 = arith.constant 0 : index
      %c0_12 = arith.constant 0 : index
      %13 = vector.load %arg6[%c0_11, %c0_12] : memref<104x128xf32, #tpu.memory_space<vmem>>, vector<104x128xf32>
      tpu.vector_store %arg6[%c0_11, %c0_12], %12 {strides = array<i32>} : memref<104x128xf32, #tpu.memory_space<vmem>>, vector<104x128xf32>,
    } else {
    }
    %c0 = arith.constant 0 : index
    %c0_1 = arith.constant 0 : index
    %3 = vector.load %arg6[%c0, %c0_1] : memref<104x128xf32, #tpu.memory_space<vmem>>, vector<104x128xf32>
    %c0_2 = arith.constant 0 : index
    %c0_3 = arith.constant 0 : index
    %4 = vector.load %arg2[%c0_2, %c0_3] : memref<104x640xbf16, #tpu.memory_space<vmem>>, vector<104x640xbf16>
    %c0_4 = arith.constant 0 : index
    %c0_5 = arith.constant 0 : index
    %5 = vector.load %arg3[%c0_4, %c0_5] : memref<640x128xbf16, #tpu.memory_space<vmem>>, vector<640x128xbf16>
    %cst = arith.constant dense<0.000000e+00> : vector<104x128xf32>
    %6 = tpu.matmul %4, %5, %cst {dimension_numbers = #tpu.dot_dimension_numbers<[1], [0], [0], [1], [0, 0, 1, 1], [], []>} : vector<104x640xbf16>, vector<640x128xbf16>, vector<104x128xf32> -> vector<104x128xf32>
    %7 = arith.addf %3, %6 : vector<104x128xf32>
    %c0_6 = arith.constant 0 : index
    %c0_7 = arith.constant 0 : index
    %8 = vector.load %arg6[%c0_6, %c0_7] : memref<104x128xf32, #tpu.memory_space<vmem>>, vector<104x128xf32>
    tpu.vector_store %arg6[%c0_6, %c0_7], %7 {strides = array<i32>} : memref<104x128xf32, #tpu.memory_space<vmem>>, vector<104x128xf32>,
    %c0_i32_8 = arith.constant 0 : i32
    %9 = arith.cmpi eq, %arg1, %c0_i32_8 : i32
    %10 = arith.extui %9 : i1 to i32
    %c0_i32_9 = arith.constant 0 : i32
    %11 = arith.cmpi ne, %10, %c0_i32_9 : i32
    scf.if %11 {
      %c0_10 = arith.constant 0 : index
      %c0_11 = arith.constant 0 : index
      %12 = vector.load %arg6[%c0_10, %c0_11] : memref<104x128xf32, #tpu.memory_space<vmem>>, vector<104x128xf32>
      %c0_12 = arith.constant 0 : index
      %c0_13 = arith.constant 0 : index
      %13 = vector.load %arg4[%c0_12, %c0_13] : memref<1x128xf32, #tpu.memory_space<vmem>>, vector<1x128xf32>
      %14 = vector.broadcast %13 : vector<1x128xf32> to vector<104x128xf32>
      %15 = arith.addf %12, %14 : vector<104x128xf32>
      %cst_14 = arith.constant 0.000000e+00 : f32
      %16 = vector.broadcast %cst_14 : f32 to vector<104x128xf32>
      %17 = arith.maximumf %15, %16 : vector<104x128xf32>
      %18 = arith.truncf %17 : vector<104x128xf32> to vector<104x128xbf16>
      %c0_15 = arith.constant 0 : index
      %c0_16 = arith.constant 0 : index
      %19 = vector.load %arg5[%c0_15, %c0_16] : memref<104x128xbf16, #tpu.memory_space<vmem>>, vector<104x128xbf16>
      tpu.vector_store %arg5[%c0_15, %c0_16], %18 {strides = array<i32>} : memref<104x128xbf16, #tpu.memory_space<vmem>>, vector<104x128xbf16>,
    } else {
    }
    return
  }
  func.func @transform_0(%arg0: i32, %arg1: i32) -> (i32, i32) {
    %c0_i32 = arith.constant 0 : i32
    return %arg0, %arg1 : i32, i32
  }
  func.func @transform_1(%arg0: i32, %arg1: i32) -> (i32, i32) {
    %c0_i32 = arith.constant 0 : i32
    %c0_i32_0 = arith.constant 0 : i32
    return %arg1, %c0_i32 : i32, i32
  }
  func.func @transform_2(%arg0: i32, %arg1: i32) -> (i32, i32) {
    %c0_i32 = arith.constant 0 : i32
    %c0_i32_0 = arith.constant 0 : i32
    %c0_i32_1 = arith.constant 0 : i32
    return %c0_i32, %c0_i32_0 : i32, i32
  }
  func.func @transform_3(%arg0: i32, %arg1: i32) -> (i32, i32) {
    %c0_i32 = arith.constant 0 : i32
    %c0_i32_0 = arith.constant 0 : i32
    return %arg0, %c0_i32 : i32, i32
  }
}

module attributes {stable_mosaic.version = 11 : i64} {
  func.func @_head_kernel(%arg0: i32, %arg1: i32, %arg2: memref<8x3200xbf16, #tpu.memory_space<vmem>>, %arg3: memref<3200x256xbf16, #tpu.memory_space<vmem>>, %arg4: memref<1x256xf32, #tpu.memory_space<vmem>>, %arg5: memref<256x128xbf16, #tpu.memory_space<vmem>>, %arg6: memref<1x128xf32, #tpu.memory_space<vmem>>, %arg7: memref<8x128xf32, #tpu.memory_space<vmem>>, %arg8: memref<8x256xf32, #tpu.memory_space<vmem>>) attributes {dimension_semantics = [#tpu.dimension_semantics<parallel>, #tpu.dimension_semantics<arbitrary>], iteration_bounds = array<i64: 1, 1>, scalar_prefetch = 0 : i64, scratch_operands = 1 : i64, tpu.core_type = #tpu.core_type<tc>, window_params = [{transform_indices = @transform_0, window_bounds = array<i64: 8, 3200>}, {transform_indices = @transform_1, window_bounds = array<i64: 3200, 256>}, {pipeline_mode = #tpu.pipeline_mode<synchronous>, transform_indices = @transform_2, window_bounds = array<i64: 1, 256>}, {pipeline_mode = #tpu.pipeline_mode<synchronous>, transform_indices = @transform_3, window_bounds = array<i64: 256, 128>}, {pipeline_mode = #tpu.pipeline_mode<synchronous>, transform_indices = @transform_4, window_bounds = array<i64: 1, 128>}, {transform_indices = @transform_5, window_bounds = array<i64: 8, 128>}]} {
    %c0_i32 = arith.constant 0 : i32
    %0 = arith.cmpi eq, %arg1, %c0_i32 : i32
    %1 = arith.extui %0 : i1 to i32
    %c0_i32_0 = arith.constant 0 : i32
    %2 = arith.cmpi ne, %1, %c0_i32_0 : i32
    scf.if %2 {
      %cst_10 = arith.constant 0.000000e+00 : f32
      %12 = vector.broadcast %cst_10 : f32 to vector<8x256xf32>
      %c0_11 = arith.constant 0 : index
      %c0_12 = arith.constant 0 : index
      %13 = vector.load %arg8[%c0_11, %c0_12] : memref<8x256xf32, #tpu.memory_space<vmem>>, vector<8x256xf32>
      tpu.vector_store %arg8[%c0_11, %c0_12], %12 {strides = array<i32>} : memref<8x256xf32, #tpu.memory_space<vmem>>, vector<8x256xf32>,
    } else {
    }
    %c0 = arith.constant 0 : index
    %c0_1 = arith.constant 0 : index
    %3 = vector.load %arg8[%c0, %c0_1] : memref<8x256xf32, #tpu.memory_space<vmem>>, vector<8x256xf32>
    %c0_2 = arith.constant 0 : index
    %c0_3 = arith.constant 0 : index
    %4 = vector.load %arg2[%c0_2, %c0_3] : memref<8x3200xbf16, #tpu.memory_space<vmem>>, vector<8x3200xbf16>
    %c0_4 = arith.constant 0 : index
    %c0_5 = arith.constant 0 : index
    %5 = vector.load %arg3[%c0_4, %c0_5] : memref<3200x256xbf16, #tpu.memory_space<vmem>>, vector<3200x256xbf16>
    %cst = arith.constant dense<0.000000e+00> : vector<8x256xf32>
    %6 = tpu.matmul %4, %5, %cst {dimension_numbers = #tpu.dot_dimension_numbers<[1], [0], [0], [1], [0, 0, 1, 1], [], []>} : vector<8x3200xbf16>, vector<3200x256xbf16>, vector<8x256xf32> -> vector<8x256xf32>
    %7 = arith.addf %3, %6 : vector<8x256xf32>
    %c0_6 = arith.constant 0 : index
    %c0_7 = arith.constant 0 : index
    %8 = vector.load %arg8[%c0_6, %c0_7] : memref<8x256xf32, #tpu.memory_space<vmem>>, vector<8x256xf32>
    tpu.vector_store %arg8[%c0_6, %c0_7], %7 {strides = array<i32>} : memref<8x256xf32, #tpu.memory_space<vmem>>, vector<8x256xf32>,
    %c0_i32_8 = arith.constant 0 : i32
    %9 = arith.cmpi eq, %arg1, %c0_i32_8 : i32
    %10 = arith.extui %9 : i1 to i32
    %c0_i32_9 = arith.constant 0 : i32
    %11 = arith.cmpi ne, %10, %c0_i32_9 : i32
    scf.if %11 {
      %c0_10 = arith.constant 0 : index
      %c0_11 = arith.constant 0 : index
      %12 = vector.load %arg8[%c0_10, %c0_11] : memref<8x256xf32, #tpu.memory_space<vmem>>, vector<8x256xf32>
      %c0_12 = arith.constant 0 : index
      %c0_13 = arith.constant 0 : index
      %13 = vector.load %arg4[%c0_12, %c0_13] : memref<1x256xf32, #tpu.memory_space<vmem>>, vector<1x256xf32>
      %14 = vector.broadcast %13 : vector<1x256xf32> to vector<8x256xf32>
      %15 = arith.addf %12, %14 : vector<8x256xf32>
      %cst_14 = arith.constant 0.000000e+00 : f32
      %16 = vector.broadcast %cst_14 : f32 to vector<8x256xf32>
      %17 = arith.maximumf %15, %16 : vector<8x256xf32>
      %18 = arith.truncf %17 : vector<8x256xf32> to vector<8x256xbf16>
      %c0_15 = arith.constant 0 : index
      %c0_16 = arith.constant 0 : index
      %19 = vector.load %arg5[%c0_15, %c0_16] : memref<256x128xbf16, #tpu.memory_space<vmem>>, vector<256x128xbf16>
      %cst_17 = arith.constant dense<0.000000e+00> : vector<8x128xf32>
      %20 = tpu.matmul %18, %19, %cst_17 {dimension_numbers = #tpu.dot_dimension_numbers<[1], [0], [0], [1], [0, 0, 1, 1], [], []>} : vector<8x256xbf16>, vector<256x128xbf16>, vector<8x128xf32> -> vector<8x128xf32>
      %c0_18 = arith.constant 0 : index
      %c0_19 = arith.constant 0 : index
      %21 = vector.load %arg6[%c0_18, %c0_19] : memref<1x128xf32, #tpu.memory_space<vmem>>, vector<1x128xf32>
      %22 = vector.broadcast %21 : vector<1x128xf32> to vector<8x128xf32>
      %23 = arith.addf %20, %22 : vector<8x128xf32>
      %c0_20 = arith.constant 0 : index
      %c0_21 = arith.constant 0 : index
      %24 = vector.load %arg7[%c0_20, %c0_21] : memref<8x128xf32, #tpu.memory_space<vmem>>, vector<8x128xf32>
      tpu.vector_store %arg7[%c0_20, %c0_21], %23 {strides = array<i32>} : memref<8x128xf32, #tpu.memory_space<vmem>>, vector<8x128xf32>,
    } else {
    }
    return
  }
  func.func @transform_0(%arg0: i32, %arg1: i32) -> (i32, i32) {
    %c0_i32 = arith.constant 0 : i32
    return %arg0, %arg1 : i32, i32
  }
  func.func @transform_1(%arg0: i32, %arg1: i32) -> (i32, i32) {
    %c0_i32 = arith.constant 0 : i32
    %c0_i32_0 = arith.constant 0 : i32
    return %arg1, %c0_i32 : i32, i32
  }
  func.func @transform_2(%arg0: i32, %arg1: i32) -> (i32, i32) {
    %c0_i32 = arith.constant 0 : i32
    %c0_i32_0 = arith.constant 0 : i32
    %c0_i32_1 = arith.constant 0 : i32
    return %c0_i32, %c0_i32_0 : i32, i32
  }
  func.func @transform_3(%arg0: i32, %arg1: i32) -> (i32, i32) {
    %c0_i32 = arith.constant 0 : i32
    %c0_i32_0 = arith.constant 0 : i32
    %c0_i32_1 = arith.constant 0 : i32
    return %c0_i32, %c0_i32_0 : i32, i32
  }
  func.func @transform_4(%arg0: i32, %arg1: i32) -> (i32, i32) {
    %c0_i32 = arith.constant 0 : i32
    %c0_i32_0 = arith.constant 0 : i32
    %c0_i32_1 = arith.constant 0 : i32
    return %c0_i32, %c0_i32_0 : i32, i32
  }
  func.func @transform_5(%arg0: i32, %arg1: i32) -> (i32, i32) {
    %c0_i32 = arith.constant 0 : i32
    %c0_i32_0 = arith.constant 0 : i32
    return %arg0, %c0_i32 : i32, i32
  }
}

</mosaic_0001>

<bundles_post_ra>
// kernel: atari_net_forward.4
= control target key start
LH: loop header
LB: loop body
LE: loop exit
PB: predicated region body
PF: predicated region fallthrough
CT: control target
= control target key end

     0   :  { %s2525_s12 = smov 0   ;;  %s2527_s13 = smov 0   ;;  %s2811_s0 = inlined_call_operand.vmem [shape: bf16[1024,256], index: 0, kind: input, shape index: {}]   ;;  %s2812_s1 = inlined_call_operand.vmem [shape: bf16[256,128], index: 1, kind: input, shape index: {}]   ;;  %s2813_s2 = inlined_call_operand.vmem [shape: f32[1,128], index: 2, kind: input, shape index: {}]   ;;  %s2814_s3 = inlined_call_operand.vmem [shape: bf16[1024,128], index: 3, kind: output, shape index: {}]  }
   0x1   :  { %s2529_s14 = smov 0  }
   0x2 LB: > { %s25_s15 = sadd.s32 1, %s2498_s13  ;;  %p1902_p0 = scmp.ge.s32.totalorder %s2502_s14, 1  ;;  %s2502_s14 = sphi %s2529_s14, %s13_s14   ;;  %s2498_s13 = sphi %s2527_s13, %s2816_s13   ;;  %s2494_s12 = sphi %s2525_s12, %s2815_s12  }
   0x3   : > { %p27_p1 = scmp.ge.s32.totalorder %s25_s15, 2  ;;  %p169_p2 = scmp.lt.s32.totalorder %s2502_s14, 3 }
   0x5   : > { %s2818_s15 = smov (%p27_p1, %s25_s15), 0  ;;  %p170_p3 = pnand %p1902_p0, %p169_p2 }
   0x6   : > { %s1903_s18 = sshll.u32 (!%p170_p3), %s2494_s12, 6 }
   0x7   : > { %173 = sbr.rel (%p170_p3) target bundleno = 401 (0x191), region = 32  ;;  %p205_p4 = scmp.lt.s32.totalorder (!%p170_p3), %s1903_s18, 127 }
   0xc   : > { %v2368_v0 = vld [vmem:[%s2812_s1 + $0x38] sm:$0xff]   ;;  %v2504_v1 = vmov 0   ;;  %v2369_v2 = vld [vmem:[%s2812_s1 + $0x30] sm:$0xff]   ;;  %v2370_v3 = vld [vmem:[%s2812_s1 + $0x28] sm:$0xff]   ;;  %s2820_s18 = smov (!%p205_p4, %s1903_s18), 127 }
   0xd   : > { %872 = vmatprep.subr.bf16.mxu0 %v2504_v1  ;;  %2311 = vmatprep.subr.bf16.mxu1 %v2504_v1  ;;  %v2371_v4 = vld [vmem:[%s2812_s1 + $0x20] sm:$0xff]   ;;  %s2055_s25 = sshll.u32 %s2820_s18, 3  ;;  %v2372_v5 = vld [vmem:[%s2812_s1 + $0x18] sm:$0xff]   ;;  %v2373_v7 = vld [vmem:[%s2812_s1 + $0x10] sm:$0xff]   ;;  %s1907_s6 = sshll.u32 %s2820_s18, 2 }
   0xe   : > { %873 = vmatpush1.bf16.msra.mxu0 %v2368_v0  ;;  %2327 = vmatpush1.bf16.msra.mxu1 %v2368_v0  ;;  %s2572_s30 = scalar_lea.vmem %s2811_s0, %s2055_s25  ;;  %v2374_v9 = vld [vmem:[%s2812_s1 + $0x8] sm:$0xff]   ;;  %v2375_v10 = vld [vmem:[%s2812_s1] sm:$0xff]   ;;  %v2376_v11 = vld [vmem:[%s2812_s1 + $0x78] sm:$0xff]   ;;  %s2708_s8 = scalar_lea.vmem %s2814_s3, %s1907_s6 }
   0xf   : > { %874 = vmatprep.subr.bf16.mxu0 %v2504_v1  ;;  %2312 = vmatprep.subr.bf16.mxu1 %v2504_v1  ;;  %v2386_v6 = vld [vmem:[%s2572_s30 + $0x4] ss:$8 sps:$4 sm:$0xff]   ;;  %v2377_v12 = vld [vmem:[%s2812_s1 + $0x70] sm:$0xff]   ;;  %v2380_v15 = vld [vmem:[%s2812_s1 + $0x58] sm:$0xff]  }
  0x10   : > { %v2389_v8 = vld [vmem:[%s2572_s30 + $0x104] ss:$8 sps:$4 sm:$0xff]   ;;  %904 = vmatprep.mubr.bf16.mxu0 %v2386_v6  ;;  %v2381_v16 = vld [vmem:[%s2812_s1 + $0x50] sm:$0xff]   ;;  %v2384_v19 = vld [vmem:[%s2572_s30] ss:$8 sps:$4 sm:$0xff]  }
  0x11   : > { %1032 = vmatprep.mubr.bf16.mxu1 %v2389_v8  ;;  %v2378_v13 = vld [vmem:[%s2812_s1 + $0x68] sm:$0xff]   ;;  %v2379_v14 = vld [vmem:[%s2812_s1 + $0x60] sm:$0xff]   ;;  %v2390_v21 = vld [vmem:[%s2572_s30 + $0x14] ss:$8 sps:$4 sm:$0xff]  }
  0x12   : > { %875 = vmatpush1.bf16.msra.mxu0 %v2369_v2  ;;  %2328 = vmatpush1.bf16.msra.mxu1 %v2369_v2  ;;  %v2382_v17 = vld [vmem:[%s2812_s1 + $0x48] sm:$0xff]   ;;  %v2383_v18 = vld [vmem:[%s2812_s1 + $0x40] sm:$0xff]   ;;  %v2392_v22 = vld [vmem:[%s2572_s30 + $0x114] ss:$8 sps:$4 sm:$0xff]  }
  0x13   : > { %876 = vmatprep.subr.bf16.mxu0 %v2504_v1  ;;  %2313 = vmatprep.subr.bf16.mxu1 %v2504_v1  ;;  %v2387_v20 = vld [vmem:[%s2572_s30 + $0x100] ss:$8 sps:$4 sm:$0xff]   ;;  %v2394_v23 = vld [vmem:[%s2572_s30 + $0x10] ss:$8 sps:$4 sm:$0xff]   ;;  %v2396_v25 = vld [vmem:[%s2572_s30 + $0x24] ss:$8 sps:$4 sm:$0xff]  }
  0x14   : > { %v2395_v24 = vld [vmem:[%s2572_s30 + $0x110] ss:$8 sps:$4 sm:$0xff]   ;;  %v2398_v26 = vld [vmem:[%s2572_s30 + $0x124] ss:$8 sps:$4 sm:$0xff]   ;;  %v2400_v27 = vld [vmem:[%s2572_s30 + $0x20] ss:$8 sps:$4 sm:$0xff]  }
  0x15   : > { %v2401_v28 = vld [vmem:[%s2572_s30 + $0x120] ss:$8 sps:$4 sm:$0xff]   ;;  %v2402_v29 = vld [vmem:[%s2572_s30 + $0x34] ss:$8 sps:$4 sm:$0xff]   ;;  %v2406_v31 = vld [vmem:[%s2572_s30 + $0x30] ss:$8 sps:$4 sm:$0xff]  }
  0x16   : > { %877 = vmatpush1.bf16.msra.mxu0 %v2370_v3  ;;  %2329 = vmatpush1.bf16.msra.mxu1 %v2370_v3  ;;  %v2404_v30 = vld [vmem:[%s2572_s30 + $0x134] ss:$8 sps:$4 sm:$0xff]   ;;  %v2407_v32 = vld [vmem:[%s2572_s30 + $0x130] ss:$8 sps:$4 sm:$0xff]   ;;  %v2408_v33 = vld [vmem:[%s2572_s30 + $0x44] ss:$8 sps:$4 sm:$0xff]  }
  0x17   : > { %878 = vmatprep.subr.bf16.mxu0 %v2504_v1  ;;  %2314 = vmatprep.subr.bf16.mxu1 %v2504_v1  ;;  %v2410_v34 = vld [vmem:[%s2572_s30 + $0x144] ss:$8 sps:$4 sm:$0xff]   ;;  %v2412_v35 = vld [vmem:[%s2572_s30 + $0x40] ss:$8 sps:$4 sm:$0xff]   ;;  %v2414_v37 = vld [vmem:[%s2572_s30 + $0x54] ss:$8 sps:$4 sm:$0xff]  }
  0x18   : > { %v2413_v36 = vld [vmem:[%s2572_s30 + $0x140] ss:$8 sps:$4 sm:$0xff]   ;;  %v2416_v38 = vld [vmem:[%s2572_s30 + $0x154] ss:$8 sps:$4 sm:$0xff]   ;;  %v2418_v39 = vld [vmem:[%s2572_s30 + $0x50] ss:$8 sps:$4 sm:$0xff]  }
  0x19   : > { %v2419_v40 = vld [vmem:[%s2572_s30 + $0x150] ss:$8 sps:$4 sm:$0xff]   ;;  %v2420_v41 = vld [vmem:[%s2572_s30 + $0x64] ss:$8 sps:$4 sm:$0xff]   ;;  %v2424_v43 = vld [vmem:[%s2572_s30 + $0x60] ss:$8 sps:$4 sm:$0xff]  }
  0x1a   : > { %879 = vmatpush1.bf16.msra.mxu0 %v2371_v4  ;;  %2330 = vmatpush1.bf16.msra.mxu1 %v2371_v4  ;;  %v2422_v42 = vld [vmem:[%s2572_s30 + $0x164] ss:$8 sps:$4 sm:$0xff]   ;;  %v2425_v44 = vld [vmem:[%s2572_s30 + $0x160] ss:$8 sps:$4 sm:$0xff]   ;;  %v2426_v45 = vld [vmem:[%s2572_s30 + $0x74] ss:$8 sps:$4 sm:$0xff]  }
  0x1b   : > { %880 = vmatprep.subr.bf16.mxu0 %v2504_v1  ;;  %2315 = vmatprep.subr.bf16.mxu1 %v2504_v1  ;;  %v2428_v46 = vld [vmem:[%s2572_s30 + $0x174] ss:$8 sps:$4 sm:$0xff]   ;;  %v2430_v47 = vld [vmem:[%s2572_s30 + $0x70] ss:$8 sps:$4 sm:$0xff]   ;;  %v2432_v49 = vld [vmem:[%s2572_s30 + $0x84] ss:$8 sps:$4 sm:$0xff]  }
  0x1c   : > { %v2431_v48 = vld [vmem:[%s2572_s30 + $0x170] ss:$8 sps:$4 sm:$0xff]   ;;  %v2434_v50 = vld [vmem:[%s2572_s30 + $0x184] ss:$8 sps:$4 sm:$0xff]   ;;  %v2436_v51 = vld [vmem:[%s2572_s30 + $0x80] ss:$8 sps:$4 sm:$0xff]  }
  0x1d   : > { %v2437_v52 = vld [vmem:[%s2572_s30 + $0x180] ss:$8 sps:$4 sm:$0xff]   ;;  %v2438_v53 = vld [vmem:[%s2572_s30 + $0x94] ss:$8 sps:$4 sm:$0xff]   ;;  %v2442_v55 = vld [vmem:[%s2572_s30 + $0x90] ss:$8 sps:$4 sm:$0xff]  }
  0x1e   : > { %881 = vmatpush1.bf16.msra.mxu0 %v2372_v5  ;;  %2331 = vmatpush1.bf16.msra.mxu1 %v2372_v5  ;;  %v2440_v54 = vld [vmem:[%s2572_s30 + $0x194] ss:$8 sps:$4 sm:$0xff]   ;;  %v2443_v56 = vld [vmem:[%s2572_s30 + $0x190] ss:$8 sps:$4 sm:$0xff]   ;;  %v2444_v57 = vld [vmem:[%s2572_s30 + $0xa4] ss:$8 sps:$4 sm:$0xff]  }
  0x1f   : > { %882 = vmatprep.subr.bf16.mxu0 %v2504_v1  ;;  %2316 = vmatprep.subr.bf16.mxu1 %v2504_v1  ;;  %v2446_v58 = vld [vmem:[%s2572_s30 + $0x1a4] ss:$8 sps:$4 sm:$0xff]   ;;  %v2448_v59 = vld [vmem:[%s2572_s30 + $0xa0] ss:$8 sps:$4 sm:$0xff]   ;;  %v2450_v61 = vld [vmem:[%s2572_s30 + $0xb4] ss:$8 sps:$4 sm:$0xff]  }
  0x20   : > { %v2449_v60 = vld [vmem:[%s2572_s30 + $0x1a0] ss:$8 sps:$4 sm:$0xff]   ;;  %v2452_v62 = vld [vmem:[%s2572_s30 + $0x1b4] ss:$8 sps:$4 sm:$0xff]   ;;  %v2454_v63 = vld [vmem:[%s2572_s30 + $0xb0] ss:$8 sps:$4 sm:$0xff]  }
  0x21   : > { %v2455_v0 = vld [vmem:[%s2572_s30 + $0x1b0] ss:$8 sps:$4 sm:$0xff]   ;;  %v2458_v2 = vld [vmem:[%s2572_s30 + $0x1c4] ss:$8 sps:$4 sm:$0xff]   ;;  %v2460_v3 = vld [vmem:[%s2572_s30 + $0xc0] ss:$8 sps:$4 sm:$0xff]  }
  0x22   : > { %883 = vmatpush1.bf16.msra.mxu0 %v2373_v7  ;;  %2332 = vmatpush1.bf16.msra.mxu1 %v2373_v7  ;;  %v2461_v4 = vld [vmem:[%s2572_s30 + $0x1c0] ss:$8 sps:$4 sm:$0xff]   ;;  %v2462_v5 = vld [vmem:[%s2572_s30 + $0xd4] ss:$8 sps:$4 sm:$0xff]   ;;  %v2466_v7 = vld [vmem:[%s2572_s30 + $0xd0] ss:$8 sps:$4 sm:$0xff]  }
  0x23   : > { %884 = vmatprep.subr.bf16.mxu0 %v2504_v1  ;;  %2317 = vmatprep.subr.bf16.mxu1 %v2504_v1  ;;  %v2464_v6 = vld [vmem:[%s2572_s30 + $0x1d4] ss:$8 sps:$4 sm:$0xff]   ;;  %v2467_v8 = vld [vmem:[%s2572_s30 + $0x1d0] ss:$8 sps:$4 sm:$0xff]  }
  0x26   : > { %885 = vmatpush1.bf16.msra.mxu0 %v2374_v9  ;;  %2333 = vmatpush1.bf16.msra.mxu1 %v2374_v9  ;;  %v2468_v9 = vld [vmem:[%s2572_s30 + $0xe4] ss:$8 sps:$4 sm:$0xff]  }
  0x27   : > { %886 = vmatprep.subr.bf16.mxu0 %v2504_v1  ;;  %2318 = vmatprep.subr.bf16.mxu1 %v2504_v1 }
  0x2a   : > { %887 = vmatpush1.bf16.msra.mxu0 %v2375_v10  ;;  %2334 = vmatpush1.bf16.msra.mxu1 %v2375_v10  ;;  %v2470_v10 = vld [vmem:[%s2572_s30 + $0x1e4] ss:$8 sps:$4 sm:$0xff]  }
  0x2b   : > { %888 = vmatprep.subr.bf16.mxu0 %v2504_v1  ;;  %2319 = vmatprep.subr.bf16.mxu1 %v2504_v1 }
  0x2e   : > { %889 = vmatpush2.bf16.msra.mxu0 %v2376_v11  ;;  %2335 = vmatpush2.bf16.msra.mxu1 %v2376_v11  ;;  %v2472_v11 = vld [vmem:[%s2572_s30 + $0xe0] ss:$8 sps:$4 sm:$0xff]  }
  0x2f   : > { %890 = vmatprep.subr.bf16.mxu0 %v2504_v1  ;;  %2320 = vmatprep.subr.bf16.mxu1 %v2504_v1 }
  0x32   : > { %891 = vmatpush2.bf16.msra.mxu0 %v2377_v12  ;;  %2336 = vmatpush2.bf16.msra.mxu1 %v2377_v12  ;;  %v2473_v12 = vld [vmem:[%s2572_s30 + $0x1e0] ss:$8 sps:$4 sm:$0xff]  }
  0x33   : > { %892 = vmatprep.subr.bf16.mxu0 %v2504_v1  ;;  %2321 = vmatprep.subr.bf16.mxu1 %v2504_v1 }
  0x36   : > { %893 = vmatpush2.bf16.msra.mxu0 %v2378_v13  ;;  %2337 = vmatpush2.bf16.msra.mxu1 %v2378_v13  ;;  %v2474_v13 = vld [vmem:[%s2572_s30 + $0xf4] ss:$8 sps:$4 sm:$0xff]  }
  0x37   : > { %894 = vmatprep.subr.bf16.mxu0 %v2504_v1  ;;  %2322 = vmatprep.subr.bf16.mxu1 %v2504_v1 }
  0x3a   : > { %895 = vmatpush2.bf16.msra.mxu0 %v2379_v14  ;;  %2338 = vmatpush2.bf16.msra.mxu1 %v2379_v14  ;;  %v2476_v14 = vld [vmem:[%s2572_s30 + $0x1f4] ss:$8 sps:$4 sm:$0xff]  }
  0x3b   : > { %896 = vmatprep.subr.bf16.mxu0 %v2504_v1  ;;  %2323 = vmatprep.subr.bf16.mxu1 %v2504_v1 }
  0x3e   : > { %897 = vmatpush2.bf16.msra.mxu0 %v2380_v15  ;;  %2339 = vmatpush2.bf16.msra.mxu1 %v2380_v15  ;;  %v2478_v15 = vld [vmem:[%s2572_s30 + $0xf0] ss:$8 sps:$4 sm:$0xff]  }
  0x3f   : > { %898 = vmatprep.subr.bf16.mxu0 %v2504_v1  ;;  %2324 = vmatprep.subr.bf16.mxu1 %v2504_v1 }
  0x42   : > { %899 = vmatpush2.bf16.msra.mxu0 %v2381_v16  ;;  %2340 = vmatpush2.bf16.msra.mxu1 %v2381_v16  ;;  %v2479_v16 = vld [vmem:[%s2572_s30 + $0x1f0] ss:$8 sps:$4 sm:$0xff]  }
  0x43   : > { %900 = vmatprep.subr.bf16.mxu0 %v2504_v1  ;;  %2325 = vmatprep.subr.bf16.mxu1 %v2504_v1 }
  0x46   : > { %901 = vmatpush2.bf16.msra.mxu0 %v2382_v17  ;;  %2341 = vmatpush2.bf16.msra.mxu1 %v2382_v17 }
  0x47   : > { %902 = vmatprep.subr.bf16.mxu0 %v2504_v1  ;;  %2326 = vmatprep.subr.bf16.mxu1 %v2504_v1  ;;  %v2456_v1 = vld [vmem:[%s2572_s30 + $0xc4] ss:$8 sps:$4 sm:$0xff]  }
  0x4a   : > { %903 = vmatpush2.bf16.msra.mxu0 %v2383_v18  ;;  %2342 = vmatpush2.bf16.msra.mxu1 %v2383_v18  ;;  %v2698_v18 = vld [vmem:[%s2813_s2] ss:$0 sm:$0xff] }
  0x4d   : > { %905 = vmatmul.mubr.bf16.vlgmr.msra.gmra.mxu0 %v2384_v19  ;;  %1033 = vmatmul.mubr.bf16.vlgmr.msra.gmra.mxu1 %v2387_v20 }
  0x4e   : > { %912 = vmatprep.mubr.bf16.mxu0 %v2390_v21  ;;  %1040 = vmatprep.mubr.bf16.mxu1 %v2392_v22 }
  0x55   : > { %913 = vmatmul.mubr.bf16.gmra.mxu0 %v2394_v23  ;;  %1041 = vmatmul.mubr.bf16.gmra.mxu1 %v2395_v24 }
  0x56   : > { %920 = vmatprep.mubr.bf16.mxu0 %v2396_v25  ;;  %1048 = vmatprep.mubr.bf16.mxu1 %v2398_v26 }
  0x5d   : > { %921 = vmatmul.mubr.bf16.gmra.mxu0 %v2400_v27  ;;  %1049 = vmatmul.mubr.bf16.gmra.mxu1 %v2401_v28 }
  0x5e   : > { %928 = vmatprep.mubr.bf16.mxu0 %v2402_v29  ;;  %1056 = vmatprep.mubr.bf16.mxu1 %v2404_v30 }
  0x65   : > { %929 = vmatmul.mubr.bf16.gmra.mxu0 %v2406_v31  ;;  %1057 = vmatmul.mubr.bf16.gmra.mxu1 %v2407_v32 }
  0x66   : > { %936 = vmatprep.mubr.bf16.mxu0 %v2408_v33  ;;  %1064 = vmatprep.mubr.bf16.mxu1 %v2410_v34 }
  0x6d   : > { %937 = vmatmul.mubr.bf16.gmra.mxu0 %v2412_v35  ;;  %1065 = vmatmul.mubr.bf16.gmra.mxu1 %v2413_v36 }
  0x6e   : > { %944 = vmatprep.mubr.bf16.mxu0 %v2414_v37  ;;  %1072 = vmatprep.mubr.bf16.mxu1 %v2416_v38 }
  0x75   : > { %945 = vmatmul.mubr.bf16.gmra.mxu0 %v2418_v39  ;;  %1073 = vmatmul.mubr.bf16.gmra.mxu1 %v2419_v40 }
  0x76   : > { %952 = vmatprep.mubr.bf16.mxu0 %v2420_v41  ;;  %1080 = vmatprep.mubr.bf16.mxu1 %v2422_v42 }
  0x7d   : > { %953 = vmatmul.mubr.bf16.gmra.mxu0 %v2424_v43  ;;  %1081 = vmatmul.mubr.bf16.gmra.mxu1 %v2425_v44 }
  0x7e   : > { %960 = vmatprep.mubr.bf16.mxu0 %v2426_v45  ;;  %1088 = vmatprep.mubr.bf16.mxu1 %v2428_v46 }
  0x85   : > { %961 = vmatmul.mubr.bf16.gmra.mxu0 %v2430_v47  ;;  %1089 = vmatmul.mubr.bf16.gmra.mxu1 %v2431_v48 }
  0x86   : > { %968 = vmatprep.mubr.bf16.mxu0 %v2432_v49  ;;  %1096 = vmatprep.mubr.bf16.mxu1 %v2434_v50 }
  0x8d   : > { %969 = vmatmul.mubr.bf16.gmra.mxu0 %v2436_v51  ;;  %1097 = vmatmul.mubr.bf16.gmra.mxu1 %v2437_v52 }
  0x8e   : > { %976 = vmatprep.mubr.bf16.mxu0 %v2438_v53  ;;  %1104 = vmatprep.mubr.bf16.mxu1 %v2440_v54 }
  0x95   : > { %977 = vmatmul.mubr.bf16.gmra.mxu0 %v2442_v55  ;;  %1105 = vmatmul.mubr.bf16.gmra.mxu1 %v2443_v56 }
  0x96   : > { %984 = vmatprep.mubr.bf16.mxu0 %v2444_v57  ;;  %1112 = vmatprep.mubr.bf16.mxu1 %v2446_v58 }
  0x9d   : > { %985 = vmatmul.mubr.bf16.gmra.mxu0 %v2448_v59  ;;  %1113 = vmatmul.mubr.bf16.gmra.mxu1 %v2449_v60 }
  0x9e   : > { %992 = vmatprep.mubr.bf16.mxu0 %v2450_v61  ;;  %1120 = vmatprep.mubr.bf16.mxu1 %v2452_v62 }
  0xa5   : > { %993 = vmatmul.mubr.bf16.gmra.mxu0 %v2454_v63  ;;  %1121 = vmatmul.mubr.bf16.gmra.mxu1 %v2455_v0 }
  0xa6   : > { %1000 = vmatprep.mubr.bf16.mxu0 %v2456_v1  ;;  %1128 = vmatprep.mubr.bf16.mxu1 %v2458_v2 }
  0xad   : > { %1001 = vmatmul.mubr.bf16.gmra.mxu0 %v2460_v3  ;;  %1129 = vmatmul.mubr.bf16.gmra.mxu1 %v2461_v4 }
  0xae   : > { %1008 = vmatprep.mubr.bf16.mxu0 %v2462_v5  ;;  %1136 = vmatprep.mubr.bf16.mxu1 %v2464_v6 }
  0xb5   : > { %1009 = vmatmul.mubr.bf16.gmra.mxu0 %v2466_v7  ;;  %1137 = vmatmul.mubr.bf16.gmra.mxu1 %v2467_v8 }
  0xb6   : > { %1016 = vmatprep.mubr.bf16.mxu0 %v2468_v9  ;;  %1144 = vmatprep.mubr.bf16.mxu1 %v2470_v10 }
  0xbd   : > { %1017 = vmatmul.mubr.bf16.gmra.mxu0 %v2472_v11  ;;  %1145 = vmatmul.mubr.bf16.gmra.mxu1 %v2473_v12 }
  0xbe   : > { %1024 = vmatprep.mubr.bf16.mxu0 %v2474_v13  ;;  %1152 = vmatprep.mubr.bf16.mxu1 %v2476_v14 }
  0xc5   : > { %1025 = vmatmul.mubr.bf16.gmra.mxu0 %v2478_v15  ;;  %1153 = vmatmul.mubr.bf16.gmra.mxu1 %v2479_v16 }
 0x10d   : > { %v906_v17 = vpop.f32.mrf.mxu0  ;;  %v1034_v19 = vpop.f32.mrf.mxu1 }
 0x10e   : > { %v1363_v22 = vadd.f32 %v2698_v18, %v906_v17  ;;  %v1395_v23 = vadd.f32 %v2698_v18, %v1034_v19 }
 0x10f   : > { %v908_v20 = vpop.f32.mrf.mxu0  ;;  %v1036_v21 = vpop.f32.mrf.mxu1 }
 0x110   : > { %v1427_v30 = vmax.f32 %v1363_v22, 0.0  ;;  %v1459_v31 = vmax.f32 %v1395_v23, 0.0 }
 0x111   : > { %v909_v24 = vpop.f32.mrf.mxu0  ;;  %v1037_v25 = vpop.f32.mrf.mxu1 }
 0x112   : > { %v1364_v26 = vadd.f32 %v2698_v18, %v909_v24  ;;  %v1396_v27 = vadd.f32 %v2698_v18, %v1037_v25 }
 0x113   : > { %v911_v28 = vpop.f32.mrf.mxu0  ;;  %v1039_v29 = vpop.f32.mrf.mxu1 }
 0x114   : > { %v1428_v32 = vmax.f32 %v1364_v26, 0.0  ;;  %v1460_v33 = vmax.f32 %v1396_v27, 0.0 }
 0x115   : > { %v914_v34 = vpop.f32.mrf.mxu0  ;;  %v1042_v35 = vpop.f32.mrf.mxu1 }
 0x116   : > { %v2123_v36 = vpack.c.bf16 %v1428_v32, %v1427_v30  ;;  %v2203_v37 = vpack.c.bf16 %v1460_v33, %v1459_v31  ;;  %v1365_v40 = vadd.f32 %v2698_v18, %v914_v34  ;;  %v1397_v41 = vadd.f32 %v2698_v18, %v1042_v35 }
 0x117   : > { %v916_v38 = vpop.f32.mrf.mxu0  ;;  %v1044_v39 = vpop.f32.mrf.mxu1 }
 0x118   : > { %2124 = vst [vmem:[%s2708_s8] sm:$0xff] %v2123_v36   ;;  %2295 = vst [vmem:[%s2708_s8 + $0x80] sm:$0xff] %v2203_v37   ;;  %v1429_v48 = vmax.f32 %v1365_v40, 0.0  ;;  %v1461_v49 = vmax.f32 %v1397_v41, 0.0 }
 0x119   : > { %v917_v42 = vpop.f32.mrf.mxu0  ;;  %v1045_v43 = vpop.f32.mrf.mxu1 }
 0x11a   : > { %v1366_v44 = vadd.f32 %v2698_v18, %v917_v42  ;;  %v1398_v45 = vadd.f32 %v2698_v18, %v1045_v43 }
 0x11b   : > { %v919_v46 = vpop.f32.mrf.mxu0  ;;  %v1047_v47 = vpop.f32.mrf.mxu1 }
 0x11c   : > { %v1430_v50 = vmax.f32 %v1366_v44, 0.0  ;;  %v1462_v51 = vmax.f32 %v1398_v45, 0.0 }
 0x11d   : > { %v922_v52 = vpop.f32.mrf.mxu0  ;;  %v1050_v53 = vpop.f32.mrf.mxu1 }
 0x11e   : > { %v2128_v54 = vpack.c.bf16 %v1430_v50, %v1429_v48  ;;  %v2208_v55 = vpack.c.bf16 %v1462_v51, %v1461_v49  ;;  %v1367_v58 = vadd.f32 %v2698_v18, %v922_v52  ;;  %v1399_v59 = vadd.f32 %v2698_v18, %v1050_v53 }
 0x11f   : > { %v924_v56 = vpop.f32.mrf.mxu0  ;;  %v1052_v57 = vpop.f32.mrf.mxu1 }
 0x120   : > { %2280 = vst [vmem:[%s2708_s8 + $0x8] sm:$0xff] %v2128_v54   ;;  %2296 = vst [vmem:[%s2708_s8 + $0x88] sm:$0xff] %v2208_v55   ;;  %v1431_v2 = vmax.f32 %v1367_v58, 0.0  ;;  %v1463_v3 = vmax.f32 %v1399_v59, 0.0 }
 0x121   : > { %v925_v60 = vpop.f32.mrf.mxu0  ;;  %v1053_v61 = vpop.f32.mrf.mxu1 }
 0x122   : > { %v1368_v62 = vadd.f32 %v2698_v18, %v925_v60  ;;  %v1400_v63 = vadd.f32 %v2698_v18, %v1053_v61 }
 0x123   : > { %v927_v0 = vpop.f32.mrf.mxu0  ;;  %v1055_v1 = vpop.f32.mrf.mxu1 }
 0x124   : > { %v1432_v4 = vmax.f32 %v1368_v62, 0.0  ;;  %v1464_v5 = vmax.f32 %v1400_v63, 0.0 }
 0x125   : > { %v930_v6 = vpop.f32.mrf.mxu0  ;;  %v1058_v7 = vpop.f32.mrf.mxu1 }
 0x126   : > { %v2133_v8 = vpack.c.bf16 %v1432_v4, %v1431_v2  ;;  %v2213_v9 = vpack.c.bf16 %v1464_v5, %v1463_v3  ;;  %v1369_v12 = vadd.f32 %v2698_v18, %v930_v6  ;;  %v1401_v13 = vadd.f32 %v2698_v18, %v1058_v7 }
 0x127   : > { %v932_v10 = vpop.f32.mrf.mxu0  ;;  %v1060_v11 = vpop.f32.mrf.mxu1 }
 0x128   : > { %2281 = vst [vmem:[%s2708_s8 + $0x10] sm:$0xff] %v2133_v8   ;;  %2297 = vst [vmem:[%s2708_s8 + $0x90] sm:$0xff] %v2213_v9   ;;  %v1433_v21 = vmax.f32 %v1369_v12, 0.0  ;;  %v1465_v22 = vmax.f32 %v1401_v13, 0.0 }
 0x129   : > { %v933_v14 = vpop.f32.mrf.mxu0  ;;  %v1061_v15 = vpop.f32.mrf.mxu1 }
 0x12a   : > { %v1370_v16 = vadd.f32 %v2698_v18, %v933_v14  ;;  %v1402_v17 = vadd.f32 %v2698_v18, %v1061_v15 }
 0x12b   : > { %v935_v19 = vpop.f32.mrf.mxu0  ;;  %v1063_v20 = vpop.f32.mrf.mxu1 }
 0x12c   : > { %v1434_v23 = vmax.f32 %v1370_v16, 0.0  ;;  %v1466_v24 = vmax.f32 %v1402_v17, 0.0 }
 0x12d   : > { %v938_v25 = vpop.f32.mrf.mxu0  ;;  %v1066_v26 = vpop.f32.mrf.mxu1 }
 0x12e   : > { %v2138_v27 = vpack.c.bf16 %v1434_v23, %v1433_v21  ;;  %v2218_v28 = vpack.c.bf16 %v1466_v24, %v1465_v22  ;;  %v1371_v31 = vadd.f32 %v2698_v18, %v938_v25  ;;  %v1403_v32 = vadd.f32 %v2698_v18, %v1066_v26 }
 0x12f   : > { %v940_v29 = vpop.f32.mrf.mxu0  ;;  %v1068_v30 = vpop.f32.mrf.mxu1 }
 0x130   : > { %2282 = vst [vmem:[%s2708_s8 + $0x18] sm:$0xff] %v2138_v27   ;;  %2298 = vst [vmem:[%s2708_s8 + $0x98] sm:$0xff] %v2218_v28   ;;  %v1435_v39 = vmax.f32 %v1371_v31, 0.0  ;;  %v1467_v40 = vmax.f32 %v1403_v32, 0.0 }
 0x131   : > { %v941_v33 = vpop.f32.mrf.mxu0  ;;  %v1069_v34 = vpop.f32.mrf.mxu1 }
 0x132   : > { %v1372_v35 = vadd.f32 %v2698_v18, %v941_v33  ;;  %v1404_v36 = vadd.f32 %v2698_v18, %v1069_v34 }
 0x133   : > { %v943_v37 = vpop.f32.mrf.mxu0  ;;  %v1071_v38 = vpop.f32.mrf.mxu1 }
 0x134   : > { %v1436_v41 = vmax.f32 %v1372_v35, 0.0  ;;  %v1468_v42 = vmax.f32 %v1404_v36, 0.0 }
 0x135   : > { %v946_v43 = vpop.f32.mrf.mxu0  ;;  %v1074_v44 = vpop.f32.mrf.mxu1 }
 0x136   : > { %v2143_v45 = vpack.c.bf16 %v1436_v41, %v1435_v39  ;;  %v2223_v46 = vpack.c.bf16 %v1468_v42, %v1467_v40  ;;  %v1373_v49 = vadd.f32 %v2698_v18, %v946_v43  ;;  %v1405_v50 = vadd.f32 %v2698_v18, %v1074_v44 }
 0x137   : > { %v948_v47 = vpop.f32.mrf.mxu0  ;;  %v1076_v48 = vpop.f32.mrf.mxu1 }
 0x138   : > { %2283 = vst [vmem:[%s2708_s8 + $0x20] sm:$0xff] %v2143_v45   ;;  %2299 = vst [vmem:[%s2708_s8 + $0xa0] sm:$0xff] %v2223_v46   ;;  %v1437_v57 = vmax.f32 %v1373_v49, 0.0  ;;  %v1469_v58 = vmax.f32 %v1405_v50, 0.0 }
 0x139   : > { %v949_v51 = vpop.f32.mrf.mxu0  ;;  %v1077_v52 = vpop.f32.mrf.mxu1 }
 0x13a   : > { %v1374_v53 = vadd.f32 %v2698_v18, %v949_v51  ;;  %v1406_v54 = vadd.f32 %v2698_v18, %v1077_v52 }
 0x13b   : > { %v951_v55 = vpop.f32.mrf.mxu0  ;;  %v1079_v56 = vpop.f32.mrf.mxu1 }
 0x13c   : > { %v1438_v59 = vmax.f32 %v1374_v53, 0.0  ;;  %v1470_v60 = vmax.f32 %v1406_v54, 0.0 }
 0x13d   : > { %v954_v61 = vpop.f32.mrf.mxu0  ;;  %v1082_v62 = vpop.f32.mrf.mxu1 }
 0x13e   : > { %v2148_v63 = vpack.c.bf16 %v1438_v59, %v1437_v57  ;;  %v2228_v0 = vpack.c.bf16 %v1470_v60, %v1469_v58  ;;  %v1375_v3 = vadd.f32 %v2698_v18, %v954_v61  ;;  %v1407_v4 = vadd.f32 %v2698_v18, %v1082_v62 }
 0x13f   : > { %v956_v1 = vpop.f32.mrf.mxu0  ;;  %v1084_v2 = vpop.f32.mrf.mxu1 }
 0x140   : > { %2284 = vst [vmem:[%s2708_s8 + $0x28] sm:$0xff] %v2148_v63   ;;  %2300 = vst [vmem:[%s2708_s8 + $0xa8] sm:$0xff] %v2228_v0   ;;  %v1439_v11 = vmax.f32 %v1375_v3, 0.0  ;;  %v1471_v12 = vmax.f32 %v1407_v4, 0.0 }
 0x141   : > { %v957_v5 = vpop.f32.mrf.mxu0  ;;  %v1085_v6 = vpop.f32.mrf.mxu1 }
 0x142   : > { %v1376_v7 = vadd.f32 %v2698_v18, %v957_v5  ;;  %v1408_v8 = vadd.f32 %v2698_v18, %v1085_v6 }
 0x143   : > { %v959_v9 = vpop.f32.mrf.mxu0  ;;  %v1087_v10 = vpop.f32.mrf.mxu1 }
 0x144   : > { %v1440_v13 = vmax.f32 %v1376_v7, 0.0  ;;  %v1472_v14 = vmax.f32 %v1408_v8, 0.0 }
 0x145   : > { %v962_v15 = vpop.f32.mrf.mxu0  ;;  %v1090_v16 = vpop.f32.mrf.mxu1 }
 0x146   : > { %v2153_v17 = vpack.c.bf16 %v1440_v13, %v1439_v11  ;;  %v2233_v19 = vpack.c.bf16 %v1472_v14, %v1471_v12  ;;  %v1377_v22 = vadd.f32 %v2698_v18, %v962_v15  ;;  %v1409_v23 = vadd.f32 %v2698_v18, %v1090_v16 }
 0x147   : > { %v964_v20 = vpop.f32.mrf.mxu0  ;;  %v1092_v21 = vpop.f32.mrf.mxu1 }
 0x148   : > { %2285 = vst [vmem:[%s2708_s8 + $0x30] sm:$0xff] %v2153_v17   ;;  %2301 = vst [vmem:[%s2708_s8 + $0xb0] sm:$0xff] %v2233_v19   ;;  %v1441_v30 = vmax.f32 %v1377_v22, 0.0  ;;  %v1473_v31 = vmax.f32 %v1409_v23, 0.0 }
 0x149   : > { %v965_v24 = vpop.f32.mrf.mxu0  ;;  %v1093_v25 = vpop.f32.mrf.mxu1 }
 0x14a   : > { %v1378_v26 = vadd.f32 %v2698_v18, %v965_v24  ;;  %v1410_v27 = vadd.f32 %v2698_v18, %v1093_v25 }
 0x14b   : > { %v967_v28 = vpop.f32.mrf.mxu0  ;;  %v1095_v29 = vpop.f32.mrf.mxu1 }
 0x14c   : > { %v1442_v32 = vmax.f32 %v1378_v26, 0.0  ;;  %v1474_v33 = vmax.f32 %v1410_v27, 0.0 }
 0x14d   : > { %v970_v34 = vpop.f32.mrf.mxu0  ;;  %v1098_v35 = vpop.f32.mrf.mxu1 }
 0x14e   : > { %v2158_v36 = vpack.c.bf16 %v1442_v32, %v1441_v30  ;;  %v2238_v37 = vpack.c.bf16 %v1474_v33, %v1473_v31  ;;  %v1379_v40 = vadd.f32 %v2698_v18, %v970_v34  ;;  %v1411_v41 = vadd.f32 %v2698_v18, %v1098_v35 }
 0x14f   : > { %v972_v38 = vpop.f32.mrf.mxu0  ;;  %v1100_v39 = vpop.f32.mrf.mxu1 }
 0x150   : > { %2286 = vst [vmem:[%s2708_s8 + $0x38] sm:$0xff] %v2158_v36   ;;  %2302 = vst [vmem:[%s2708_s8 + $0xb8] sm:$0xff] %v2238_v37   ;;  %v1443_v48 = vmax.f32 %v1379_v40, 0.0  ;;  %v1475_v49 = vmax.f32 %v1411_v41, 0.0 }
 0x151   : > { %v973_v42 = vpop.f32.mrf.mxu0  ;;  %v1101_v43 = vpop.f32.mrf.mxu1 }
 0x152   : > { %v1380_v44 = vadd.f32 %v2698_v18, %v973_v42  ;;  %v1412_v45 = vadd.f32 %v2698_v18, %v1101_v43 }
 0x153   : > { %v975_v46 = vpop.f32.mrf.mxu0  ;;  %v1103_v47 = vpop.f32.mrf.mxu1 }
 0x154   : > { %v1444_v50 = vmax.f32 %v1380_v44, 0.0  ;;  %v1476_v51 = vmax.f32 %v1412_v45, 0.0 }
 0x155   : > { %v978_v52 = vpop.f32.mrf.mxu0  ;;  %v1106_v53 = vpop.f32.mrf.mxu1 }
 0x156   : > { %v2163_v54 = vpack.c.bf16 %v1444_v50, %v1443_v48  ;;  %v2243_v55 = vpack.c.bf16 %v1476_v51, %v1475_v49  ;;  %v1381_v58 = vadd.f32 %v2698_v18, %v978_v52  ;;  %v1413_v59 = vadd.f32 %v2698_v18, %v1106_v53 }
 0x157   : > { %v980_v56 = vpop.f32.mrf.mxu0  ;;  %v1108_v57 = vpop.f32.mrf.mxu1 }
 0x158   : > { %2287 = vst [vmem:[%s2708_s8 + $0x40] sm:$0xff] %v2163_v54   ;;  %2303 = vst [vmem:[%s2708_s8 + $0xc0] sm:$0xff] %v2243_v55   ;;  %v1445_v2 = vmax.f32 %v1381_v58, 0.0  ;;  %v1477_v3 = vmax.f32 %v1413_v59, 0.0 }
 0x159   : > { %v981_v60 = vpop.f32.mrf.mxu0  ;;  %v1109_v61 = vpop.f32.mrf.mxu1 }
 0x15a   : > { %v1382_v62 = vadd.f32 %v2698_v18, %v981_v60  ;;  %v1414_v63 = vadd.f32 %v2698_v18, %v1109_v61 }
 0x15b   : > { %v983_v0 = vpop.f32.mrf.mxu0  ;;  %v1111_v1 = vpop.f32.mrf.mxu1 }
 0x15c   : > { %v1446_v4 = vmax.f32 %v1382_v62, 0.0  ;;  %v1478_v5 = vmax.f32 %v1414_v63, 0.0 }
 0x15d   : > { %v986_v6 = vpop.f32.mrf.mxu0  ;;  %v1114_v7 = vpop.f32.mrf.mxu1 }
 0x15e   : > { %v2168_v8 = vpack.c.bf16 %v1446_v4, %v1445_v2  ;;  %v2248_v9 = vpack.c.bf16 %v1478_v5, %v1477_v3  ;;  %v1383_v12 = vadd.f32 %v2698_v18, %v986_v6  ;;  %v1415_v13 = vadd.f32 %v2698_v18, %v1114_v7 }
 0x15f   : > { %v988_v10 = vpop.f32.mrf.mxu0  ;;  %v1116_v11 = vpop.f32.mrf.mxu1 }
 0x160   : > { %2288 = vst [vmem:[%s2708_s8 + $0x48] sm:$0xff] %v2168_v8   ;;  %2304 = vst [vmem:[%s2708_s8 + $0xc8] sm:$0xff] %v2248_v9   ;;  %v1447_v21 = vmax.f32 %v1383_v12, 0.0  ;;  %v1479_v22 = vmax.f32 %v1415_v13, 0.0 }
 0x161   : > { %v989_v14 = vpop.f32.mrf.mxu0  ;;  %v1117_v15 = vpop.f32.mrf.mxu1 }
 0x162   : > { %v1384_v16 = vadd.f32 %v2698_v18, %v989_v14  ;;  %v1416_v17 = vadd.f32 %v2698_v18, %v1117_v15 }
 0x163   : > { %v991_v19 = vpop.f32.mrf.mxu0  ;;  %v1119_v20 = vpop.f32.mrf.mxu1 }
 0x164   : > { %v1448_v23 = vmax.f32 %v1384_v16, 0.0  ;;  %v1480_v24 = vmax.f32 %v1416_v17, 0.0 }
 0x165   : > { %v994_v25 = vpop.f32.mrf.mxu0  ;;  %v1122_v26 = vpop.f32.mrf.mxu1 }
 0x166   : > { %v2173_v27 = vpack.c.bf16 %v1448_v23, %v1447_v21  ;;  %v2253_v28 = vpack.c.bf16 %v1480_v24, %v1479_v22  ;;  %v1385_v31 = vadd.f32 %v2698_v18, %v994_v25  ;;  %v1417_v32 = vadd.f32 %v2698_v18, %v1122_v26 }
 0x167   : > { %v996_v29 = vpop.f32.mrf.mxu0  ;;  %v1124_v30 = vpop.f32.mrf.mxu1 }
 0x168   : > { %2289 = vst [vmem:[%s2708_s8 + $0x50] sm:$0xff] %v2173_v27   ;;  %2305 = vst [vmem:[%s2708_s8 + $0xd0] sm:$0xff] %v2253_v28   ;;  %v1449_v39 = vmax.f32 %v1385_v31, 0.0  ;;  %v1481_v40 = vmax.f32 %v1417_v32, 0.0 }
 0x169   : > { %v997_v33 = vpop.f32.mrf.mxu0  ;;  %v1125_v34 = vpop.f32.mrf.mxu1 }
 0x16a   : > { %v1386_v35 = vadd.f32 %v2698_v18, %v997_v33  ;;  %v1418_v36 = vadd.f32 %v2698_v18, %v1125_v34 }
 0x16b   : > { %v999_v37 = vpop.f32.mrf.mxu0  ;;  %v1127_v38 = vpop.f32.mrf.mxu1 }
 0x16c   : > { %v1450_v41 = vmax.f32 %v1386_v35, 0.0  ;;  %v1482_v42 = vmax.f32 %v1418_v36, 0.0 }
 0x16d   : > { %v1002_v43 = vpop.f32.mrf.mxu0  ;;  %v1130_v44 = vpop.f32.mrf.mxu1 }
 0x16e   : > { %v2178_v45 = vpack.c.bf16 %v1450_v41, %v1449_v39  ;;  %v2258_v46 = vpack.c.bf16 %v1482_v42, %v1481_v40  ;;  %v1387_v49 = vadd.f32 %v2698_v18, %v1002_v43  ;;  %v1419_v50 = vadd.f32 %v2698_v18, %v1130_v44 }
 0x16f   : > { %v1004_v47 = vpop.f32.mrf.mxu0  ;;  %v1132_v48 = vpop.f32.mrf.mxu1 }
 0x170   : > { %2290 = vst [vmem:[%s2708_s8 + $0x58] sm:$0xff] %v2178_v45   ;;  %2306 = vst [vmem:[%s2708_s8 + $0xd8] sm:$0xff] %v2258_v46   ;;  %v1451_v57 = vmax.f32 %v1387_v49, 0.0  ;;  %v1483_v58 = vmax.f32 %v1419_v50, 0.0 }
 0x171   : > { %v1005_v51 = vpop.f32.mrf.mxu0  ;;  %v1133_v52 = vpop.f32.mrf.mxu1 }
 0x172   : > { %v1388_v53 = vadd.f32 %v2698_v18, %v1005_v51  ;;  %v1420_v54 = vadd.f32 %v2698_v18, %v1133_v52 }
 0x173   : > { %v1007_v55 = vpop.f32.mrf.mxu0  ;;  %v1135_v56 = vpop.f32.mrf.mxu1 }
 0x174   : > { %v1452_v59 = vmax.f32 %v1388_v53, 0.0  ;;  %v1484_v60 = vmax.f32 %v1420_v54, 0.0 }
 0x175   : > { %v1010_v61 = vpop.f32.mrf.mxu0  ;;  %v1138_v62 = vpop.f32.mrf.mxu1 }
 0x176   : > { %v2183_v63 = vpack.c.bf16 %v1452_v59, %v1451_v57  ;;  %v2263_v0 = vpack.c.bf16 %v1484_v60, %v1483_v58  ;;  %v1389_v3 = vadd.f32 %v2698_v18, %v1010_v61  ;;  %v1421_v4 = vadd.f32 %v2698_v18, %v1138_v62 }
 0x177   : > { %v1012_v1 = vpop.f32.mrf.mxu0  ;;  %v1140_v2 = vpop.f32.mrf.mxu1 }
 0x178   : > { %2291 = vst [vmem:[%s2708_s8 + $0x60] sm:$0xff] %v2183_v63   ;;  %2307 = vst [vmem:[%s2708_s8 + $0xe0] sm:$0xff] %v2263_v0   ;;  %v1453_v11 = vmax.f32 %v1389_v3, 0.0  ;;  %v1485_v12 = vmax.f32 %v1421_v4, 0.0 }
 0x179   : > { %v1013_v5 = vpop.f32.mrf.mxu0  ;;  %v1141_v6 = vpop.f32.mrf.mxu1 }
 0x17a   : > { %v1390_v7 = vadd.f32 %v2698_v18, %v1013_v5  ;;  %v1422_v8 = vadd.f32 %v2698_v18, %v1141_v6 }
 0x17b   : > { %v1015_v9 = vpop.f32.mrf.mxu0  ;;  %v1143_v10 = vpop.f32.mrf.mxu1 }
 0x17c   : > { %v1454_v13 = vmax.f32 %v1390_v7, 0.0  ;;  %v1486_v14 = vmax.f32 %v1422_v8, 0.0 }
 0x17d   : > { %v1018_v15 = vpop.f32.mrf.mxu0  ;;  %v1146_v16 = vpop.f32.mrf.mxu1 }
 0x17e   : > { %v2188_v17 = vpack.c.bf16 %v1454_v13, %v1453_v11  ;;  %v2268_v19 = vpack.c.bf16 %v1486_v14, %v1485_v12  ;;  %v1391_v22 = vadd.f32 %v2698_v18, %v1018_v15  ;;  %v1423_v23 = vadd.f32 %v2698_v18, %v1146_v16 }
 0x17f   : > { %v1020_v20 = vpop.f32.mrf.mxu0  ;;  %v1148_v21 = vpop.f32.mrf.mxu1 }
 0x180   : > { %2292 = vst [vmem:[%s2708_s8 + $0x68] sm:$0xff] %v2188_v17   ;;  %2308 = vst [vmem:[%s2708_s8 + $0xe8] sm:$0xff] %v2268_v19   ;;  %v1455_v30 = vmax.f32 %v1391_v22, 0.0  ;;  %v1487_v31 = vmax.f32 %v1423_v23, 0.0 }
 0x181   : > { %v1021_v24 = vpop.f32.mrf.mxu0  ;;  %v1149_v25 = vpop.f32.mrf.mxu1 }
 0x182   : > { %v1392_v26 = vadd.f32 %v2698_v18, %v1021_v24  ;;  %v1424_v27 = vadd.f32 %v2698_v18, %v1149_v25 }
 0x183   : > { %v1023_v28 = vpop.f32.mrf.mxu0  ;;  %v1151_v29 = vpop.f32.mrf.mxu1 }
 0x184   : > { %v1456_v32 = vmax.f32 %v1392_v26, 0.0  ;;  %v1488_v33 = vmax.f32 %v1424_v27, 0.0 }
 0x185   : > { %v1026_v34 = vpop.f32.mrf.mxu0  ;;  %v1154_v35 = vpop.f32.mrf.mxu1 }
 0x186   : > { %v2193_v36 = vpack.c.bf16 %v1456_v32, %v1455_v30  ;;  %v2273_v37 = vpack.c.bf16 %v1488_v33, %v1487_v31  ;;  %v1393_v40 = vadd.f32 %v2698_v18, %v1026_v34  ;;  %v1425_v41 = vadd.f32 %v2698_v18, %v1154_v35 }
 0x187   : > { %v1028_v38 = vpop.f32.mrf.mxu0  ;;  %v1156_v39 = vpop.f32.mrf.mxu1 }
 0x188   : > { %2293 = vst [vmem:[%s2708_s8 + $0x70] sm:$0xff] %v2193_v36   ;;  %2309 = vst [vmem:[%s2708_s8 + $0xf0] sm:$0xff] %v2273_v37   ;;  %v1457_v48 = vmax.f32 %v1393_v40, 0.0  ;;  %v1489_v49 = vmax.f32 %v1425_v41, 0.0 }
 0x189   : > { %v1029_v42 = vpop.f32.mrf.mxu0  ;;  %v1157_v43 = vpop.f32.mrf.mxu1 }
 0x18a   : > { %v1394_v44 = vadd.f32 %v2698_v18, %v1029_v42  ;;  %v1426_v45 = vadd.f32 %v2698_v18, %v1157_v43 }
 0x18b   : > { %v1031_v46 = vpop.f32.mrf.mxu0  ;;  %v1159_v47 = vpop.f32.mrf.mxu1 }
 0x18c   : > { %v1458_v50 = vmax.f32 %v1394_v44, 0.0  ;;  %v1490_v51 = vmax.f32 %v1426_v45, 0.0 }
 0x18e   : > { %v2198_v52 = vpack.c.bf16 %v1458_v50, %v1457_v48  ;;  %v2278_v53 = vpack.c.bf16 %v1490_v51, %v1489_v49 }
 0x190   : > { %2294 = vst [vmem:[%s2708_s8 + $0x78] sm:$0xff] %v2198_v52   ;;  %2310 = vst [vmem:[%s2708_s8 + $0xf8] sm:$0xff] %v2278_v53  }
 0x191 PF: > { %s13_s14 = sadd.s32 1, %s2502_s14   ;;  %s2815_s12 = smov %s2498_s13 }
 0x192   : > { %p10_p5 = scmp.ge.s32.totalorder %s13_s14, 4   ;;  %s2816_s13 = smov %s2818_s15 }
 0x194   :  { %12 = sbr.rel (!%p10_p5) target bundleno = 2 (0x2), region = 73 }

// kernel: atari_net_forward.5
= control target key start
LH: loop header
LB: loop body
LE: loop exit
PB: predicated region body
PF: predicated region fallthrough
CT: control target
= control target key end

     0   :  { %s1777_s1 = inlined_call_operand.vmem [shape: bf16[512,128], index: 1, kind: input, shape index: {}]   ;;  %s1778_s0 = inlined_call_operand.vmem [shape: bf16[168,512], index: 0, kind: input, shape index: {}]   ;;  %s1779_s2 = inlined_call_operand.vmem [shape: f32[1,128], index: 2, kind: input, shape index: {}]   ;;  %s1780_s3 = inlined_call_operand.vmem [shape: bf16[168,128], index: 3, kind: output, shape index: {}]  }
   0x1   :  { %v1380_v0 = vld [vmem:[%s1777_s1 + $0x78] sm:$0xff]   ;;  %v1384_v4 = vld [vmem:[%s1777_s1 + $0x70] sm:$0xff]   ;;  %v1388_v8 = vld [vmem:[%s1777_s1 + $0x68] sm:$0xff]  }
   0x2   :  { %v1381_v1 = vld [vmem:[%s1777_s1 + $0xf8] sm:$0xff]   ;;  %1216 = vmatprep.subr.bf16.mxu0 %v1380_v0  ;;  %v1385_v5 = vld [vmem:[%s1777_s1 + $0xf0] sm:$0xff]   ;;  %v1389_v9 = vld [vmem:[%s1777_s1 + $0xe8] sm:$0xff]  }
   0x3   :  { %v1382_v2 = vld [vmem:[%s1777_s1 + $0x38] sm:$0xff]   ;;  %1298 = vmatprep.subr.bf16.mxu1 %v1381_v1  ;;  %v1386_v6 = vld [vmem:[%s1777_s1 + $0x30] sm:$0xff]   ;;  %v1390_v10 = vld [vmem:[%s1777_s1 + $0x28] sm:$0xff]  }
   0x4   :  { %v1383_v3 = vld [vmem:[%s1777_s1 + $0xb8] sm:$0xff]   ;;  %1217 = vmatpush3.bf16.msra.mxu0 %v1382_v2  ;;  %v1387_v7 = vld [vmem:[%s1777_s1 + $0xb0] sm:$0xff]   ;;  %v1391_v11 = vld [vmem:[%s1777_s1 + $0xa8] sm:$0xff]  }
   0x5   :  { %1299 = vmatpush3.bf16.msra.mxu1 %v1383_v3  ;;  %1218 = vmatprep.subr.bf16.mxu0 %v1384_v4  ;;  %v1392_v12 = vld [vmem:[%s1777_s1 + $0x60] sm:$0xff]   ;;  %v1396_v16 = vld [vmem:[%s1777_s1 + $0x58] sm:$0xff]   ;;  %v1400_v20 = vld [vmem:[%s1777_s1 + $0x50] sm:$0xff]  }
   0x6   :  { %1300 = vmatprep.subr.bf16.mxu1 %v1385_v5  ;;  %v1393_v13 = vld [vmem:[%s1777_s1 + $0xe0] sm:$0xff]   ;;  %v1397_v17 = vld [vmem:[%s1777_s1 + $0xd8] sm:$0xff]   ;;  %v1401_v21 = vld [vmem:[%s1777_s1 + $0xd0] sm:$0xff]  }
   0x7   :  { %v1394_v14 = vld [vmem:[%s1777_s1 + $0x20] sm:$0xff]   ;;  %v1398_v18 = vld [vmem:[%s1777_s1 + $0x18] sm:$0xff]   ;;  %v1402_v22 = vld [vmem:[%s1777_s1 + $0x10] sm:$0xff]  }
   0x8   :  { %1219 = vmatpush3.bf16.msra.mxu0 %v1386_v6  ;;  %v1395_v15 = vld [vmem:[%s1777_s1 + $0xa0] sm:$0xff]   ;;  %v1399_v19 = vld [vmem:[%s1777_s1 + $0x98] sm:$0xff]   ;;  %v1403_v23 = vld [vmem:[%s1777_s1 + $0x90] sm:$0xff]  }
   0x9   :  { %1301 = vmatpush3.bf16.msra.mxu1 %v1387_v7  ;;  %1220 = vmatprep.subr.bf16.mxu0 %v1388_v8  ;;  %v1404_v24 = vld [vmem:[%s1777_s1 + $0x48] sm:$0xff]   ;;  %v1408_v28 = vld [vmem:[%s1777_s1 + $0x40] sm:$0xff]  }
   0xa   :  { %1302 = vmatprep.subr.bf16.mxu1 %v1389_v9  ;;  %v1405_v25 = vld [vmem:[%s1777_s1 + $0xc8] sm:$0xff]   ;;  %v1409_v29 = vld [vmem:[%s1777_s1 + $0xc0] sm:$0xff]  }
   0xb   :  { %v1406_v26 = vld [vmem:[%s1777_s1 + $0x8] sm:$0xff]   ;;  %v1410_v30 = vld [vmem:[%s1777_s1] sm:$0xff]  }
   0xc   :  { %1221 = vmatpush3.bf16.msra.mxu0 %v1390_v10  ;;  %v1407_v27 = vld [vmem:[%s1777_s1 + $0x88] sm:$0xff]   ;;  %v1411_v31 = vld [vmem:[%s1777_s1 + $0x80] sm:$0xff]  }
   0xd   :  { %1303 = vmatpush3.bf16.msra.mxu1 %v1391_v11  ;;  %1222 = vmatprep.subr.bf16.mxu0 %v1392_v12  ;;  %v1412_v32 = vld [vmem:[%s1778_s0] ss:$16 sps:$4 sm:$0xff]   ;;  %v1414_v33 = vld [vmem:[%s1778_s0 + $0x4] ss:$16 sps:$4 sm:$0xff]   ;;  %v1415_v34 = vld [vmem:[%s1778_s0 + $0x8] ss:$16 sps:$4 sm:$0xff]  }
   0xe   :  { %1304 = vmatprep.subr.bf16.mxu1 %v1393_v13  ;;  %v1417_v35 = vld [vmem:[%s1778_s0 + $0xc] ss:$16 sps:$4 sm:$0xff]   ;;  %605 = vmatprep.mubr.bf16.mxu0 %v1414_v33  ;;  %v1418_v36 = vld [vmem:[%s1778_s0 + $0x24] ss:$16 sps:$4 sm:$0xff]   ;;  %v1422_v38 = vld [vmem:[%s1778_s0 + $0x20] ss:$16 sps:$4 sm:$0xff]  }
   0xf   :  { %725 = vmatprep.mubr.bf16.mxu1 %v1417_v35  ;;  %v1420_v37 = vld [vmem:[%s1778_s0 + $0x2c] ss:$16 sps:$4 sm:$0xff]   ;;  %v1423_v39 = vld [vmem:[%s1778_s0 + $0x28] ss:$16 sps:$4 sm:$0xff]   ;;  %v1424_v40 = vld [vmem:[%s1778_s0 + $0x44] ss:$16 sps:$4 sm:$0xff]  }
  0x10   :  { %1223 = vmatpush3.bf16.msra.mxu0 %v1394_v14  ;;  %v1426_v41 = vld [vmem:[%s1778_s0 + $0x4c] ss:$16 sps:$4 sm:$0xff]   ;;  %v1428_v42 = vld [vmem:[%s1778_s0 + $0x40] ss:$16 sps:$4 sm:$0xff]   ;;  %v1429_v43 = vld [vmem:[%s1778_s0 + $0x48] ss:$16 sps:$4 sm:$0xff]  }
  0x11   :  { %1305 = vmatpush3.bf16.msra.mxu1 %v1395_v15  ;;  %1224 = vmatprep.subr.bf16.mxu0 %v1396_v16  ;;  %v1430_v44 = vld [vmem:[%s1778_s0 + $0x64] ss:$16 sps:$4 sm:$0xff]   ;;  %v1432_v45 = vld [vmem:[%s1778_s0 + $0x6c] ss:$16 sps:$4 sm:$0xff]   ;;  %v1434_v46 = vld [vmem:[%s1778_s0 + $0x60] ss:$16 sps:$4 sm:$0xff]  }
  0x12   :  { %1306 = vmatprep.subr.bf16.mxu1 %v1397_v17  ;;  %v1435_v47 = vld [vmem:[%s1778_s0 + $0x68] ss:$16 sps:$4 sm:$0xff]   ;;  %v1436_v48 = vld [vmem:[%s1778_s0 + $0x84] ss:$16 sps:$4 sm:$0xff]   ;;  %v1438_v49 = vld [vmem:[%s1778_s0 + $0x8c] ss:$16 sps:$4 sm:$0xff]  }
  0x13   :  { %v1440_v50 = vld [vmem:[%s1778_s0 + $0x80] ss:$16 sps:$4 sm:$0xff]   ;;  %v1441_v51 = vld [vmem:[%s1778_s0 + $0x88] ss:$16 sps:$4 sm:$0xff]   ;;  %v1442_v52 = vld [vmem:[%s1778_s0 + $0xa4] ss:$16 sps:$4 sm:$0xff]  }
  0x14   :  { %1225 = vmatpush3.bf16.msra.mxu0 %v1398_v18  ;;  %v1444_v53 = vld [vmem:[%s1778_s0 + $0xac] ss:$16 sps:$4 sm:$0xff]   ;;  %v1446_v54 = vld [vmem:[%s1778_s0 + $0xa0] ss:$16 sps:$4 sm:$0xff]   ;;  %v1447_v55 = vld [vmem:[%s1778_s0 + $0xa8] ss:$16 sps:$4 sm:$0xff]  }
  0x15   :  { %1307 = vmatpush3.bf16.msra.mxu1 %v1399_v19  ;;  %1226 = vmatprep.subr.bf16.mxu0 %v1400_v20  ;;  %v1448_v56 = vld [vmem:[%s1778_s0 + $0xc4] ss:$16 sps:$4 sm:$0xff]   ;;  %v1450_v57 = vld [vmem:[%s1778_s0 + $0xcc] ss:$16 sps:$4 sm:$0xff]   ;;  %v1452_v58 = vld [vmem:[%s1778_s0 + $0xc0] ss:$16 sps:$4 sm:$0xff]  }
  0x16   :  { %1308 = vmatprep.subr.bf16.mxu1 %v1401_v21  ;;  %v1453_v59 = vld [vmem:[%s1778_s0 + $0xc8] ss:$16 sps:$4 sm:$0xff]   ;;  %v1454_v60 = vld [vmem:[%s1778_s0 + $0xe4] ss:$16 sps:$4 sm:$0xff]   ;;  %v1456_v61 = vld [vmem:[%s1778_s0 + $0xec] ss:$16 sps:$4 sm:$0xff]  }
  0x17   :  { %v1458_v62 = vld [vmem:[%s1778_s0 + $0xe0] ss:$16 sps:$4 sm:$0xff]   ;;  %v1459_v63 = vld [vmem:[%s1778_s0 + $0xe8] ss:$16 sps:$4 sm:$0xff]   ;;  %v1460_v0 = vld [vmem:[%s1778_s0 + $0x104] ss:$16 sps:$4 sm:$0xff]  }
  0x18   :  { %1227 = vmatpush3.bf16.msra.mxu0 %v1402_v22  ;;  %v1462_v1 = vld [vmem:[%s1778_s0 + $0x10c] ss:$16 sps:$4 sm:$0xff]   ;;  %v1464_v2 = vld [vmem:[%s1778_s0 + $0x100] ss:$16 sps:$4 sm:$0xff]   ;;  %v1465_v3 = vld [vmem:[%s1778_s0 + $0x108] ss:$16 sps:$4 sm:$0xff]  }
  0x19   :  { %1309 = vmatpush3.bf16.msra.mxu1 %v1403_v23  ;;  %1228 = vmatprep.subr.bf16.mxu0 %v1404_v24  ;;  %v1466_v4 = vld [vmem:[%s1778_s0 + $0x124] ss:$16 sps:$4 sm:$0xff]   ;;  %v1468_v5 = vld [vmem:[%s1778_s0 + $0x12c] ss:$16 sps:$4 sm:$0xff]   ;;  %v1470_v8 = vld [vmem:[%s1778_s0 + $0x120] ss:$16 sps:$4 sm:$0xff]  }
  0x1a   :  { %1310 = vmatprep.subr.bf16.mxu1 %v1405_v25  ;;  %v101_v6 = vld [vmem:[%s1778_s0 + $0x140] sm:$0xff]  ;;  %v102_v7 = vld [vmem:[%s1778_s0 + $0x148] sm:$0xff] }
  0x1b   :  { %v1471_v9 = vld [vmem:[%s1778_s0 + $0x128] ss:$16 sps:$4 sm:$0xff]   ;;  %v1079_v10 = vcombine.high %v101_v6, %v101_v6  ;;  %v1081_v11 = vcombine.high %v102_v7, %v102_v7  ;;  %v1078_v12 = vcombine.low %v101_v6, %v101_v6  ;;  %v1080_v13 = vcombine.low %v102_v7, %v102_v7  ;;  %v1721_v24 = vld [vmem:[%s1779_s2] ss:$0 sm:$0xff] }
  0x1c   :  { %1229 = vmatpush3.bf16.msra.mxu0 %v1406_v26 }
  0x1d   :  { %1311 = vmatpush3.bf16.msra.mxu1 %v1407_v27  ;;  %1230 = vmatprep.subr.bf16.mxu0 %v1408_v28 }
  0x1e   :  { %1312 = vmatprep.subr.bf16.mxu1 %v1409_v29 }
  0x20   :  { %1231 = vmatpush3.bf16.msra.mxu0 %v1410_v30 }
  0x21   :  { %1313 = vmatpush3.bf16.msra.mxu1 %v1411_v31 }
  0x23   :  { %606 = vmatmul.mubr.bf16.vlgmr.msra.gmra.mxu0 %v1412_v32 }
  0x24   :  { %726 = vmatmul.mubr.bf16.vlgmr.msra.gmra.mxu1 %v1415_v34  ;;  %613 = vmatprep.mubr.bf16.mxu0 %v1418_v36 }
  0x25   :  { %733 = vmatprep.mubr.bf16.mxu1 %v1420_v37 }
  0x2b   :  { %614 = vmatmul.mubr.bf16.gmra.mxu0 %v1422_v38 }
  0x2c   :  { %734 = vmatmul.mubr.bf16.gmra.mxu1 %v1423_v39  ;;  %621 = vmatprep.mubr.bf16.mxu0 %v1424_v40 }
  0x2d   :  { %741 = vmatprep.mubr.bf16.mxu1 %v1426_v41 }
  0x33   :  { %622 = vmatmul.mubr.bf16.gmra.mxu0 %v1428_v42 }
  0x34   :  { %742 = vmatmul.mubr.bf16.gmra.mxu1 %v1429_v43  ;;  %629 = vmatprep.mubr.bf16.mxu0 %v1430_v44 }
  0x35   :  { %749 = vmatprep.mubr.bf16.mxu1 %v1432_v45 }
  0x3b   :  { %630 = vmatmul.mubr.bf16.gmra.mxu0 %v1434_v46 }
  0x3c   :  { %750 = vmatmul.mubr.bf16.gmra.mxu1 %v1435_v47  ;;  %637 = vmatprep.mubr.bf16.mxu0 %v1436_v48 }
  0x3d   :  { %757 = vmatprep.mubr.bf16.mxu1 %v1438_v49 }
  0x43   :  { %638 = vmatmul.mubr.bf16.gmra.mxu0 %v1440_v50 }
  0x44   :  { %758 = vmatmul.mubr.bf16.gmra.mxu1 %v1441_v51  ;;  %645 = vmatprep.mubr.bf16.mxu0 %v1442_v52 }
  0x45   :  { %765 = vmatprep.mubr.bf16.mxu1 %v1444_v53 }
  0x4b   :  { %646 = vmatmul.mubr.bf16.gmra.mxu0 %v1446_v54 }
  0x4c   :  { %766 = vmatmul.mubr.bf16.gmra.mxu1 %v1447_v55  ;;  %653 = vmatprep.mubr.bf16.mxu0 %v1448_v56 }
  0x4d   :  { %773 = vmatprep.mubr.bf16.mxu1 %v1450_v57 }
  0x53   :  { %654 = vmatmul.mubr.bf16.gmra.mxu0 %v1452_v58 }
  0x54   :  { %774 = vmatmul.mubr.bf16.gmra.mxu1 %v1453_v59  ;;  %661 = vmatprep.mubr.bf16.mxu0 %v1454_v60 }
  0x55   :  { %781 = vmatprep.mubr.bf16.mxu1 %v1456_v61 }
  0x5b   :  { %662 = vmatmul.mubr.bf16.gmra.mxu0 %v1458_v62 }
  0x5c   :  { %782 = vmatmul.mubr.bf16.gmra.mxu1 %v1459_v63  ;;  %669 = vmatprep.mubr.bf16.mxu0 %v1460_v0 }
  0x5d   :  { %789 = vmatprep.mubr.bf16.mxu1 %v1462_v1 }
  0x63   :  { %670 = vmatmul.mubr.bf16.gmra.mxu0 %v1464_v2 }
  0x64   :  { %790 = vmatmul.mubr.bf16.gmra.mxu1 %v1465_v3  ;;  %677 = vmatprep.mubr.bf16.mxu0 %v1466_v4 }
  0x65   :  { %797 = vmatprep.mubr.bf16.mxu1 %v1468_v5 }
  0x6b   :  { %678 = vmatmul.mubr.bf16.gmra.mxu0 %v1470_v8 }
  0x6c   :  { %798 = vmatmul.mubr.bf16.gmra.mxu1 %v1471_v9  ;;  %685 = vmatprep.mubr.bf16.mxu0 %v1079_v10 }
  0x6d   :  { %805 = vmatprep.mubr.bf16.mxu1 %v1081_v11 }
  0x73   :  { %686 = vmatmul.mubr.bf16.gmra.mxu0 %v1078_v12 }
  0x74   :  { %806 = vmatmul.mubr.bf16.gmra.mxu1 %v1080_v13 }
  0xe3   :  { %v1232_v14 = vpop.f32.mrf.mxu0 }
  0xe4   :  { %v1314_v15 = vpop.f32.mrf.mxu1 }
  0xe5   :  { %v1233_v16 = vpop.f32.mrf.mxu0 }
  0xe6   :  { %v1234_v17 = vadd.f32 %v1233_v16, %v1232_v14  ;;  %v1315_v18 = vpop.f32.mrf.mxu1 }
  0xe7   :  { %v1316_v19 = vadd.f32 %v1315_v18, %v1314_v15  ;;  %v1235_v20 = vpop.f32.mrf.mxu0 }
  0xe8   :  { %v1317_v21 = vpop.f32.mrf.mxu1 }
  0xe9   :  { %v728_v22 = vadd.f32 %v1316_v19, %v1234_v17  ;;  %v1236_v23 = vpop.f32.mrf.mxu0 }
  0xea   :  { %v1237_v25 = vadd.f32 %v1236_v23, %v1235_v20  ;;  %v1318_v26 = vpop.f32.mrf.mxu1 }
  0xeb   :  { %v1319_v27 = vadd.f32 %v1318_v26, %v1317_v21  ;;  %v1238_v28 = vpop.f32.mrf.mxu0  ;;  %v886_v30 = vadd.f32 %v1721_v24, %v728_v22 }
  0xec   :  { %v1320_v29 = vpop.f32.mrf.mxu1 }
  0xed   :  { %v731_v31 = vadd.f32 %v1319_v27, %v1237_v25  ;;  %v1239_v32 = vpop.f32.mrf.mxu0  ;;  %v907_v39 = vmax.f32 %v886_v30, 0.0 }
  0xee   :  { %v1240_v33 = vadd.f32 %v1239_v32, %v1238_v28  ;;  %v1321_v34 = vpop.f32.mrf.mxu1 }
  0xef   :  { %v887_v35 = vadd.f32 %v1721_v24, %v731_v31  ;;  %v1322_v36 = vadd.f32 %v1321_v34, %v1320_v29  ;;  %v1241_v37 = vpop.f32.mrf.mxu0 }
  0xf0   :  { %v1323_v38 = vpop.f32.mrf.mxu1 }
  0xf1   :  { %v908_v40 = vmax.f32 %v887_v35, 0.0  ;;  %v736_v41 = vadd.f32 %v1322_v36, %v1240_v33  ;;  %v1242_v42 = vpop.f32.mrf.mxu0 }
  0xf2   :  { %v1243_v43 = vadd.f32 %v1242_v42, %v1241_v37  ;;  %v1324_v44 = vpop.f32.mrf.mxu1 }
  0xf3   :  { %v1160_v45 = vpack.c.bf16 %v908_v40, %v907_v39  ;;  %v1325_v46 = vadd.f32 %v1324_v44, %v1323_v38  ;;  %v1244_v47 = vpop.f32.mrf.mxu0  ;;  %v888_v49 = vadd.f32 %v1721_v24, %v736_v41 }
  0xf4   :  { %v1326_v48 = vpop.f32.mrf.mxu1 }
  0xf5   :  { %1161 = vst [vmem:[%s1780_s3] sm:$0xff] %v1160_v45   ;;  %v739_v50 = vadd.f32 %v1325_v46, %v1243_v43  ;;  %v1245_v51 = vpop.f32.mrf.mxu0  ;;  %v909_v58 = vmax.f32 %v888_v49, 0.0 }
  0xf6   :  { %v1246_v52 = vadd.f32 %v1245_v51, %v1244_v47  ;;  %v1327_v53 = vpop.f32.mrf.mxu1 }
  0xf7   :  { %v889_v54 = vadd.f32 %v1721_v24, %v739_v50  ;;  %v1328_v55 = vadd.f32 %v1327_v53, %v1326_v48  ;;  %v1247_v56 = vpop.f32.mrf.mxu0 }
  0xf8   :  { %v1329_v57 = vpop.f32.mrf.mxu1 }
  0xf9   :  { %v910_v59 = vmax.f32 %v889_v54, 0.0  ;;  %v744_v60 = vadd.f32 %v1328_v55, %v1246_v52  ;;  %v1248_v61 = vpop.f32.mrf.mxu0 }
  0xfa   :  { %v1249_v62 = vadd.f32 %v1248_v61, %v1247_v56  ;;  %v1330_v63 = vpop.f32.mrf.mxu1 }
  0xfb   :  { %v1165_v0 = vpack.c.bf16 %v910_v59, %v909_v58  ;;  %v1331_v1 = vadd.f32 %v1330_v63, %v1329_v57  ;;  %v1250_v2 = vpop.f32.mrf.mxu0  ;;  %v890_v4 = vadd.f32 %v1721_v24, %v744_v60 }
  0xfc   :  { %v1332_v3 = vpop.f32.mrf.mxu1 }
  0xfd   :  { %1207 = vst [vmem:[%s1780_s3 + $0x8] sm:$0xff] %v1165_v0   ;;  %v747_v5 = vadd.f32 %v1331_v1, %v1249_v62  ;;  %v1251_v6 = vpop.f32.mrf.mxu0  ;;  %v911_v13 = vmax.f32 %v890_v4, 0.0 }
  0xfe   :  { %v1252_v7 = vadd.f32 %v1251_v6, %v1250_v2  ;;  %v1333_v8 = vpop.f32.mrf.mxu1 }
  0xff   :  { %v891_v9 = vadd.f32 %v1721_v24, %v747_v5  ;;  %v1334_v10 = vadd.f32 %v1333_v8, %v1332_v3  ;;  %v1253_v11 = vpop.f32.mrf.mxu0 }
 0x100   :  { %v1335_v12 = vpop.f32.mrf.mxu1 }
 0x101   :  { %v912_v14 = vmax.f32 %v891_v9, 0.0  ;;  %v752_v15 = vadd.f32 %v1334_v10, %v1252_v7  ;;  %v1254_v16 = vpop.f32.mrf.mxu0 }
 0x102   :  { %v1255_v17 = vadd.f32 %v1254_v16, %v1253_v11  ;;  %v1336_v18 = vpop.f32.mrf.mxu1 }
 0x103   :  { %v1170_v19 = vpack.c.bf16 %v912_v14, %v911_v13  ;;  %v1337_v20 = vadd.f32 %v1336_v18, %v1335_v12  ;;  %v1256_v21 = vpop.f32.mrf.mxu0  ;;  %v892_v23 = vadd.f32 %v1721_v24, %v752_v15 }
 0x104   :  { %v1338_v22 = vpop.f32.mrf.mxu1 }
 0x105   :  { %1208 = vst [vmem:[%s1780_s3 + $0x10] sm:$0xff] %v1170_v19   ;;  %v755_v25 = vadd.f32 %v1337_v20, %v1255_v17  ;;  %v1257_v26 = vpop.f32.mrf.mxu0  ;;  %v913_v33 = vmax.f32 %v892_v23, 0.0 }
 0x106   :  { %v1258_v27 = vadd.f32 %v1257_v26, %v1256_v21  ;;  %v1339_v28 = vpop.f32.mrf.mxu1 }
 0x107   :  { %v893_v29 = vadd.f32 %v1721_v24, %v755_v25  ;;  %v1340_v30 = vadd.f32 %v1339_v28, %v1338_v22  ;;  %v1259_v31 = vpop.f32.mrf.mxu0 }
 0x108   :  { %v1341_v32 = vpop.f32.mrf.mxu1 }
 0x109   :  { %v914_v34 = vmax.f32 %v893_v29, 0.0  ;;  %v760_v35 = vadd.f32 %v1340_v30, %v1258_v27  ;;  %v1260_v36 = vpop.f32.mrf.mxu0 }
 0x10a   :  { %v1261_v37 = vadd.f32 %v1260_v36, %v1259_v31  ;;  %v1342_v38 = vpop.f32.mrf.mxu1 }
 0x10b   :  { %v1175_v39 = vpack.c.bf16 %v914_v34, %v913_v33  ;;  %v1343_v40 = vadd.f32 %v1342_v38, %v1341_v32  ;;  %v1262_v41 = vpop.f32.mrf.mxu0  ;;  %v894_v43 = vadd.f32 %v1721_v24, %v760_v35 }
 0x10c   :  { %v1344_v42 = vpop.f32.mrf.mxu1 }
 0x10d   :  { %1209 = vst [vmem:[%s1780_s3 + $0x18] sm:$0xff] %v1175_v39   ;;  %v763_v44 = vadd.f32 %v1343_v40, %v1261_v37  ;;  %v1263_v45 = vpop.f32.mrf.mxu0  ;;  %v915_v52 = vmax.f32 %v894_v43, 0.0 }
 0x10e   :  { %v1264_v46 = vadd.f32 %v1263_v45, %v1262_v41  ;;  %v1345_v47 = vpop.f32.mrf.mxu1 }
 0x10f   :  { %v895_v48 = vadd.f32 %v1721_v24, %v763_v44  ;;  %v1346_v49 = vadd.f32 %v1345_v47, %v1344_v42  ;;  %v1265_v50 = vpop.f32.mrf.mxu0 }
 0x110   :  { %v1347_v51 = vpop.f32.mrf.mxu1 }
 0x111   :  { %v916_v53 = vmax.f32 %v895_v48, 0.0  ;;  %v768_v54 = vadd.f32 %v1346_v49, %v1264_v46  ;;  %v1266_v55 = vpop.f32.mrf.mxu0 }
 0x112   :  { %v1267_v56 = vadd.f32 %v1266_v55, %v1265_v50  ;;  %v1348_v57 = vpop.f32.mrf.mxu1 }
 0x113   :  { %v1180_v58 = vpack.c.bf16 %v916_v53, %v915_v52  ;;  %v1349_v59 = vadd.f32 %v1348_v57, %v1347_v51  ;;  %v1268_v60 = vpop.f32.mrf.mxu0  ;;  %v896_v62 = vadd.f32 %v1721_v24, %v768_v54 }
 0x114   :  { %v1350_v61 = vpop.f32.mrf.mxu1 }
 0x115   :  { %1210 = vst [vmem:[%s1780_s3 + $0x20] sm:$0xff] %v1180_v58   ;;  %v771_v63 = vadd.f32 %v1349_v59, %v1267_v56  ;;  %v1269_v0 = vpop.f32.mrf.mxu0  ;;  %v917_v7 = vmax.f32 %v896_v62, 0.0 }
 0x116   :  { %v1270_v1 = vadd.f32 %v1269_v0, %v1268_v60  ;;  %v1351_v2 = vpop.f32.mrf.mxu1 }
 0x117   :  { %v897_v3 = vadd.f32 %v1721_v24, %v771_v63  ;;  %v1352_v4 = vadd.f32 %v1351_v2, %v1350_v61  ;;  %v1271_v5 = vpop.f32.mrf.mxu0 }
 0x118   :  { %v1353_v6 = vpop.f32.mrf.mxu1 }
 0x119   :  { %v918_v8 = vmax.f32 %v897_v3, 0.0  ;;  %v776_v9 = vadd.f32 %v1352_v4, %v1270_v1  ;;  %v1272_v10 = vpop.f32.mrf.mxu0 }
 0x11a   :  { %v1273_v11 = vadd.f32 %v1272_v10, %v1271_v5  ;;  %v1354_v12 = vpop.f32.mrf.mxu1 }
 0x11b   :  { %v1185_v13 = vpack.c.bf16 %v918_v8, %v917_v7  ;;  %v1355_v14 = vadd.f32 %v1354_v12, %v1353_v6  ;;  %v1274_v15 = vpop.f32.mrf.mxu0  ;;  %v898_v17 = vadd.f32 %v1721_v24, %v776_v9 }
 0x11c   :  { %v1356_v16 = vpop.f32.mrf.mxu1 }
 0x11d   :  { %1211 = vst [vmem:[%s1780_s3 + $0x28] sm:$0xff] %v1185_v13   ;;  %v779_v18 = vadd.f32 %v1355_v14, %v1273_v11  ;;  %v1275_v19 = vpop.f32.mrf.mxu0  ;;  %v919_v27 = vmax.f32 %v898_v17, 0.0 }
 0x11e   :  { %v1276_v20 = vadd.f32 %v1275_v19, %v1274_v15  ;;  %v1357_v21 = vpop.f32.mrf.mxu1 }
 0x11f   :  { %v899_v22 = vadd.f32 %v1721_v24, %v779_v18  ;;  %v1358_v23 = vadd.f32 %v1357_v21, %v1356_v16  ;;  %v1277_v25 = vpop.f32.mrf.mxu0 }
 0x120   :  { %v1359_v26 = vpop.f32.mrf.mxu1 }
 0x121   :  { %v920_v28 = vmax.f32 %v899_v22, 0.0  ;;  %v784_v29 = vadd.f32 %v1358_v23, %v1276_v20  ;;  %v1278_v30 = vpop.f32.mrf.mxu0 }
 0x122   :  { %v1279_v31 = vadd.f32 %v1278_v30, %v1277_v25  ;;  %v1360_v32 = vpop.f32.mrf.mxu1 }
 0x123   :  { %v1190_v33 = vpack.c.bf16 %v920_v28, %v919_v27  ;;  %v1361_v34 = vadd.f32 %v1360_v32, %v1359_v26  ;;  %v1280_v35 = vpop.f32.mrf.mxu0  ;;  %v900_v37 = vadd.f32 %v1721_v24, %v784_v29 }
 0x124   :  { %v1362_v36 = vpop.f32.mrf.mxu1 }
 0x125   :  { %1212 = vst [vmem:[%s1780_s3 + $0x30] sm:$0xff] %v1190_v33   ;;  %v787_v38 = vadd.f32 %v1361_v34, %v1279_v31  ;;  %v1281_v39 = vpop.f32.mrf.mxu0  ;;  %v921_v46 = vmax.f32 %v900_v37, 0.0 }
 0x126   :  { %v1282_v40 = vadd.f32 %v1281_v39, %v1280_v35  ;;  %v1363_v41 = vpop.f32.mrf.mxu1 }
 0x127   :  { %v901_v42 = vadd.f32 %v1721_v24, %v787_v38  ;;  %v1364_v43 = vadd.f32 %v1363_v41, %v1362_v36  ;;  %v1283_v44 = vpop.f32.mrf.mxu0 }
 0x128   :  { %v1365_v45 = vpop.f32.mrf.mxu1 }
 0x129   :  { %v922_v47 = vmax.f32 %v901_v42, 0.0  ;;  %v792_v48 = vadd.f32 %v1364_v43, %v1282_v40  ;;  %v1284_v49 = vpop.f32.mrf.mxu0 }
 0x12a   :  { %v1285_v50 = vadd.f32 %v1284_v49, %v1283_v44  ;;  %v1366_v51 = vpop.f32.mrf.mxu1 }
 0x12b   :  { %v1195_v52 = vpack.c.bf16 %v922_v47, %v921_v46  ;;  %v1367_v53 = vadd.f32 %v1366_v51, %v1365_v45  ;;  %v1286_v54 = vpop.f32.mrf.mxu0  ;;  %v902_v56 = vadd.f32 %v1721_v24, %v792_v48 }
 0x12c   :  { %v1368_v55 = vpop.f32.mrf.mxu1 }
 0x12d   :  { %1213 = vst [vmem:[%s1780_s3 + $0x38] sm:$0xff] %v1195_v52   ;;  %v795_v57 = vadd.f32 %v1367_v53, %v1285_v50  ;;  %v1287_v58 = vpop.f32.mrf.mxu0  ;;  %v923_v1 = vmax.f32 %v902_v56, 0.0 }
 0x12e   :  { %v1288_v59 = vadd.f32 %v1287_v58, %v1286_v54  ;;  %v1369_v60 = vpop.f32.mrf.mxu1 }
 0x12f   :  { %v903_v61 = vadd.f32 %v1721_v24, %v795_v57  ;;  %v1370_v62 = vadd.f32 %v1369_v60, %v1368_v55  ;;  %v1289_v63 = vpop.f32.mrf.mxu0 }
 0x130   :  { %v1371_v0 = vpop.f32.mrf.mxu1 }
 0x131   :  { %v924_v2 = vmax.f32 %v903_v61, 0.0  ;;  %v800_v3 = vadd.f32 %v1370_v62, %v1288_v59  ;;  %v1290_v4 = vpop.f32.mrf.mxu0 }
 0x132   :  { %v1291_v5 = vadd.f32 %v1290_v4, %v1289_v63  ;;  %v1372_v6 = vpop.f32.mrf.mxu1 }
 0x133   :  { %v1200_v7 = vpack.c.bf16 %v924_v2, %v923_v1  ;;  %v1373_v8 = vadd.f32 %v1372_v6, %v1371_v0  ;;  %v1292_v9 = vpop.f32.mrf.mxu0  ;;  %v904_v11 = vadd.f32 %v1721_v24, %v800_v3 }
 0x134   :  { %v1374_v10 = vpop.f32.mrf.mxu1 }
 0x135   :  { %1214 = vst [vmem:[%s1780_s3 + $0x40] sm:$0xff] %v1200_v7   ;;  %v803_v12 = vadd.f32 %v1373_v8, %v1291_v5  ;;  %v1293_v13 = vpop.f32.mrf.mxu0  ;;  %v925_v20 = vmax.f32 %v904_v11, 0.0 }
 0x136   :  { %v1294_v14 = vadd.f32 %v1293_v13, %v1292_v9  ;;  %v1375_v15 = vpop.f32.mrf.mxu1 }
 0x137   :  { %v905_v16 = vadd.f32 %v1721_v24, %v803_v12  ;;  %v1376_v17 = vadd.f32 %v1375_v15, %v1374_v10  ;;  %v1295_v18 = vpop.f32.mrf.mxu0 }
 0x138   :  { %v1377_v19 = vpop.f32.mrf.mxu1 }
 0x139   :  { %v926_v21 = vmax.f32 %v905_v16, 0.0  ;;  %v808_v22 = vadd.f32 %v1376_v17, %v1294_v14  ;;  %v1296_v23 = vpop.f32.mrf.mxu0 }
 0x13a   :  { %v1378_v25 = vpop.f32.mrf.mxu1 }
 0x13b   :  { %v1205_v26 = vpack.c.bf16 %v926_v21, %v925_v20  ;;  %v906_v27 = vadd.f32 %v1721_v24, %v808_v22 }
 0x13d   :  { %1215 = vst [vmem:[%s1780_s3 + $0x48] sm:$0xff] %v1205_v26   ;;  %v927_v28 = vmax.f32 %v906_v27, 0.0 }
 0x13f   :  { %v1156_v29 = vpack.c.bf16 %v927_v28, %v927_v28 }
 0x141   :  { %1033 = vst [vmem:[%s1780_s3 + $0x50] sm:$0xf] %v1156_v29 }

// kernel: atari_net_forward.6
= control target key start
LH: loop header
LB: loop body
LE: loop exit
PB: predicated region body
PF: predicated region fallthrough
CT: control target
= control target key end

     0   :  { %v1404_v24 = vmov 0.0   ;;  %vm1405_vm0 = vmmov 0   ;;  %s1733_s1 = inlined_call_operand.vmem [shape: bf16[640,128], index: 1, kind: input, shape index: {}]   ;;  %s1734_s0 = inlined_call_operand.vmem [shape: bf16[104,640], index: 0, kind: input, shape index: {}]   ;;  %s1735_s2 = inlined_call_operand.vmem [shape: f32[1,128], index: 2, kind: input, shape index: {}]   ;;  %s1736_s3 = inlined_call_operand.vmem [shape: bf16[104,128], index: 3, kind: output, shape index: {}]  }
   0x1   :  { %v1317_v0 = vld [vmem:[%s1733_s1 + $0x78] sm:$0xff]   ;;  %v1319_v2 = vld [vmem:[%s1733_s1 + $0x70] sm:$0xff]   ;;  %v1321_v4 = vld [vmem:[%s1733_s1 + $0x68] sm:$0xff]  }
   0x2   :  { %v1318_v1 = vld [vmem:[%s1733_s1 + $0x38] sm:$0xff]   ;;  %1124 = vmatprep.subr.bf16.mxu0 %v1317_v0  ;;  %1299 = vmatprep.subr.bf16.mxu1 %v1317_v0  ;;  %v1320_v3 = vld [vmem:[%s1733_s1 + $0x30] sm:$0xff]   ;;  %v1322_v5 = vld [vmem:[%s1733_s1 + $0x28] sm:$0xff]  }
   0x3   :  { %1125 = vmatpush3.bf16.msra.mxu0 %v1318_v1  ;;  %1307 = vmatpush3.bf16.msra.mxu1 %v1318_v1  ;;  %v1323_v6 = vld [vmem:[%s1733_s1 + $0x60] sm:$0xff]   ;;  %v1325_v8 = vld [vmem:[%s1733_s1 + $0x58] sm:$0xff]   ;;  %v1327_v10 = vld [vmem:[%s1733_s1 + $0x50] sm:$0xff]  }
   0x4   :  { %1126 = vmatprep.subr.bf16.mxu0 %v1319_v2  ;;  %1300 = vmatprep.subr.bf16.mxu1 %v1319_v2  ;;  %v1324_v7 = vld [vmem:[%s1733_s1 + $0x20] sm:$0xff]   ;;  %v1326_v9 = vld [vmem:[%s1733_s1 + $0x18] sm:$0xff]   ;;  %v1328_v13 = vld [vmem:[%s1733_s1 + $0x10] sm:$0xff]  }
   0x5   :  { %v1335_v11 = vld [vmem:[%s1734_s0 + $0x4] ss:$20 sps:$4 sm:$0xff]   ;;  %v1329_v14 = vld [vmem:[%s1733_s1 + $0x48] sm:$0xff]   ;;  %v1333_v18 = vld [vmem:[%s1734_s0] ss:$20 sps:$4 sm:$0xff]  }
   0x6   :  { %v1338_v12 = vld [vmem:[%s1734_s0 + $0xa4] ss:$20 sps:$4 sm:$0xff]   ;;  %610 = vmatprep.mubr.bf16.mxu0 %v1335_v11  ;;  %v1330_v15 = vld [vmem:[%s1733_s1 + $0x8] sm:$0xff]   ;;  %v1336_v19 = vld [vmem:[%s1734_s0 + $0xa0] ss:$20 sps:$4 sm:$0xff]  }
   0x7   :  { %1127 = vmatpush3.bf16.msra.mxu0 %v1320_v3  ;;  %1308 = vmatpush3.bf16.msra.mxu1 %v1320_v3  ;;  %v1331_v16 = vld [vmem:[%s1733_s1 + $0x40] sm:$0xff]   ;;  %v1339_v20 = vld [vmem:[%s1733_s1 + $0xf8] sm:$0xff]   ;;  %v1342_v23 = vld [vmem:[%s1733_s1 + $0xf0] sm:$0xff]  }
   0x8   :  { %1128 = vmatprep.subr.bf16.mxu0 %v1321_v4  ;;  %1301 = vmatprep.subr.bf16.mxu1 %v1321_v4  ;;  %v1332_v17 = vld [vmem:[%s1733_s1] sm:$0xff]   ;;  %v1340_v21 = vld [vmem:[%s1733_s1 + $0xb8] sm:$0xff]   ;;  %v1343_v27 = vld [vmem:[%s1733_s1 + $0xb0] sm:$0xff]  }
   0x9   :  { %642 = vmatprep.mubr.bf16.mxu1 %v1338_v12  ;;  %v1341_v22 = vld [vmem:[%s1733_s1 + $0x138] sm:$0xff]   ;;  %v1345_v25 = vld [vmem:[%s1734_s0 + $0x2c] ss:$20 sps:$4 sm:$0xff]   ;;  %v1344_v28 = vld [vmem:[%s1733_s1 + $0x130] sm:$0xff]  }
   0xa   :  { %v1349_v26 = vld [vmem:[%s1734_s0 + $0xcc] ss:$20 sps:$4 sm:$0xff]   ;;  %v1347_v29 = vld [vmem:[%s1734_s0 + $0x28] ss:$20 sps:$4 sm:$0xff]   ;;  %v81_v33 = vld [vmem:[%s1734_s0 + $0xf0] sm:$0xff] }
   0xb   :  { %1129 = vmatpush3.bf16.msra.mxu0 %v1322_v5  ;;  %1309 = vmatpush3.bf16.msra.mxu1 %v1322_v5  ;;  %v1348_v30 = vld [vmem:[%s1733_s1 + $0xe8] sm:$0xff]   ;;  %v1354_v35 = vld [vmem:[%s1733_s1 + $0xe0] sm:$0xff]   ;;  %v1018_v37 = vcombine.high %v81_v33, %v81_v33  ;;  %v1360_v40 = vld [vmem:[%s1733_s1 + $0xd8] sm:$0xff]   ;;  %v1017_v43 = vcombine.low %v81_v33, %v81_v33 }
   0xc   :  { %1130 = vmatprep.subr.bf16.mxu0 %v1323_v6  ;;  %1302 = vmatprep.subr.bf16.mxu1 %v1323_v6  ;;  %v1351_v31 = vld [vmem:[%s1733_s1 + $0xa8] sm:$0xff]   ;;  %v1355_v38 = vld [vmem:[%s1733_s1 + $0xa0] sm:$0xff]   ;;  %v1362_v42 = vld [vmem:[%s1733_s1 + $0x98] sm:$0xff]  }
   0xd   :  { %v1353_v32 = vld [vmem:[%s1734_s0 + $0xc8] ss:$20 sps:$4 sm:$0xff]   ;;  %v1356_v39 = vld [vmem:[%s1733_s1 + $0x120] sm:$0xff]   ;;  %v1365_v45 = vld [vmem:[%s1733_s1 + $0xd0] sm:$0xff]  }
   0xe   :  { %v1352_v34 = vld [vmem:[%s1733_s1 + $0x128] sm:$0xff]   ;;  %v1359_v41 = vld [vmem:[%s1734_s0 + $0x50] ss:$20 sps:$4 sm:$0xff]   ;;  %v1363_v44 = vld [vmem:[%s1733_s1 + $0x118] sm:$0xff]  }
   0xf   :  { %1131 = vmatpush3.bf16.msra.mxu0 %v1324_v7  ;;  %1310 = vmatpush3.bf16.msra.mxu1 %v1324_v7  ;;  %v1357_v36 = vld [vmem:[%s1734_s0 + $0x54] ss:$20 sps:$4 sm:$0xff]   ;;  %v1368_v46 = vld [vmem:[%s1734_s0 + $0x7c] ss:$20 sps:$4 sm:$0xff]   ;;  %v1379_v47 = vld [vmem:[%s1734_s0 + $0xc] ss:$20 sps:$4 sm:$0xff]  }
  0x10   :  { %1132 = vmatprep.subr.bf16.mxu0 %v1325_v8  ;;  %1303 = vmatprep.subr.bf16.mxu1 %v1325_v8  ;;  %v1366_v48 = vld [vmem:[%s1733_s1 + $0x90] sm:$0xff]   ;;  %v1371_v50 = vld [vmem:[%s1733_s1 + $0xc8] sm:$0xff]   ;;  %v1374_v54 = vld [vmem:[%s1733_s1 + $0xc0] sm:$0xff]  }
  0x11   :  { %v1367_v49 = vld [vmem:[%s1733_s1 + $0x110] sm:$0xff]   ;;  %v1370_v51 = vld [vmem:[%s1734_s0 + $0x78] ss:$20 sps:$4 sm:$0xff]   ;;  %v1375_v55 = vld [vmem:[%s1733_s1 + $0x80] sm:$0xff]  }
  0x12   :  { %v1372_v52 = vld [vmem:[%s1733_s1 + $0x88] sm:$0xff]   ;;  %v1376_v56 = vld [vmem:[%s1733_s1 + $0x100] sm:$0xff]   ;;  %v1385_v62 = vld [vmem:[%s1734_s0 + $0x5c] ss:$20 sps:$4 sm:$0xff]  }
  0x13   :  { %1133 = vmatpush3.bf16.msra.mxu0 %v1326_v9  ;;  %1311 = vmatpush3.bf16.msra.mxu1 %v1326_v9  ;;  %v1373_v53 = vld [vmem:[%s1733_s1 + $0x108] sm:$0xff]   ;;  %v1380_v58 = vld [vmem:[%s1734_s0 + $0x10] ss:$20 sps:$4 sm:$0xff]   ;;  %v1388_v0 = vld [vmem:[%s1734_s0 + $0x60] ss:$20 sps:$4 sm:$0xff]  }
  0x14   :  { %1134 = vmatprep.subr.bf16.mxu0 %v1327_v10  ;;  %1304 = vmatprep.subr.bf16.mxu1 %v1327_v10  ;;  %v1377_v57 = vld [vmem:[%s1734_s0 + $0x8] ss:$20 sps:$4 sm:$0xff]   ;;  %v1383_v60 = vld [vmem:[%s1734_s0 + $0x30] ss:$20 sps:$4 sm:$0xff]   ;;  %v1384_v61 = vld [vmem:[%s1734_s0 + $0x38] ss:$20 sps:$4 sm:$0xff]  }
  0x15   :  { %v1381_v59 = vld [vmem:[%s1734_s0 + $0x34] ss:$20 sps:$4 sm:$0xff]   ;;  %v1387_v63 = vld [vmem:[%s1734_s0 + $0x58] ss:$20 sps:$4 sm:$0xff]   ;;  %v1396_v6 = vld [vmem:[%s1734_s0 + $0xb0] ss:$20 sps:$4 sm:$0xff]  }
  0x16   :  { %v1389_v1 = vld [vmem:[%s1734_s0 + $0x84] ss:$20 sps:$4 sm:$0xff]   ;;  %v1391_v2 = vld [vmem:[%s1734_s0 + $0x80] ss:$20 sps:$4 sm:$0xff]   ;;  %v1392_v3 = vld [vmem:[%s1734_s0 + $0x88] ss:$20 sps:$4 sm:$0xff]  }
  0x17   :  { %1135 = vmatpush3.bf16.msra.mxu0 %v1328_v13  ;;  %1312 = vmatpush3.bf16.msra.mxu1 %v1328_v13  ;;  %v1393_v4 = vld [vmem:[%s1734_s0 + $0xac] ss:$20 sps:$4 sm:$0xff]   ;;  %v1395_v5 = vld [vmem:[%s1734_s0 + $0xa8] ss:$20 sps:$4 sm:$0xff]   ;;  %v1399_v9 = vld [vmem:[%s1734_s0 + $0xd0] ss:$20 sps:$4 sm:$0xff]  }
  0x18   :  { %1136 = vmatprep.subr.bf16.mxu0 %v1329_v14  ;;  %1305 = vmatprep.subr.bf16.mxu1 %v1329_v14  ;;  %v1397_v7 = vld [vmem:[%s1734_s0 + $0xd4] ss:$20 sps:$4 sm:$0xff]   ;;  %v82_v8 = vld [vmem:[%s1734_s0 + $0xf8] sm:$0xff]  ;;  %v1403_v13 = vld [vmem:[%s1734_s0 + $0x100] ss:$0 sps:$4 sm:$0xff]  }
  0x19   :  { %v1400_v10 = vld [vmem:[%s1734_s0 + $0xd8] ss:$20 sps:$4 sm:$0xff]   ;;  %v1020_v11 = vcombine.high %v82_v8, %v82_v8  ;;  %v1019_v12 = vcombine.low %v82_v8, %v82_v8 }
  0x1b   :  { %1137 = vmatpush3.bf16.msra.mxu0 %v1330_v15  ;;  %1313 = vmatpush3.bf16.msra.mxu1 %v1330_v15 }
  0x1c   :  { %1138 = vmatprep.subr.bf16.mxu0 %v1331_v16  ;;  %1306 = vmatprep.subr.bf16.mxu1 %v1331_v16 }
  0x1f   :  { %1139 = vmatpush3.bf16.msra.mxu0 %v1332_v17  ;;  %1314 = vmatpush3.bf16.msra.mxu1 %v1332_v17 }
  0x20   :  { %1182 = vmatprep.subr.bf16.mxu1 %v1339_v20  ;;  %1255 = vmatprep.subr.bf16.mxu0 %v1404_v24 }
  0x22   :  { %611 = vmatmul.mubr.bf16.vlgmr.msra.gmra.mxu0 %v1333_v18  ;;  %643 = vmatmul.mubr.bf16.vlgmr.msra.gmra.mxu1 %v1336_v19 }
  0x23   :  { %1183 = vmatpush3.bf16.msra.mxu1 %v1340_v21  ;;  %1256 = vmatpush3.bf16.msra.mxu0 %v1341_v22 }
  0x24   :  { %1184 = vmatprep.subr.bf16.mxu1 %v1342_v23  ;;  %1257 = vmatprep.subr.bf16.mxu0 %v1404_v24 }
  0x25   :  { %618 = vmatprep.mubr.bf16.mxu0 %v1345_v25  ;;  %650 = vmatprep.mubr.bf16.mxu1 %v1349_v26 }
  0x27   :  { %1185 = vmatpush3.bf16.msra.mxu1 %v1343_v27  ;;  %1258 = vmatpush3.bf16.msra.mxu0 %v1344_v28 }
  0x28   :  { %1186 = vmatprep.subr.bf16.mxu1 %v1348_v30  ;;  %1259 = vmatprep.subr.bf16.mxu0 %v1404_v24 }
  0x2a   :  { %619 = vmatmul.mubr.bf16.gmra.mxu0 %v1347_v29  ;;  %651 = vmatmul.mubr.bf16.gmra.mxu1 %v1353_v32 }
  0x2b   :  { %1187 = vmatpush3.bf16.msra.mxu1 %v1351_v31  ;;  %1260 = vmatpush3.bf16.msra.mxu0 %v1352_v34 }
  0x2c   :  { %1188 = vmatprep.subr.bf16.mxu1 %v1354_v35  ;;  %1261 = vmatprep.subr.bf16.mxu0 %v1404_v24 }
  0x2d   :  { %626 = vmatprep.mubr.bf16.mxu0 %v1357_v36  ;;  %658 = vmatprep.mubr.bf16.mxu1 %v1018_v37 }
  0x2f   :  { %1189 = vmatpush3.bf16.msra.mxu1 %v1355_v38  ;;  %1262 = vmatpush3.bf16.msra.mxu0 %v1356_v39 }
  0x30   :  { %1190 = vmatprep.subr.bf16.mxu1 %v1360_v40  ;;  %1263 = vmatprep.subr.bf16.mxu0 %v1404_v24 }
  0x32   :  { %627 = vmatmul.mubr.bf16.gmra.mxu0 %v1359_v41  ;;  %659 = vmatmul.mubr.bf16.gmra.mxu1 %v1017_v43 }
  0x33   :  { %1191 = vmatpush3.bf16.msra.mxu1 %v1362_v42  ;;  %1264 = vmatpush3.bf16.msra.mxu0 %v1363_v44 }
  0x34   :  { %1192 = vmatprep.subr.bf16.mxu1 %v1365_v45  ;;  %1265 = vmatprep.subr.bf16.mxu0 %v1404_v24 }
  0x35   :  { %634 = vmatprep.mubr.bf16.mxu0 %v1368_v46  ;;  %698 = vmatprep.mubr.bf16.mxu1 %v1379_v47 }
  0x37   :  { %1193 = vmatpush3.bf16.msra.mxu1 %v1366_v48  ;;  %1266 = vmatpush3.bf16.msra.mxu0 %v1367_v49 }
  0x38   :  { %1194 = vmatprep.subr.bf16.mxu1 %v1371_v50  ;;  %1267 = vmatprep.subr.bf16.mxu0 %v1404_v24 }
  0x3a   :  { %635 = vmatmul.mubr.bf16.gmra.mxu0 %v1370_v51 }
  0x3b   :  { %1195 = vmatpush3.bf16.msra.mxu1 %v1372_v52  ;;  %1268 = vmatpush3.bf16.msra.mxu0 %v1373_v53 }
  0x3c   :  { %1196 = vmatprep.subr.bf16.mxu1 %v1374_v54  ;;  %1269 = vmatprep.subr.bf16.mxu0 %v1404_v24 }
  0x3d   :  { %1271 = vmatprep.mubr.msk.bf16.mxu0 %vm1405_vm0, %v1404_v24 }
  0x3f   :  { %1197 = vmatpush3.bf16.msra.mxu1 %v1375_v55  ;;  %1270 = vmatpush3.bf16.msra.mxu0 %v1376_v56 }
  0x42   :  { %699 = vmatmul.mubr.bf16.vlgmr.msra.gmra.mxu1 %v1377_v57  ;;  %1272 = vmatmul.mubr.bf16.vlgmr.msra.gmra.mxu0 %v1380_v58 }
  0x43   :  { %706 = vmatprep.mubr.bf16.mxu1 %v1381_v59  ;;  %1275 = vmatprep.mubr.msk.bf16.mxu0 %vm1405_vm0, %v1404_v24 }
  0x4a   :  { %707 = vmatmul.mubr.bf16.gmra.mxu1 %v1383_v60  ;;  %1276 = vmatmul.mubr.bf16.gmra.mxu0 %v1384_v61  ;;  %v1688_v61 = vld [vmem:[%s1735_s2] ss:$0 sm:$0xff] }
  0x4b   :  { %714 = vmatprep.mubr.bf16.mxu1 %v1385_v62  ;;  %1279 = vmatprep.mubr.msk.bf16.mxu0 %vm1405_vm0, %v1404_v24 }
  0x52   :  { %715 = vmatmul.mubr.bf16.gmra.mxu1 %v1387_v63  ;;  %1280 = vmatmul.mubr.bf16.gmra.mxu0 %v1388_v0 }
  0x53   :  { %722 = vmatprep.mubr.bf16.mxu1 %v1389_v1  ;;  %1283 = vmatprep.mubr.msk.bf16.mxu0 %vm1405_vm0, %v1404_v24 }
  0x5a   :  { %723 = vmatmul.mubr.bf16.gmra.mxu1 %v1391_v2  ;;  %1284 = vmatmul.mubr.bf16.gmra.mxu0 %v1392_v3 }
  0x5b   :  { %730 = vmatprep.mubr.bf16.mxu1 %v1393_v4  ;;  %1287 = vmatprep.mubr.msk.bf16.mxu0 %vm1405_vm0, %v1404_v24 }
  0x62   :  { %731 = vmatmul.mubr.bf16.gmra.mxu1 %v1395_v5  ;;  %1288 = vmatmul.mubr.bf16.gmra.mxu0 %v1396_v6 }
  0x63   :  { %738 = vmatprep.mubr.bf16.mxu1 %v1397_v7  ;;  %1291 = vmatprep.mubr.msk.bf16.mxu0 %vm1405_vm0, %v1404_v24 }
  0x6a   :  { %739 = vmatmul.mubr.bf16.gmra.mxu1 %v1399_v9  ;;  %1292 = vmatmul.mubr.bf16.gmra.mxu0 %v1400_v10 }
  0x6b   :  { %746 = vmatprep.mubr.bf16.mxu1 %v1020_v11  ;;  %1295 = vmatprep.mubr.msk.bf16.mxu0 %vm1405_vm0, %v1404_v24 }
  0x72   :  { %747 = vmatmul.mubr.bf16.gmra.mxu1 %v1019_v12  ;;  %1296 = vmatmul.mubr.bf16.gmra.mxu0 %v1403_v13 }
  0xe2   :  { %v1140_v14 = vpop.f32.mrf.mxu0  ;;  %v1164_v15 = vpop.f32.mrf.mxu1 }
  0xe4   :  { %v1141_v16 = vpop.f32.mrf.mxu0  ;;  %v1165_v17 = vpop.f32.mrf.mxu1 }
  0xe5   :  { %v1667_v18 = vadd.f32 %v1165_v17, %v1164_v15  ;;  %v1142_v51 = vadd.f32 %v1141_v16, %v1140_v14 }
  0xe6   :  { %v1143_v19 = vpop.f32.mrf.mxu0  ;;  %v1167_v20 = vpop.f32.mrf.mxu1 }
  0xe8   :  { %v1144_v21 = vpop.f32.mrf.mxu0  ;;  %v1168_v22 = vpop.f32.mrf.mxu1 }
  0xe9   :  { %v1669_v23 = vadd.f32 %v1168_v22, %v1167_v20  ;;  %v1145_v58 = vadd.f32 %v1144_v21, %v1143_v19 }
  0xea   :  { %v1146_v24 = vpop.f32.mrf.mxu0  ;;  %v1170_v25 = vpop.f32.mrf.mxu1 }
  0xec   :  { %v1147_v26 = vpop.f32.mrf.mxu0  ;;  %v1171_v27 = vpop.f32.mrf.mxu1 }
  0xed   :  { %v1671_v28 = vadd.f32 %v1171_v27, %v1170_v25  ;;  %v1148_v3 = vadd.f32 %v1147_v26, %v1146_v24 }
  0xee   :  { %v1149_v29 = vpop.f32.mrf.mxu0  ;;  %v1173_v30 = vpop.f32.mrf.mxu1 }
  0xf0   :  { %v1150_v31 = vpop.f32.mrf.mxu0  ;;  %v1174_v32 = vpop.f32.mrf.mxu1 }
  0xf1   :  { %v1673_v33 = vadd.f32 %v1174_v32, %v1173_v30  ;;  %v1151_v11 = vadd.f32 %v1150_v31, %v1149_v29 }
  0xf2   :  { %v1152_v34 = vpop.f32.mrf.mxu0  ;;  %v1176_v35 = vpop.f32.mrf.mxu1 }
  0xf4   :  { %v1153_v36 = vpop.f32.mrf.mxu0  ;;  %v1177_v37 = vpop.f32.mrf.mxu1 }
  0xf5   :  { %v1675_v38 = vadd.f32 %v1177_v37, %v1176_v35  ;;  %v1154_v26 = vadd.f32 %v1153_v36, %v1152_v34 }
  0xf6   :  { %v1155_v39 = vpop.f32.mrf.mxu0  ;;  %v1179_v40 = vpop.f32.mrf.mxu1 }
  0xf8   :  { %v1156_v41 = vpop.f32.mrf.mxu0  ;;  %v1180_v42 = vpop.f32.mrf.mxu1 }
  0xf9   :  { %v1157_v40 = vadd.f32 %v1156_v41, %v1155_v39 }
  0xfa   :  { %v1677_v43 = vpop.f32.mrf.mxu0 }
  0xfc   :  { %v1679_v44 = vpop.f32.mrf.mxu0 }
  0xfe   :  { %v1681_v45 = vpop.f32.mrf.mxu0 }
 0x100   :  { %v1683_v46 = vpop.f32.mrf.mxu0 }
 0x102   :  { %v1198_v47 = vpop.f32.mrf.mxu1  ;;  %v788_v48 = vpop.f32.mrf.mxu0 }
 0x104   :  { %v1199_v49 = vpop.f32.mrf.mxu1  ;;  %v1273_v50 = vpop.f32.mrf.mxu0 }
 0x105   :  { %v1200_v52 = vadd.f32 %v1199_v49, %v1198_v47 }
 0x106   :  { %v1201_v53 = vpop.f32.mrf.mxu1  ;;  %v791_v54 = vpop.f32.mrf.mxu0 }
 0x107   :  { %v701_v55 = vadd.f32 %v1200_v52, %v1142_v51 }
 0x108   :  { %v1202_v56 = vpop.f32.mrf.mxu1  ;;  %v1274_v57 = vpop.f32.mrf.mxu0 }
 0x109   :  { %v789_v59 = vadd.f32 %v788_v48, %v701_v55  ;;  %v1203_v60 = vadd.f32 %v1202_v56, %v1201_v53  ;;  %v1160_v56 = vadd.f32 %v1679_v44, %v1677_v43 }
 0x10a   :  { %v1204_v62 = vpop.f32.mrf.mxu1  ;;  %v796_v63 = vpop.f32.mrf.mxu0 }
 0x10b   :  { %v704_v0 = vadd.f32 %v1203_v60, %v1145_v58  ;;  %v891_v4 = vadd.f32 %v1688_v61, %v789_v59 }
 0x10c   :  { %v1205_v1 = vpop.f32.mrf.mxu1  ;;  %v1277_v2 = vpop.f32.mrf.mxu0 }
 0x10d   :  { %v792_v5 = vadd.f32 %v791_v54, %v704_v0  ;;  %v1206_v6 = vadd.f32 %v1205_v1, %v1204_v62  ;;  %v904_v14 = vmax.f32 %v891_v4, 0.0 }
 0x10e   :  { %v1207_v7 = vpop.f32.mrf.mxu1  ;;  %v799_v8 = vpop.f32.mrf.mxu0 }
 0x10f   :  { %v892_v9 = vadd.f32 %v1688_v61, %v792_v5  ;;  %v709_v10 = vadd.f32 %v1206_v6, %v1148_v3 }
 0x110   :  { %v1208_v12 = vpop.f32.mrf.mxu1  ;;  %v1278_v13 = vpop.f32.mrf.mxu0 }
 0x111   :  { %v905_v15 = vmax.f32 %v892_v9, 0.0  ;;  %v797_v16 = vadd.f32 %v796_v63, %v709_v10  ;;  %v1209_v17 = vadd.f32 %v1208_v12, %v1207_v7  ;;  %v1163_v63 = vadd.f32 %v1683_v46, %v1681_v45 }
 0x112   :  { %v1210_v19 = vpop.f32.mrf.mxu1  ;;  %v804_v20 = vpop.f32.mrf.mxu0 }
 0x113   :  { %v1092_v21 = vpack.c.bf16 %v905_v15, %v904_v14  ;;  %v712_v22 = vadd.f32 %v1209_v17, %v1151_v11  ;;  %v893_v27 = vadd.f32 %v1688_v61, %v797_v16 }
 0x114   :  { %v1211_v24 = vpop.f32.mrf.mxu1  ;;  %v1281_v25 = vpop.f32.mrf.mxu0 }
 0x115   :  { %1093 = vst [vmem:[%s1736_s3] sm:$0xff] %v1092_v21   ;;  %v800_v29 = vadd.f32 %v799_v8, %v712_v22  ;;  %v1212_v30 = vadd.f32 %v1211_v24, %v1210_v19  ;;  %v906_v48 = vmax.f32 %v893_v27, 0.0 }
 0x116   :  { %v1213_v31 = vpop.f32.mrf.mxu1  ;;  %v807_v32 = vpop.f32.mrf.mxu0 }
 0x117   :  { %v894_v35 = vadd.f32 %v1688_v61, %v800_v29  ;;  %v717_v37 = vadd.f32 %v1212_v30, %v1154_v26 }
 0x118   :  { %v1214_v42 = vpop.f32.mrf.mxu1  ;;  %v1282_v47 = vpop.f32.mrf.mxu0 }
 0x119   :  { %v907_v49 = vmax.f32 %v894_v35, 0.0  ;;  %v805_v50 = vadd.f32 %v804_v20, %v717_v37  ;;  %v1215_v34 = vadd.f32 %v1214_v42, %v1213_v31 }
 0x11a   :  { %v1216_v36 = vpop.f32.mrf.mxu1  ;;  %v812_v51 = vpop.f32.mrf.mxu0 }
 0x11b   :  { %v1097_v52 = vpack.c.bf16 %v907_v49, %v906_v48  ;;  %v720_v53 = vadd.f32 %v1215_v34, %v1157_v40  ;;  %v895_v39 = vadd.f32 %v1688_v61, %v805_v50 }
 0x11c   :  { %v1217_v54 = vpop.f32.mrf.mxu1  ;;  %v1285_v55 = vpop.f32.mrf.mxu0 }
 0x11d   :  { %1119 = vst [vmem:[%s1736_s3 + $0x8] sm:$0xff] %v1097_v52   ;;  %v808_v41 = vadd.f32 %v807_v32, %v720_v53  ;;  %v1218_v57 = vadd.f32 %v1217_v54, %v1216_v36  ;;  %v908_v2 = vmax.f32 %v895_v39, 0.0 }
 0x11e   :  { %v1219_v58 = vpop.f32.mrf.mxu1  ;;  %v815_v59 = vpop.f32.mrf.mxu0 }
 0x11f   :  { %v896_v60 = vadd.f32 %v1688_v61, %v808_v41  ;;  %v725_v62 = vadd.f32 %v1218_v57, %v1160_v56 }
 0x120   :  { %v1220_v0 = vpop.f32.mrf.mxu1  ;;  %v1286_v1 = vpop.f32.mrf.mxu0 }
 0x121   :  { %v909_v43 = vmax.f32 %v896_v60, 0.0  ;;  %v813_v44 = vadd.f32 %v812_v51, %v725_v62  ;;  %v1221_v3 = vadd.f32 %v1220_v0, %v1219_v58 }
 0x122   :  { %v1222_v4 = vpop.f32.mrf.mxu1  ;;  %v820_v5 = vpop.f32.mrf.mxu0 }
 0x123   :  { %v1102_v6 = vpack.c.bf16 %v909_v43, %v908_v2  ;;  %v728_v7 = vadd.f32 %v1221_v3, %v1163_v63  ;;  %v897_v10 = vadd.f32 %v1688_v61, %v813_v44 }
 0x124   :  { %v1223_v8 = vpop.f32.mrf.mxu1  ;;  %v1289_v9 = vpop.f32.mrf.mxu0 }
 0x125   :  { %1120 = vst [vmem:[%s1736_s3 + $0x10] sm:$0xff] %v1102_v6   ;;  %v816_v11 = vadd.f32 %v815_v59, %v728_v7  ;;  %v1224_v45 = vadd.f32 %v1223_v8, %v1222_v4  ;;  %v910_v17 = vmax.f32 %v897_v10, 0.0 }
 0x126   :  { %v1225_v46 = vpop.f32.mrf.mxu1  ;;  %v823_v12 = vpop.f32.mrf.mxu0 }
 0x127   :  { %v898_v13 = vadd.f32 %v1688_v61, %v816_v11  ;;  %v733_v14 = vadd.f32 %v1224_v45, %v1667_v18 }
 0x128   :  { %v1226_v15 = vpop.f32.mrf.mxu1  ;;  %v1290_v16 = vpop.f32.mrf.mxu0 }
 0x129   :  { %v911_v19 = vmax.f32 %v898_v13, 0.0  ;;  %v821_v20 = vadd.f32 %v820_v5, %v733_v14  ;;  %v1227_v21 = vadd.f32 %v1226_v15, %v1225_v46 }
 0x12a   :  { %v1228_v22 = vpop.f32.mrf.mxu1  ;;  %v828_v24 = vpop.f32.mrf.mxu0 }
 0x12b   :  { %v1107_v25 = vpack.c.bf16 %v911_v19, %v910_v17  ;;  %v736_v26 = vadd.f32 %v1227_v21, %v1669_v23  ;;  %v899_v30 = vadd.f32 %v1688_v61, %v821_v20 }
 0x12c   :  { %v1229_v27 = vpop.f32.mrf.mxu1  ;;  %v1293_v29 = vpop.f32.mrf.mxu0 }
 0x12d   :  { %1121 = vst [vmem:[%s1736_s3 + $0x18] sm:$0xff] %v1107_v25   ;;  %v824_v18 = vadd.f32 %v823_v12, %v736_v26  ;;  %v1230_v31 = vadd.f32 %v1229_v27, %v1228_v22  ;;  %v912_v48 = vmax.f32 %v899_v30, 0.0 }
 0x12e   :  { %v1231_v32 = vpop.f32.mrf.mxu1  ;;  %v831_v35 = vpop.f32.mrf.mxu0 }
 0x12f   :  { %v900_v37 = vadd.f32 %v1688_v61, %v824_v18  ;;  %v741_v40 = vadd.f32 %v1230_v31, %v1671_v28 }
 0x130   :  { %v1232_v42 = vpop.f32.mrf.mxu1  ;;  %v1294_v47 = vpop.f32.mrf.mxu0 }
 0x131   :  { %v913_v23 = vmax.f32 %v900_v37, 0.0  ;;  %v829_v49 = vadd.f32 %v828_v24, %v741_v40  ;;  %v1233_v50 = vadd.f32 %v1232_v42, %v1231_v32 }
 0x132   :  { %v1234_v34 = vpop.f32.mrf.mxu1  ;;  %v836_v36 = vpop.f32.mrf.mxu0 }
 0x133   :  { %v1112_v51 = vpack.c.bf16 %v913_v23, %v912_v48  ;;  %v744_v52 = vadd.f32 %v1233_v50, %v1673_v33  ;;  %v901_v55 = vadd.f32 %v1688_v61, %v829_v49 }
 0x134   :  { %v1235_v53 = vpop.f32.mrf.mxu1  ;;  %v1297_v54 = vpop.f32.mrf.mxu0 }
 0x135   :  { %1122 = vst [vmem:[%s1736_s3 + $0x20] sm:$0xff] %v1112_v51   ;;  %v832_v28 = vadd.f32 %v831_v35, %v744_v52  ;;  %v1236_v56 = vadd.f32 %v1235_v53, %v1234_v34  ;;  %v914_v62 = vmax.f32 %v901_v55, 0.0 }
 0x136   :  { %v1237_v39 = vpop.f32.mrf.mxu1  ;;  %v839_v41 = vpop.f32.mrf.mxu0 }
 0x137   :  { %v902_v57 = vadd.f32 %v1688_v61, %v832_v28  ;;  %v749_v58 = vadd.f32 %v1236_v56, %v1675_v38 }
 0x138   :  { %v1238_v59 = vpop.f32.mrf.mxu1  ;;  %v1298_v60 = vpop.f32.mrf.mxu0 }
 0x139   :  { %v915_v33 = vmax.f32 %v902_v57, 0.0  ;;  %v837_v63 = vadd.f32 %v836_v36, %v749_v58 }
 0x13b   :  { %v1117_v0 = vpack.c.bf16 %v915_v33, %v914_v62  ;;  %v903_v1 = vadd.f32 %v1688_v61, %v837_v63 }
 0x13d   :  { %1123 = vst [vmem:[%s1736_s3 + $0x28] sm:$0xff] %v1117_v0   ;;  %v916_v2 = vmax.f32 %v903_v1, 0.0 }
 0x13f   :  { %v1088_v43 = vpack.c.bf16 %v916_v2, %v916_v2 }
 0x141   :  { %982 = vst [vmem:[%s1736_s3 + $0x30] sm:$0xf] %v1088_v43 }

// kernel: atari_net_forward.7
= control target key start
LH: loop header
LB: loop body
LE: loop exit
PB: predicated region body
PF: predicated region fallthrough
CT: control target
= control target key end

     0   :  { %s5775_s1 = inlined_call_operand.vmem [shape: bf16[3200,256], index: 1, kind: input, shape index: {}]   ;;  %s5776_s0 = inlined_call_operand.vmem [shape: bf16[8,3200], index: 0, kind: input, shape index: {}]   ;;  %s5777_s3 = inlined_call_operand.vmem [shape: bf16[256,128], index: 3, kind: input, shape index: {}]   ;;  %s5778_s2 = inlined_call_operand.vmem [shape: f32[1,256], index: 2, kind: input, shape index: {}]   ;;  %s5779_s4 = inlined_call_operand.vmem [shape: f32[1,128], index: 4, kind: input, shape index: {}]   ;;  %s5780_s5 = inlined_call_operand.vmem [shape: f32[8,128], index: 5, kind: output, shape index: {}]  }
   0x1   :  { %v3735_v0 = vld [vmem:[%s5775_s1 + $0x74] ss:$8 sps:$4 sm:$0xff]   ;;  %v3739_v2 = vld [vmem:[%s5775_s1 + $0x70] ss:$8 sps:$4 sm:$0xff]   ;;  %v3741_v4 = vld [vmem:[%s5775_s1 + $0x64] ss:$8 sps:$4 sm:$0xff]  }
   0x2   :  { %v3737_v1 = vld [vmem:[%s5775_s1 + $0x174] ss:$8 sps:$4 sm:$0xff]   ;;  %2530 = vmatprep.subr.bf16.mxu0 %v3735_v0  ;;  %v3740_v3 = vld [vmem:[%s5775_s1 + $0x170] ss:$8 sps:$4 sm:$0xff]   ;;  %v3743_v5 = vld [vmem:[%s5775_s1 + $0x164] ss:$8 sps:$4 sm:$0xff]  }
   0x3   :  { %2571 = vmatprep.subr.bf16.mxu1 %v3737_v1  ;;  %2531 = vmatpush1.bf16.msra.mxu0 %v3739_v2  ;;  %v3745_v6 = vld [vmem:[%s5775_s1 + $0x60] ss:$8 sps:$4 sm:$0xff]   ;;  %v3747_v8 = vld [vmem:[%s5775_s1 + $0x54] ss:$8 sps:$4 sm:$0xff]   ;;  %v3751_v10 = vld [vmem:[%s5775_s1 + $0x50] ss:$8 sps:$4 sm:$0xff]  }
   0x4   :  { %2572 = vmatpush1.bf16.msra.mxu1 %v3740_v3  ;;  %2532 = vmatprep.subr.bf16.mxu0 %v3741_v4  ;;  %v3746_v7 = vld [vmem:[%s5775_s1 + $0x160] ss:$8 sps:$4 sm:$0xff]   ;;  %v3749_v9 = vld [vmem:[%s5775_s1 + $0x154] ss:$8 sps:$4 sm:$0xff]   ;;  %v3752_v11 = vld [vmem:[%s5775_s1 + $0x150] ss:$8 sps:$4 sm:$0xff]  }
   0x5   :  { %2573 = vmatprep.subr.bf16.mxu1 %v3743_v5  ;;  %v3753_v12 = vld [vmem:[%s5775_s1 + $0x44] ss:$8 sps:$4 sm:$0xff]   ;;  %v3757_v14 = vld [vmem:[%s5775_s1 + $0x40] ss:$8 sps:$4 sm:$0xff]   ;;  %v3759_v16 = vld [vmem:[%s5775_s1 + $0x34] ss:$8 sps:$4 sm:$0xff]  }
   0x6   :  { %v3755_v13 = vld [vmem:[%s5775_s1 + $0x144] ss:$8 sps:$4 sm:$0xff]   ;;  %v3758_v15 = vld [vmem:[%s5775_s1 + $0x140] ss:$8 sps:$4 sm:$0xff]   ;;  %v3761_v17 = vld [vmem:[%s5775_s1 + $0x134] ss:$8 sps:$4 sm:$0xff]  }
   0x7   :  { %2533 = vmatpush1.bf16.msra.mxu0 %v3745_v6  ;;  %v3763_v18 = vld [vmem:[%s5775_s1 + $0x30] ss:$8 sps:$4 sm:$0xff]   ;;  %v3765_v20 = vld [vmem:[%s5775_s1 + $0x24] ss:$8 sps:$4 sm:$0xff]   ;;  %v3769_v22 = vld [vmem:[%s5775_s1 + $0x20] ss:$8 sps:$4 sm:$0xff]  }
   0x8   :  { %2574 = vmatpush1.bf16.msra.mxu1 %v3746_v7  ;;  %2534 = vmatprep.subr.bf16.mxu0 %v3747_v8  ;;  %v3764_v19 = vld [vmem:[%s5775_s1 + $0x130] ss:$8 sps:$4 sm:$0xff]   ;;  %v3767_v21 = vld [vmem:[%s5775_s1 + $0x124] ss:$8 sps:$4 sm:$0xff]   ;;  %v3770_v23 = vld [vmem:[%s5775_s1 + $0x120] ss:$8 sps:$4 sm:$0xff]  }
   0x9   :  { %2575 = vmatprep.subr.bf16.mxu1 %v3749_v9  ;;  %v3771_v24 = vld [vmem:[%s5775_s1 + $0x14] ss:$8 sps:$4 sm:$0xff]   ;;  %v3775_v26 = vld [vmem:[%s5775_s1 + $0x10] ss:$8 sps:$4 sm:$0xff]   ;;  %v3777_v28 = vld [vmem:[%s5775_s1 + $0x4] ss:$8 sps:$4 sm:$0xff]  }
   0xa   :  { %v3773_v25 = vld [vmem:[%s5775_s1 + $0x114] ss:$8 sps:$4 sm:$0xff]   ;;  %v3776_v27 = vld [vmem:[%s5775_s1 + $0x110] ss:$8 sps:$4 sm:$0xff]   ;;  %v3779_v29 = vld [vmem:[%s5775_s1 + $0x104] ss:$8 sps:$4 sm:$0xff]  }
   0xb   :  { %2535 = vmatpush1.bf16.msra.mxu0 %v3751_v10  ;;  %v3781_v30 = vld [vmem:[%s5775_s1] ss:$8 sps:$4 sm:$0xff]   ;;  %v3783_v32 = vld [vmem:[%s5775_s1 + $0xf4] ss:$8 sps:$4 sm:$0xff]   ;;  %v3787_v34 = vld [vmem:[%s5775_s1 + $0xf0] ss:$8 sps:$4 sm:$0xff]  }
   0xc   :  { %2576 = vmatpush1.bf16.msra.mxu1 %v3752_v11  ;;  %2536 = vmatprep.subr.bf16.mxu0 %v3753_v12  ;;  %v3782_v31 = vld [vmem:[%s5775_s1 + $0x100] ss:$8 sps:$4 sm:$0xff]   ;;  %v3785_v33 = vld [vmem:[%s5775_s1 + $0x1f4] ss:$8 sps:$4 sm:$0xff]   ;;  %v3788_v35 = vld [vmem:[%s5775_s1 + $0x1f0] ss:$8 sps:$4 sm:$0xff]  }
   0xd   :  { %2577 = vmatprep.subr.bf16.mxu1 %v3755_v13  ;;  %v3789_v36 = vld [vmem:[%s5775_s1 + $0xe4] ss:$8 sps:$4 sm:$0xff]   ;;  %v3793_v38 = vld [vmem:[%s5775_s1 + $0xe0] ss:$8 sps:$4 sm:$0xff]   ;;  %v3795_v40 = vld [vmem:[%s5775_s1 + $0xd4] ss:$8 sps:$4 sm:$0xff]  }
   0xe   :  { %v3791_v37 = vld [vmem:[%s5775_s1 + $0x1e4] ss:$8 sps:$4 sm:$0xff]   ;;  %v3794_v39 = vld [vmem:[%s5775_s1 + $0x1e0] ss:$8 sps:$4 sm:$0xff]   ;;  %v3797_v41 = vld [vmem:[%s5775_s1 + $0x1d4] ss:$8 sps:$4 sm:$0xff]  }
   0xf   :  { %2537 = vmatpush1.bf16.msra.mxu0 %v3757_v14  ;;  %v3799_v42 = vld [vmem:[%s5775_s1 + $0xd0] ss:$8 sps:$4 sm:$0xff]   ;;  %v3801_v44 = vld [vmem:[%s5775_s1 + $0xc4] ss:$8 sps:$4 sm:$0xff]   ;;  %v3805_v49 = vld [vmem:[%s5775_s1 + $0xc0] ss:$8 sps:$4 sm:$0xff]  }
  0x10   :  { %2578 = vmatpush1.bf16.msra.mxu1 %v3758_v15  ;;  %2538 = vmatprep.subr.bf16.mxu0 %v3759_v16  ;;  %v3800_v43 = vld [vmem:[%s5775_s1 + $0x1d0] ss:$8 sps:$4 sm:$0xff]   ;;  %v3803_v45 = vld [vmem:[%s5775_s1 + $0x1c4] ss:$8 sps:$4 sm:$0xff]   ;;  %v3806_v50 = vld [vmem:[%s5775_s1 + $0x1c0] ss:$8 sps:$4 sm:$0xff]  }
  0x11   :  { %2579 = vmatprep.subr.bf16.mxu1 %v3761_v17  ;;  %v29_v46 = vld [vmem:[%s5776_s0] sm:$0xff]  ;;  %v30_v48 = vld [vmem:[%s5776_s0 + $0x8] sm:$0xff]  ;;  %v3807_v52 = vld [vmem:[%s5775_s1 + $0xb4] ss:$8 sps:$4 sm:$0xff]  }
  0x12   :  { %v3271_v47 = vcombine.high %v29_v46, %v29_v46  ;;  %v3273_v51 = vcombine.high %v30_v48, %v30_v48  ;;  %v3809_v53 = vld [vmem:[%s5775_s1 + $0x1b4] ss:$8 sps:$4 sm:$0xff]   ;;  %v3811_v54 = vld [vmem:[%s5775_s1 + $0xb0] ss:$8 sps:$4 sm:$0xff]   ;;  %v3813_v56 = vld [vmem:[%s5775_s1 + $0xa4] ss:$8 sps:$4 sm:$0xff]   ;;  %v3270_v6 = vcombine.low %v29_v46, %v29_v46  ;;  %v3272_v7 = vcombine.low %v30_v48, %v30_v48 }
  0x13   :  { %2539 = vmatpush1.bf16.msra.mxu0 %v3763_v18  ;;  %v3812_v55 = vld [vmem:[%s5775_s1 + $0x1b0] ss:$8 sps:$4 sm:$0xff]   ;;  %v3815_v57 = vld [vmem:[%s5775_s1 + $0x1a4] ss:$8 sps:$4 sm:$0xff]   ;;  %v3817_v58 = vld [vmem:[%s5775_s1 + $0xa0] ss:$8 sps:$4 sm:$0xff]  }
  0x14   :  { %2580 = vmatpush1.bf16.msra.mxu1 %v3764_v19  ;;  %2540 = vmatprep.subr.bf16.mxu0 %v3765_v20  ;;  %v3818_v59 = vld [vmem:[%s5775_s1 + $0x1a0] ss:$8 sps:$4 sm:$0xff]   ;;  %v3819_v60 = vld [vmem:[%s5775_s1 + $0x94] ss:$8 sps:$4 sm:$0xff]   ;;  %v3823_v62 = vld [vmem:[%s5775_s1 + $0x90] ss:$8 sps:$4 sm:$0xff]  }
  0x15   :  { %2581 = vmatprep.subr.bf16.mxu1 %v3767_v21  ;;  %2562 = vmatprep.mubr.bf16.mxu0 %v3271_v47  ;;  %v3821_v61 = vld [vmem:[%s5775_s1 + $0x194] ss:$8 sps:$4 sm:$0xff]   ;;  %v3824_v63 = vld [vmem:[%s5775_s1 + $0x190] ss:$8 sps:$4 sm:$0xff]   ;;  %v3825_v0 = vld [vmem:[%s5775_s1 + $0x84] ss:$8 sps:$4 sm:$0xff]  }
  0x16   :  { %2603 = vmatprep.mubr.bf16.mxu1 %v3273_v51  ;;  %v3827_v1 = vld [vmem:[%s5775_s1 + $0x184] ss:$8 sps:$4 sm:$0xff]   ;;  %v3829_v2 = vld [vmem:[%s5775_s1 + $0x80] ss:$8 sps:$4 sm:$0xff]   ;;  %v3837_v4 = vld [vmem:[%s5775_s1 + $0x274] ss:$8 sps:$4 sm:$0xff]  }
  0x17   :  { %2541 = vmatpush1.bf16.msra.mxu0 %v3769_v22  ;;  %v3830_v3 = vld [vmem:[%s5775_s1 + $0x180] ss:$8 sps:$4 sm:$0xff]   ;;  %v3840_v5 = vld [vmem:[%s5775_s1 + $0x374] ss:$8 sps:$4 sm:$0xff]   ;;  %v3835_v8 = vld [vmem:[%s5775_s1 + $0x270] ss:$8 sps:$4 sm:$0xff]  }
  0x18   :  { %2582 = vmatpush1.bf16.msra.mxu1 %v3770_v23  ;;  %2542 = vmatprep.subr.bf16.mxu0 %v3771_v24  ;;  %v3838_v9 = vld [vmem:[%s5775_s1 + $0x370] ss:$8 sps:$4 sm:$0xff]   ;;  %v3843_v10 = vld [vmem:[%s5775_s1 + $0x264] ss:$8 sps:$4 sm:$0xff]   ;;  %v3841_v12 = vld [vmem:[%s5775_s1 + $0x260] ss:$8 sps:$4 sm:$0xff]  }
  0x19   :  { %2583 = vmatprep.subr.bf16.mxu1 %v3773_v25  ;;  %v3846_v11 = vld [vmem:[%s5775_s1 + $0x364] ss:$8 sps:$4 sm:$0xff]   ;;  %v3844_v13 = vld [vmem:[%s5775_s1 + $0x360] ss:$8 sps:$4 sm:$0xff]   ;;  %v3849_v14 = vld [vmem:[%s5775_s1 + $0x254] ss:$8 sps:$4 sm:$0xff]  }
  0x1a   :  { %v3852_v15 = vld [vmem:[%s5775_s1 + $0x354] ss:$8 sps:$4 sm:$0xff]   ;;  %v3847_v16 = vld [vmem:[%s5775_s1 + $0x250] ss:$8 sps:$4 sm:$0xff]   ;;  %v3855_v18 = vld [vmem:[%s5775_s1 + $0x244] ss:$8 sps:$4 sm:$0xff]  }
  0x1b   :  { %2543 = vmatpush1.bf16.msra.mxu0 %v3775_v26  ;;  %v3850_v17 = vld [vmem:[%s5775_s1 + $0x350] ss:$8 sps:$4 sm:$0xff]   ;;  %v3858_v19 = vld [vmem:[%s5775_s1 + $0x344] ss:$8 sps:$4 sm:$0xff]   ;;  %v3853_v20 = vld [vmem:[%s5775_s1 + $0x240] ss:$8 sps:$4 sm:$0xff]  }
  0x1c   :  { %2584 = vmatpush1.bf16.msra.mxu1 %v3776_v27  ;;  %2544 = vmatprep.subr.bf16.mxu0 %v3777_v28  ;;  %v3856_v21 = vld [vmem:[%s5775_s1 + $0x340] ss:$8 sps:$4 sm:$0xff]   ;;  %v3861_v22 = vld [vmem:[%s5775_s1 + $0x234] ss:$8 sps:$4 sm:$0xff]   ;;  %v3859_v24 = vld [vmem:[%s5775_s1 + $0x230] ss:$8 sps:$4 sm:$0xff]  }
  0x1d   :  { %2585 = vmatprep.subr.bf16.mxu1 %v3779_v29  ;;  %v3864_v23 = vld [vmem:[%s5775_s1 + $0x334] ss:$8 sps:$4 sm:$0xff]   ;;  %v3862_v25 = vld [vmem:[%s5775_s1 + $0x330] ss:$8 sps:$4 sm:$0xff]   ;;  %v3867_v26 = vld [vmem:[%s5775_s1 + $0x224] ss:$8 sps:$4 sm:$0xff]  }
  0x1e   :  { %v3870_v27 = vld [vmem:[%s5775_s1 + $0x324] ss:$8 sps:$4 sm:$0xff]   ;;  %v3865_v28 = vld [vmem:[%s5775_s1 + $0x220] ss:$8 sps:$4 sm:$0xff]   ;;  %v3900_v51 = vld [vmem:[%s5775_s1 + $0x3d4] ss:$8 sps:$4 sm:$0xff]  }
  0x1f   :  { %2545 = vmatpush1.bf16.msra.mxu0 %v3781_v30  ;;  %v3868_v29 = vld [vmem:[%s5775_s1 + $0x320] ss:$8 sps:$4 sm:$0xff]   ;;  %v3873_v30 = vld [vmem:[%s5775_s1 + $0x214] ss:$8 sps:$4 sm:$0xff]   ;;  %v3891_v46 = vld [vmem:[%s5775_s1 + $0x2e4] ss:$8 sps:$4 sm:$0xff]  }
  0x20   :  { %2586 = vmatpush1.bf16.msra.mxu1 %v3782_v31  ;;  %2546 = vmatprep.subr.bf16.mxu0 %v3783_v32  ;;  %v3876_v31 = vld [vmem:[%s5775_s1 + $0x314] ss:$8 sps:$4 sm:$0xff]   ;;  %v3894_v47 = vld [vmem:[%s5775_s1 + $0x3e4] ss:$8 sps:$4 sm:$0xff]   ;;  %v3889_v48 = vld [vmem:[%s5775_s1 + $0x2e0] ss:$8 sps:$4 sm:$0xff]  }
  0x21   :  { %2587 = vmatprep.subr.bf16.mxu1 %v3785_v33  ;;  %v4686_v32 = vld [vmem:[%s5776_s0 + $0x10] sm:$0xff] }
  0x22   :  { %v3871_v33 = vld [vmem:[%s5775_s1 + $0x210] ss:$8 sps:$4 sm:$0xff]  }
  0x23   :  { %2547 = vmatpush2.bf16.msra.mxu0 %v3787_v34  ;;  %v3874_v34 = vld [vmem:[%s5775_s1 + $0x310] ss:$8 sps:$4 sm:$0xff]  }
  0x24   :  { %2588 = vmatpush2.bf16.msra.mxu1 %v3788_v35  ;;  %2548 = vmatprep.subr.bf16.mxu0 %v3789_v36  ;;  %v3275_v35 = vcombine.high %v4686_v32, %v4686_v32  ;;  %v4699_v36 = vld [vmem:[%s5776_s0 + $0x18] sm:$0xff] }
  0x25   :  { %2589 = vmatprep.subr.bf16.mxu1 %v3791_v37  ;;  %v3879_v37 = vld [vmem:[%s5775_s1 + $0x204] ss:$8 sps:$4 sm:$0xff]  }
  0x27   :  { %2549 = vmatpush2.bf16.msra.mxu0 %v3793_v38  ;;  %v3277_v38 = vcombine.high %v4699_v36, %v4699_v36 }
  0x28   :  { %2590 = vmatpush2.bf16.msra.mxu1 %v3794_v39  ;;  %2550 = vmatprep.subr.bf16.mxu0 %v3795_v40  ;;  %v3882_v39 = vld [vmem:[%s5775_s1 + $0x304] ss:$8 sps:$4 sm:$0xff]   ;;  %v3877_v40 = vld [vmem:[%s5775_s1 + $0x200] ss:$8 sps:$4 sm:$0xff]  }
  0x29   :  { %2591 = vmatprep.subr.bf16.mxu1 %v3797_v41  ;;  %v3880_v41 = vld [vmem:[%s5775_s1 + $0x300] ss:$8 sps:$4 sm:$0xff]  }
  0x2b   :  { %2551 = vmatpush2.bf16.msra.mxu0 %v3799_v42  ;;  %v3885_v42 = vld [vmem:[%s5775_s1 + $0x2f4] ss:$8 sps:$4 sm:$0xff]  }
  0x2c   :  { %2592 = vmatpush2.bf16.msra.mxu1 %v3800_v43  ;;  %2552 = vmatprep.subr.bf16.mxu0 %v3801_v44  ;;  %v3888_v43 = vld [vmem:[%s5775_s1 + $0x3f4] ss:$8 sps:$4 sm:$0xff]   ;;  %v3883_v44 = vld [vmem:[%s5775_s1 + $0x2f0] ss:$8 sps:$4 sm:$0xff]  }
  0x2d   :  { %2593 = vmatprep.subr.bf16.mxu1 %v3803_v45  ;;  %v3886_v45 = vld [vmem:[%s5775_s1 + $0x3f0] ss:$8 sps:$4 sm:$0xff]  }
  0x2f   :  { %2553 = vmatpush2.bf16.msra.mxu0 %v3805_v49  ;;  %v3892_v49 = vld [vmem:[%s5775_s1 + $0x3e0] ss:$8 sps:$4 sm:$0xff]  }
  0x30   :  { %2594 = vmatpush2.bf16.msra.mxu1 %v3806_v50  ;;  %2554 = vmatprep.subr.bf16.mxu0 %v3807_v52  ;;  %v3897_v50 = vld [vmem:[%s5775_s1 + $0x2d4] ss:$8 sps:$4 sm:$0xff]   ;;  %v3895_v52 = vld [vmem:[%s5775_s1 + $0x2d0] ss:$8 sps:$4 sm:$0xff]  }
  0x31   :  { %2595 = vmatprep.subr.bf16.mxu1 %v3809_v53  ;;  %v3898_v53 = vld [vmem:[%s5775_s1 + $0x3d0] ss:$8 sps:$4 sm:$0xff]  }
  0x33   :  { %2555 = vmatpush2.bf16.msra.mxu0 %v3811_v54  ;;  %v3903_v54 = vld [vmem:[%s5775_s1 + $0x2c4] ss:$8 sps:$4 sm:$0xff]  }
  0x34   :  { %2596 = vmatpush2.bf16.msra.mxu1 %v3812_v55  ;;  %2556 = vmatprep.subr.bf16.mxu0 %v3813_v56  ;;  %v3906_v55 = vld [vmem:[%s5775_s1 + $0x3c4] ss:$8 sps:$4 sm:$0xff]   ;;  %v3901_v56 = vld [vmem:[%s5775_s1 + $0x2c0] ss:$8 sps:$4 sm:$0xff]  }
  0x35   :  { %2597 = vmatprep.subr.bf16.mxu1 %v3815_v57  ;;  %v3904_v57 = vld [vmem:[%s5775_s1 + $0x3c0] ss:$8 sps:$4 sm:$0xff]  }
  0x37   :  { %2557 = vmatpush2.bf16.msra.mxu0 %v3817_v58  ;;  %v3909_v58 = vld [vmem:[%s5775_s1 + $0x2b4] ss:$8 sps:$4 sm:$0xff]  }
  0x38   :  { %2598 = vmatpush2.bf16.msra.mxu1 %v3818_v59  ;;  %2558 = vmatprep.subr.bf16.mxu0 %v3819_v60  ;;  %v3912_v59 = vld [vmem:[%s5775_s1 + $0x3b4] ss:$8 sps:$4 sm:$0xff]   ;;  %v3907_v60 = vld [vmem:[%s5775_s1 + $0x2b0] ss:$8 sps:$4 sm:$0xff]  }
  0x39   :  { %2599 = vmatprep.subr.bf16.mxu1 %v3821_v61  ;;  %v3910_v61 = vld [vmem:[%s5775_s1 + $0x3b0] ss:$8 sps:$4 sm:$0xff]  }
  0x3b   :  { %2559 = vmatpush2.bf16.msra.mxu0 %v3823_v62  ;;  %v3915_v62 = vld [vmem:[%s5775_s1 + $0x2a4] ss:$8 sps:$4 sm:$0xff]  }
  0x3c   :  { %2600 = vmatpush2.bf16.msra.mxu1 %v3824_v63  ;;  %2560 = vmatprep.subr.bf16.mxu0 %v3825_v0  ;;  %v3918_v63 = vld [vmem:[%s5775_s1 + $0x3a4] ss:$8 sps:$4 sm:$0xff]   ;;  %v3913_v0 = vld [vmem:[%s5775_s1 + $0x2a0] ss:$8 sps:$4 sm:$0xff]  }
  0x3d   :  { %2601 = vmatprep.subr.bf16.mxu1 %v3827_v1  ;;  %v3916_v1 = vld [vmem:[%s5775_s1 + $0x3a0] ss:$8 sps:$4 sm:$0xff]  }
  0x3f   :  { %2561 = vmatpush2.bf16.msra.mxu0 %v3829_v2  ;;  %v3921_v2 = vld [vmem:[%s5775_s1 + $0x294] ss:$8 sps:$4 sm:$0xff]  }
  0x40   :  { %2602 = vmatpush2.bf16.msra.mxu1 %v3830_v3  ;;  %2612 = vmatprep.subr.bf16.mxu0 %v3837_v4  ;;  %v3924_v3 = vld [vmem:[%s5775_s1 + $0x394] ss:$8 sps:$4 sm:$0xff]   ;;  %v3919_v4 = vld [vmem:[%s5775_s1 + $0x290] ss:$8 sps:$4 sm:$0xff]  }
  0x41   :  { %2653 = vmatprep.subr.bf16.mxu1 %v3840_v5  ;;  %v3922_v5 = vld [vmem:[%s5775_s1 + $0x390] ss:$8 sps:$4 sm:$0xff]  }
  0x42   :  { %2563 = vmatmul.mubr.bf16.vlgmr.msra.gmra.mxu0 %v3270_v6  ;;  %v3927_v6 = vld [vmem:[%s5775_s1 + $0x284] ss:$8 sps:$4 sm:$0xff]  }
  0x43   :  { %2604 = vmatmul.mubr.bf16.vlgmr.msra.gmra.mxu1 %v3272_v7  ;;  %2613 = vmatpush1.bf16.msra.mxu0 %v3835_v8  ;;  %v3930_v7 = vld [vmem:[%s5775_s1 + $0x384] ss:$8 sps:$4 sm:$0xff]   ;;  %v3925_v8 = vld [vmem:[%s5775_s1 + $0x280] ss:$8 sps:$4 sm:$0xff]  }
  0x44   :  { %2654 = vmatpush1.bf16.msra.mxu1 %v3838_v9  ;;  %2614 = vmatprep.subr.bf16.mxu0 %v3843_v10  ;;  %v3928_v9 = vld [vmem:[%s5775_s1 + $0x380] ss:$8 sps:$4 sm:$0xff]   ;;  %v3935_v10 = vld [vmem:[%s5775_s1 + $0x474] ss:$8 sps:$4 sm:$0xff]  }
  0x45   :  { %2655 = vmatprep.subr.bf16.mxu1 %v3846_v11  ;;  %2644 = vmatprep.mubr.bf16.mxu0 %v3275_v35  ;;  %v3940_v11 = vld [vmem:[%s5775_s1 + $0x574] ss:$8 sps:$4 sm:$0xff]   ;;  %v3962_v35 = vld [vmem:[%s5775_s1 + $0x530] ss:$8 sps:$4 sm:$0xff]  }
  0x46   :  { %2685 = vmatprep.mubr.bf16.mxu1 %v3277_v38  ;;  %v3965_v38 = vld [vmem:[%s5775_s1 + $0x420] ss:$8 sps:$4 sm:$0xff]  }
  0x47   :  { %2615 = vmatpush1.bf16.msra.mxu0 %v3841_v12  ;;  %v3274_v12 = vcombine.low %v4686_v32, %v4686_v32  ;;  %v3961_v32 = vld [vmem:[%s5775_s1 + $0x434] ss:$8 sps:$4 sm:$0xff]  }
  0x48   :  { %2656 = vmatpush1.bf16.msra.mxu1 %v3844_v13  ;;  %2616 = vmatprep.subr.bf16.mxu0 %v3849_v14  ;;  %v3933_v13 = vld [vmem:[%s5775_s1 + $0x470] ss:$8 sps:$4 sm:$0xff]   ;;  %v3276_v14 = vcombine.low %v4699_v36, %v4699_v36  ;;  %v3967_v36 = vld [vmem:[%s5775_s1 + $0x424] ss:$8 sps:$4 sm:$0xff]  }
  0x49   :  { %2657 = vmatprep.subr.bf16.mxu1 %v3852_v15  ;;  %v3938_v15 = vld [vmem:[%s5775_s1 + $0x570] ss:$8 sps:$4 sm:$0xff]  }
  0x4b   :  { %2617 = vmatpush1.bf16.msra.mxu0 %v3847_v16  ;;  %v3943_v16 = vld [vmem:[%s5775_s1 + $0x464] ss:$8 sps:$4 sm:$0xff]  }
  0x4c   :  { %2658 = vmatpush1.bf16.msra.mxu1 %v3850_v17  ;;  %2618 = vmatprep.subr.bf16.mxu0 %v3855_v18  ;;  %v3946_v17 = vld [vmem:[%s5775_s1 + $0x564] ss:$8 sps:$4 sm:$0xff]  }
  0x4d   :  { %2659 = vmatprep.subr.bf16.mxu1 %v3858_v19  ;;  %v4836_v18 = vld [vmem:[%s5776_s0 + $0x20] sm:$0xff] }
  0x4e   :  { %v3279_v19 = vcombine.high %v4836_v18, %v4836_v18 }
  0x4f   :  { %2619 = vmatpush1.bf16.msra.mxu0 %v3853_v20  ;;  %v4843_v20 = vld [vmem:[%s5776_s0 + $0x28] sm:$0xff] }
  0x50   :  { %2660 = vmatpush1.bf16.msra.mxu1 %v3856_v21  ;;  %2620 = vmatprep.subr.bf16.mxu0 %v3861_v22  ;;  %v3941_v21 = vld [vmem:[%s5775_s1 + $0x460] ss:$8 sps:$4 sm:$0xff]  }
  0x51   :  { %2661 = vmatprep.subr.bf16.mxu1 %v3864_v23  ;;  %v3944_v22 = vld [vmem:[%s5775_s1 + $0x560] ss:$8 sps:$4 sm:$0xff]   ;;  %v3281_v23 = vcombine.high %v4843_v20, %v4843_v20 }
  0x53   :  { %2621 = vmatpush1.bf16.msra.mxu0 %v3859_v24  ;;  %v3949_v24 = vld [vmem:[%s5775_s1 + $0x454] ss:$8 sps:$4 sm:$0xff]  }
  0x54   :  { %2662 = vmatpush1.bf16.msra.mxu1 %v3862_v25  ;;  %2622 = vmatprep.subr.bf16.mxu0 %v3867_v26  ;;  %v3952_v25 = vld [vmem:[%s5775_s1 + $0x554] ss:$8 sps:$4 sm:$0xff]   ;;  %v3947_v26 = vld [vmem:[%s5775_s1 + $0x450] ss:$8 sps:$4 sm:$0xff]  }
  0x55   :  { %2663 = vmatprep.subr.bf16.mxu1 %v3870_v27  ;;  %v3950_v27 = vld [vmem:[%s5775_s1 + $0x550] ss:$8 sps:$4 sm:$0xff]  }
  0x57   :  { %2623 = vmatpush1.bf16.msra.mxu0 %v3865_v28  ;;  %v3955_v28 = vld [vmem:[%s5775_s1 + $0x444] ss:$8 sps:$4 sm:$0xff]  }
  0x58   :  { %2664 = vmatpush1.bf16.msra.mxu1 %v3868_v29  ;;  %2624 = vmatprep.subr.bf16.mxu0 %v3873_v30  ;;  %v3958_v29 = vld [vmem:[%s5775_s1 + $0x544] ss:$8 sps:$4 sm:$0xff]   ;;  %v3953_v30 = vld [vmem:[%s5775_s1 + $0x440] ss:$8 sps:$4 sm:$0xff]  }
  0x59   :  { %2665 = vmatprep.subr.bf16.mxu1 %v3876_v31  ;;  %v3956_v31 = vld [vmem:[%s5775_s1 + $0x540] ss:$8 sps:$4 sm:$0xff]  }
  0x5b   :  { %2625 = vmatpush1.bf16.msra.mxu0 %v3871_v33  ;;  %v3964_v33 = vld [vmem:[%s5775_s1 + $0x534] ss:$8 sps:$4 sm:$0xff]  }
  0x5c   :  { %2666 = vmatpush1.bf16.msra.mxu1 %v3874_v34  ;;  %2626 = vmatprep.subr.bf16.mxu0 %v3879_v37  ;;  %v3959_v34 = vld [vmem:[%s5775_s1 + $0x430] ss:$8 sps:$4 sm:$0xff]   ;;  %v3970_v37 = vld [vmem:[%s5775_s1 + $0x524] ss:$8 sps:$4 sm:$0xff]  }
  0x5d   :  { %2667 = vmatprep.subr.bf16.mxu1 %v3882_v39  ;;  %v3968_v39 = vld [vmem:[%s5775_s1 + $0x520] ss:$8 sps:$4 sm:$0xff]  }
  0x5f   :  { %2627 = vmatpush1.bf16.msra.mxu0 %v3877_v40  ;;  %v3973_v40 = vld [vmem:[%s5775_s1 + $0x414] ss:$8 sps:$4 sm:$0xff]  }
  0x60   :  { %2668 = vmatpush1.bf16.msra.mxu1 %v3880_v41  ;;  %2628 = vmatprep.subr.bf16.mxu0 %v3885_v42  ;;  %v3976_v41 = vld [vmem:[%s5775_s1 + $0x514] ss:$8 sps:$4 sm:$0xff]   ;;  %v3971_v42 = vld [vmem:[%s5775_s1 + $0x410] ss:$8 sps:$4 sm:$0xff]  }
  0x61   :  { %2669 = vmatprep.subr.bf16.mxu1 %v3888_v43  ;;  %v3974_v43 = vld [vmem:[%s5775_s1 + $0x510] ss:$8 sps:$4 sm:$0xff]  }
  0x63   :  { %2629 = vmatpush2.bf16.msra.mxu0 %v3883_v44  ;;  %v3979_v44 = vld [vmem:[%s5775_s1 + $0x404] ss:$8 sps:$4 sm:$0xff]  }
  0x64   :  { %2670 = vmatpush2.bf16.msra.mxu1 %v3886_v45  ;;  %2630 = vmatprep.subr.bf16.mxu0 %v3891_v46  ;;  %v3982_v45 = vld [vmem:[%s5775_s1 + $0x504] ss:$8 sps:$4 sm:$0xff]   ;;  %v3977_v46 = vld [vmem:[%s5775_s1 + $0x400] ss:$8 sps:$4 sm:$0xff]  }
  0x65   :  { %2671 = vmatprep.subr.bf16.mxu1 %v3894_v47  ;;  %v3980_v47 = vld [vmem:[%s5775_s1 + $0x500] ss:$8 sps:$4 sm:$0xff]  }
  0x67   :  { %2631 = vmatpush2.bf16.msra.mxu0 %v3889_v48  ;;  %v3985_v48 = vld [vmem:[%s5775_s1 + $0x4f4] ss:$8 sps:$4 sm:$0xff]  }
  0x68   :  { %2672 = vmatpush2.bf16.msra.mxu1 %v3892_v49  ;;  %2632 = vmatprep.subr.bf16.mxu0 %v3897_v50  ;;  %v3988_v49 = vld [vmem:[%s5775_s1 + $0x5f4] ss:$8 sps:$4 sm:$0xff]   ;;  %v3983_v50 = vld [vmem:[%s5775_s1 + $0x4f0] ss:$8 sps:$4 sm:$0xff]  }
  0x69   :  { %2673 = vmatprep.subr.bf16.mxu1 %v3900_v51  ;;  %v3986_v51 = vld [vmem:[%s5775_s1 + $0x5f0] ss:$8 sps:$4 sm:$0xff]  }
  0x6b   :  { %2633 = vmatpush2.bf16.msra.mxu0 %v3895_v52  ;;  %v3991_v52 = vld [vmem:[%s5775_s1 + $0x4e4] ss:$8 sps:$4 sm:$0xff]  }
  0x6c   :  { %2674 = vmatpush2.bf16.msra.mxu1 %v3898_v53  ;;  %2634 = vmatprep.subr.bf16.mxu0 %v3903_v54  ;;  %v3994_v53 = vld [vmem:[%s5775_s1 + $0x5e4] ss:$8 sps:$4 sm:$0xff]   ;;  %v3989_v54 = vld [vmem:[%s5775_s1 + $0x4e0] ss:$8 sps:$4 sm:$0xff]  }
  0x6d   :  { %2675 = vmatprep.subr.bf16.mxu1 %v3906_v55  ;;  %v3992_v55 = vld [vmem:[%s5775_s1 + $0x5e0] ss:$8 sps:$4 sm:$0xff]  }
  0x6f   :  { %2635 = vmatpush2.bf16.msra.mxu0 %v3901_v56  ;;  %v3997_v56 = vld [vmem:[%s5775_s1 + $0x4d4] ss:$8 sps:$4 sm:$0xff]  }
  0x70   :  { %2676 = vmatpush2.bf16.msra.mxu1 %v3904_v57  ;;  %2636 = vmatprep.subr.bf16.mxu0 %v3909_v58  ;;  %v4000_v57 = vld [vmem:[%s5775_s1 + $0x5d4] ss:$8 sps:$4 sm:$0xff]   ;;  %v3995_v58 = vld [vmem:[%s5775_s1 + $0x4d0] ss:$8 sps:$4 sm:$0xff]  }
  0x71   :  { %2677 = vmatprep.subr.bf16.mxu1 %v3912_v59  ;;  %v3998_v59 = vld [vmem:[%s5775_s1 + $0x5d0] ss:$8 sps:$4 sm:$0xff]  }
  0x73   :  { %2637 = vmatpush2.bf16.msra.mxu0 %v3907_v60  ;;  %v4003_v60 = vld [vmem:[%s5775_s1 + $0x4c4] ss:$8 sps:$4 sm:$0xff]  }
  0x74   :  { %2678 = vmatpush2.bf16.msra.mxu1 %v3910_v61  ;;  %2638 = vmatprep.subr.bf16.mxu0 %v3915_v62  ;;  %v4006_v61 = vld [vmem:[%s5775_s1 + $0x5c4] ss:$8 sps:$4 sm:$0xff]   ;;  %v4001_v62 = vld [vmem:[%s5775_s1 + $0x4c0] ss:$8 sps:$4 sm:$0xff]  }
  0x75   :  { %2679 = vmatprep.subr.bf16.mxu1 %v3918_v63  ;;  %v4004_v63 = vld [vmem:[%s5775_s1 + $0x5c0] ss:$8 sps:$4 sm:$0xff]  }
  0x77   :  { %2639 = vmatpush2.bf16.msra.mxu0 %v3913_v0  ;;  %v4009_v0 = vld [vmem:[%s5775_s1 + $0x4b4] ss:$8 sps:$4 sm:$0xff]  }
  0x78   :  { %2680 = vmatpush2.bf16.msra.mxu1 %v3916_v1  ;;  %2640 = vmatprep.subr.bf16.mxu0 %v3921_v2  ;;  %v4012_v1 = vld [vmem:[%s5775_s1 + $0x5b4] ss:$8 sps:$4 sm:$0xff]   ;;  %v4007_v2 = vld [vmem:[%s5775_s1 + $0x4b0] ss:$8 sps:$4 sm:$0xff]  }
  0x79   :  { %2681 = vmatprep.subr.bf16.mxu1 %v3924_v3  ;;  %v4010_v3 = vld [vmem:[%s5775_s1 + $0x5b0] ss:$8 sps:$4 sm:$0xff]  }
  0x7b   :  { %2641 = vmatpush2.bf16.msra.mxu0 %v3919_v4  ;;  %v4015_v4 = vld [vmem:[%s5775_s1 + $0x4a4] ss:$8 sps:$4 sm:$0xff]  }
  0x7c   :  { %2682 = vmatpush2.bf16.msra.mxu1 %v3922_v5  ;;  %2642 = vmatprep.subr.bf16.mxu0 %v3927_v6  ;;  %v4018_v5 = vld [vmem:[%s5775_s1 + $0x5a4] ss:$8 sps:$4 sm:$0xff]   ;;  %v4013_v6 = vld [vmem:[%s5775_s1 + $0x4a0] ss:$8 sps:$4 sm:$0xff]  }
  0x7d   :  { %2683 = vmatprep.subr.bf16.mxu1 %v3930_v7  ;;  %v4016_v7 = vld [vmem:[%s5775_s1 + $0x5a0] ss:$8 sps:$4 sm:$0xff]  }
  0x7f   :  { %2643 = vmatpush2.bf16.msra.mxu0 %v3925_v8  ;;  %v4021_v8 = vld [vmem:[%s5775_s1 + $0x494] ss:$8 sps:$4 sm:$0xff]  }
  0x80   :  { %2684 = vmatpush2.bf16.msra.mxu1 %v3928_v9  ;;  %2694 = vmatprep.subr.bf16.mxu0 %v3935_v10  ;;  %v4024_v9 = vld [vmem:[%s5775_s1 + $0x594] ss:$8 sps:$4 sm:$0xff]   ;;  %v4019_v10 = vld [vmem:[%s5775_s1 + $0x490] ss:$8 sps:$4 sm:$0xff]  }
  0x81   :  { %2735 = vmatprep.subr.bf16.mxu1 %v3940_v11  ;;  %v4022_v11 = vld [vmem:[%s5775_s1 + $0x590] ss:$8 sps:$4 sm:$0xff]  }
  0x82   :  { %2645 = vmatmul.mubr.bf16.vlgmr.msra.gmra.mxu0 %v3274_v12  ;;  %v4027_v12 = vld [vmem:[%s5775_s1 + $0x484] ss:$8 sps:$4 sm:$0xff]  }
  0x83   :  { %2686 = vmatmul.mubr.bf16.vlgmr.msra.gmra.mxu1 %v3276_v14  ;;  %2695 = vmatpush1.bf16.msra.mxu0 %v3933_v13  ;;  %v4030_v13 = vld [vmem:[%s5775_s1 + $0x584] ss:$8 sps:$4 sm:$0xff]   ;;  %v4025_v14 = vld [vmem:[%s5775_s1 + $0x480] ss:$8 sps:$4 sm:$0xff]  }
  0x84   :  { %2736 = vmatpush1.bf16.msra.mxu1 %v3938_v15  ;;  %2696 = vmatprep.subr.bf16.mxu0 %v3943_v16  ;;  %v4028_v15 = vld [vmem:[%s5775_s1 + $0x580] ss:$8 sps:$4 sm:$0xff]   ;;  %v4035_v16 = vld [vmem:[%s5775_s1 + $0x674] ss:$8 sps:$4 sm:$0xff]  }
  0x85   :  { %2737 = vmatprep.subr.bf16.mxu1 %v3946_v17  ;;  %2726 = vmatprep.mubr.bf16.mxu0 %v3279_v19  ;;  %v4040_v17 = vld [vmem:[%s5775_s1 + $0x774] ss:$8 sps:$4 sm:$0xff]   ;;  %v4033_v19 = vld [vmem:[%s5775_s1 + $0x670] ss:$8 sps:$4 sm:$0xff]  }
  0x86   :  { %2767 = vmatprep.mubr.bf16.mxu1 %v3281_v23  ;;  %v3280_v23 = vcombine.low %v4843_v20, %v4843_v20 }
  0x87   :  { %2697 = vmatpush1.bf16.msra.mxu0 %v3941_v21  ;;  %v4038_v21 = vld [vmem:[%s5775_s1 + $0x770] ss:$8 sps:$4 sm:$0xff]  }
  0x88   :  { %2738 = vmatpush1.bf16.msra.mxu1 %v3944_v22  ;;  %2698 = vmatprep.subr.bf16.mxu0 %v3949_v24  ;;  %v3278_v22 = vcombine.low %v4836_v18, %v4836_v18  ;;  %v5040_v24 = vld [vmem:[%s5776_s0 + $0x30] sm:$0xff]  ;;  %v4046_v18 = vld [vmem:[%s5775_s1 + $0x764] ss:$8 sps:$4 sm:$0xff]  }
  0x89   :  { %2739 = vmatprep.subr.bf16.mxu1 %v3952_v25  ;;  %v5045_v25 = vld [vmem:[%s5776_s0 + $0x38] sm:$0xff]  ;;  %v3283_v20 = vcombine.high %v5040_v24, %v5040_v24 }
  0x8b   :  { %2699 = vmatpush1.bf16.msra.mxu0 %v3947_v26  ;;  %v4043_v26 = vld [vmem:[%s5775_s1 + $0x664] ss:$8 sps:$4 sm:$0xff]  }
  0x8c   :  { %2740 = vmatpush1.bf16.msra.mxu1 %v3950_v27  ;;  %2700 = vmatprep.subr.bf16.mxu0 %v3955_v28  ;;  %v3285_v27 = vcombine.high %v5045_v25, %v5045_v25  ;;  %v4041_v28 = vld [vmem:[%s5775_s1 + $0x660] ss:$8 sps:$4 sm:$0xff]  }
  0x8d   :  { %2741 = vmatprep.subr.bf16.mxu1 %v3958_v29  ;;  %v4044_v29 = vld [vmem:[%s5775_s1 + $0x760] ss:$8 sps:$4 sm:$0xff]  }
  0x8f   :  { %2701 = vmatpush1.bf16.msra.mxu0 %v3953_v30  ;;  %v4049_v30 = vld [vmem:[%s5775_s1 + $0x654] ss:$8 sps:$4 sm:$0xff]  }
  0x90   :  { %2742 = vmatpush1.bf16.msra.mxu1 %v3956_v31  ;;  %2702 = vmatprep.subr.bf16.mxu0 %v3961_v32  ;;  %v4052_v31 = vld [vmem:[%s5775_s1 + $0x754] ss:$8 sps:$4 sm:$0xff]   ;;  %v4047_v32 = vld [vmem:[%s5775_s1 + $0x650] ss:$8 sps:$4 sm:$0xff]  }
  0x91   :  { %2743 = vmatprep.subr.bf16.mxu1 %v3964_v33  ;;  %v4050_v33 = vld [vmem:[%s5775_s1 + $0x750] ss:$8 sps:$4 sm:$0xff]  }
  0x93   :  { %2703 = vmatpush1.bf16.msra.mxu0 %v3959_v34  ;;  %v4055_v34 = vld [vmem:[%s5775_s1 + $0x644] ss:$8 sps:$4 sm:$0xff]  }
  0x94   :  { %2744 = vmatpush1.bf16.msra.mxu1 %v3962_v35  ;;  %2704 = vmatprep.subr.bf16.mxu0 %v3967_v36  ;;  %v4058_v35 = vld [vmem:[%s5775_s1 + $0x744] ss:$8 sps:$4 sm:$0xff]   ;;  %v4053_v36 = vld [vmem:[%s5775_s1 + $0x640] ss:$8 sps:$4 sm:$0xff]  }
  0x95   :  { %2745 = vmatprep.subr.bf16.mxu1 %v3970_v37  ;;  %v4056_v37 = vld [vmem:[%s5775_s1 + $0x740] ss:$8 sps:$4 sm:$0xff]  }
  0x97   :  { %2705 = vmatpush1.bf16.msra.mxu0 %v3965_v38  ;;  %v4061_v38 = vld [vmem:[%s5775_s1 + $0x634] ss:$8 sps:$4 sm:$0xff]  }
  0x98   :  { %2746 = vmatpush1.bf16.msra.mxu1 %v3968_v39  ;;  %2706 = vmatprep.subr.bf16.mxu0 %v3973_v40  ;;  %v4064_v39 = vld [vmem:[%s5775_s1 + $0x734] ss:$8 sps:$4 sm:$0xff]   ;;  %v4059_v40 = vld [vmem:[%s5775_s1 + $0x630] ss:$8 sps:$4 sm:$0xff]  }
  0x99   :  { %2747 = vmatprep.subr.bf16.mxu1 %v3976_v41  ;;  %v4062_v41 = vld [vmem:[%s5775_s1 + $0x730] ss:$8 sps:$4 sm:$0xff]  }
  0x9b   :  { %2707 = vmatpush1.bf16.msra.mxu0 %v3971_v42  ;;  %v4067_v42 = vld [vmem:[%s5775_s1 + $0x624] ss:$8 sps:$4 sm:$0xff]  }
  0x9c   :  { %2748 = vmatpush1.bf16.msra.mxu1 %v3974_v43  ;;  %2708 = vmatprep.subr.bf16.mxu0 %v3979_v44  ;;  %v4070_v43 = vld [vmem:[%s5775_s1 + $0x724] ss:$8 sps:$4 sm:$0xff]   ;;  %v4065_v44 = vld [vmem:[%s5775_s1 + $0x620] ss:$8 sps:$4 sm:$0xff]  }
  0x9d   :  { %2749 = vmatprep.subr.bf16.mxu1 %v3982_v45  ;;  %v4068_v45 = vld [vmem:[%s5775_s1 + $0x720] ss:$8 sps:$4 sm:$0xff]  }
  0x9f   :  { %2709 = vmatpush1.bf16.msra.mxu0 %v3977_v46  ;;  %v4073_v46 = vld [vmem:[%s5775_s1 + $0x614] ss:$8 sps:$4 sm:$0xff]  }
  0xa0   :  { %2750 = vmatpush1.bf16.msra.mxu1 %v3980_v47  ;;  %2710 = vmatprep.subr.bf16.mxu0 %v3985_v48  ;;  %v4076_v47 = vld [vmem:[%s5775_s1 + $0x714] ss:$8 sps:$4 sm:$0xff]   ;;  %v4071_v48 = vld [vmem:[%s5775_s1 + $0x610] ss:$8 sps:$4 sm:$0xff]  }
  0xa1   :  { %2751 = vmatprep.subr.bf16.mxu1 %v3988_v49  ;;  %v4074_v49 = vld [vmem:[%s5775_s1 + $0x710] ss:$8 sps:$4 sm:$0xff]  }
  0xa3   :  { %2711 = vmatpush2.bf16.msra.mxu0 %v3983_v50  ;;  %v4079_v50 = vld [vmem:[%s5775_s1 + $0x604] ss:$8 sps:$4 sm:$0xff]  }
  0xa4   :  { %2752 = vmatpush2.bf16.msra.mxu1 %v3986_v51  ;;  %2712 = vmatprep.subr.bf16.mxu0 %v3991_v52  ;;  %v4082_v51 = vld [vmem:[%s5775_s1 + $0x704] ss:$8 sps:$4 sm:$0xff]   ;;  %v4077_v52 = vld [vmem:[%s5775_s1 + $0x600] ss:$8 sps:$4 sm:$0xff]  }
  0xa5   :  { %2753 = vmatprep.subr.bf16.mxu1 %v3994_v53  ;;  %v4080_v53 = vld [vmem:[%s5775_s1 + $0x700] ss:$8 sps:$4 sm:$0xff]  }
  0xa7   :  { %2713 = vmatpush2.bf16.msra.mxu0 %v3989_v54  ;;  %v4085_v54 = vld [vmem:[%s5775_s1 + $0x6f4] ss:$8 sps:$4 sm:$0xff]  }
  0xa8   :  { %2754 = vmatpush2.bf16.msra.mxu1 %v3992_v55  ;;  %2714 = vmatprep.subr.bf16.mxu0 %v3997_v56  ;;  %v4088_v55 = vld [vmem:[%s5775_s1 + $0x7f4] ss:$8 sps:$4 sm:$0xff]   ;;  %v4083_v56 = vld [vmem:[%s5775_s1 + $0x6f0] ss:$8 sps:$4 sm:$0xff]  }
  0xa9   :  { %2755 = vmatprep.subr.bf16.mxu1 %v4000_v57  ;;  %v4086_v57 = vld [vmem:[%s5775_s1 + $0x7f0] ss:$8 sps:$4 sm:$0xff]  }
  0xab   :  { %2715 = vmatpush2.bf16.msra.mxu0 %v3995_v58  ;;  %v4091_v58 = vld [vmem:[%s5775_s1 + $0x6e4] ss:$8 sps:$4 sm:$0xff]  }
  0xac   :  { %2756 = vmatpush2.bf16.msra.mxu1 %v3998_v59  ;;  %2716 = vmatprep.subr.bf16.mxu0 %v4003_v60  ;;  %v4094_v59 = vld [vmem:[%s5775_s1 + $0x7e4] ss:$8 sps:$4 sm:$0xff]   ;;  %v4089_v60 = vld [vmem:[%s5775_s1 + $0x6e0] ss:$8 sps:$4 sm:$0xff]  }
  0xad   :  { %2757 = vmatprep.subr.bf16.mxu1 %v4006_v61  ;;  %v4092_v61 = vld [vmem:[%s5775_s1 + $0x7e0] ss:$8 sps:$4 sm:$0xff]  }
  0xaf   :  { %2717 = vmatpush2.bf16.msra.mxu0 %v4001_v62  ;;  %v4097_v62 = vld [vmem:[%s5775_s1 + $0x6d4] ss:$8 sps:$4 sm:$0xff]  }
  0xb0   :  { %2758 = vmatpush2.bf16.msra.mxu1 %v4004_v63  ;;  %2718 = vmatprep.subr.bf16.mxu0 %v4009_v0  ;;  %v4100_v63 = vld [vmem:[%s5775_s1 + $0x7d4] ss:$8 sps:$4 sm:$0xff]   ;;  %v4095_v0 = vld [vmem:[%s5775_s1 + $0x6d0] ss:$8 sps:$4 sm:$0xff]  }
  0xb1   :  { %2759 = vmatprep.subr.bf16.mxu1 %v4012_v1  ;;  %v4098_v1 = vld [vmem:[%s5775_s1 + $0x7d0] ss:$8 sps:$4 sm:$0xff]  }
  0xb3   :  { %2719 = vmatpush2.bf16.msra.mxu0 %v4007_v2  ;;  %v4103_v2 = vld [vmem:[%s5775_s1 + $0x6c4] ss:$8 sps:$4 sm:$0xff]  }
  0xb4   :  { %2760 = vmatpush2.bf16.msra.mxu1 %v4010_v3  ;;  %2720 = vmatprep.subr.bf16.mxu0 %v4015_v4  ;;  %v4106_v3 = vld [vmem:[%s5775_s1 + $0x7c4] ss:$8 sps:$4 sm:$0xff]   ;;  %v4101_v4 = vld [vmem:[%s5775_s1 + $0x6c0] ss:$8 sps:$4 sm:$0xff]  }
  0xb5   :  { %2761 = vmatprep.subr.bf16.mxu1 %v4018_v5  ;;  %v4104_v5 = vld [vmem:[%s5775_s1 + $0x7c0] ss:$8 sps:$4 sm:$0xff]  }
  0xb7   :  { %2721 = vmatpush2.bf16.msra.mxu0 %v4013_v6  ;;  %v4109_v6 = vld [vmem:[%s5775_s1 + $0x6b4] ss:$8 sps:$4 sm:$0xff]  }
  0xb8   :  { %2762 = vmatpush2.bf16.msra.mxu1 %v4016_v7  ;;  %2722 = vmatprep.subr.bf16.mxu0 %v4021_v8  ;;  %v4112_v7 = vld [vmem:[%s5775_s1 + $0x7b4] ss:$8 sps:$4 sm:$0xff]   ;;  %v4107_v8 = vld [vmem:[%s5775_s1 + $0x6b0] ss:$8 sps:$4 sm:$0xff]  }
  0xb9   :  { %2763 = vmatprep.subr.bf16.mxu1 %v4024_v9  ;;  %v4110_v9 = vld [vmem:[%s5775_s1 + $0x7b0] ss:$8 sps:$4 sm:$0xff]  }
  0xbb   :  { %2723 = vmatpush2.bf16.msra.mxu0 %v4019_v10  ;;  %v4115_v10 = vld [vmem:[%s5775_s1 + $0x6a4] ss:$8 sps:$4 sm:$0xff]  }
  0xbc   :  { %2764 = vmatpush2.bf16.msra.mxu1 %v4022_v11  ;;  %2724 = vmatprep.subr.bf16.mxu0 %v4027_v12  ;;  %v4118_v11 = vld [vmem:[%s5775_s1 + $0x7a4] ss:$8 sps:$4 sm:$0xff]   ;;  %v4113_v12 = vld [vmem:[%s5775_s1 + $0x6a0] ss:$8 sps:$4 sm:$0xff]  }
  0xbd   :  { %2765 = vmatprep.subr.bf16.mxu1 %v4030_v13  ;;  %v4116_v13 = vld [vmem:[%s5775_s1 + $0x7a0] ss:$8 sps:$4 sm:$0xff]  }
  0xbf   :  { %2725 = vmatpush2.bf16.msra.mxu0 %v4025_v14  ;;  %v4121_v14 = vld [vmem:[%s5775_s1 + $0x694] ss:$8 sps:$4 sm:$0xff]  }
  0xc0   :  { %2766 = vmatpush2.bf16.msra.mxu1 %v4028_v15  ;;  %2776 = vmatprep.subr.bf16.mxu0 %v4035_v16  ;;  %v4124_v15 = vld [vmem:[%s5775_s1 + $0x794] ss:$8 sps:$4 sm:$0xff]   ;;  %v4119_v16 = vld [vmem:[%s5775_s1 + $0x690] ss:$8 sps:$4 sm:$0xff]  }
  0xc1   :  { %2817 = vmatprep.subr.bf16.mxu1 %v4040_v17  ;;  %v4122_v17 = vld [vmem:[%s5775_s1 + $0x790] ss:$8 sps:$4 sm:$0xff]  }
  0xc2   :  { %2727 = vmatmul.mubr.bf16.vlgmr.msra.gmra.mxu0 %v3278_v22  ;;  %v4125_v22 = vld [vmem:[%s5775_s1 + $0x680] ss:$8 sps:$4 sm:$0xff]  }
  0xc3   :  { %2768 = vmatmul.mubr.bf16.vlgmr.msra.gmra.mxu1 %v3280_v23  ;;  %2777 = vmatpush1.bf16.msra.mxu0 %v4033_v19  ;;  %v4127_v19 = vld [vmem:[%s5775_s1 + $0x684] ss:$8 sps:$4 sm:$0xff]   ;;  %v4128_v23 = vld [vmem:[%s5775_s1 + $0x780] ss:$8 sps:$4 sm:$0xff]  }
  0xc4   :  { %2818 = vmatpush1.bf16.msra.mxu1 %v4038_v21  ;;  %2778 = vmatprep.subr.bf16.mxu0 %v4043_v26  ;;  %v4130_v21 = vld [vmem:[%s5775_s1 + $0x784] ss:$8 sps:$4 sm:$0xff]   ;;  %v4135_v26 = vld [vmem:[%s5775_s1 + $0x874] ss:$8 sps:$4 sm:$0xff]  }
  0xc5   :  { %2819 = vmatprep.subr.bf16.mxu1 %v4046_v18  ;;  %2808 = vmatprep.mubr.bf16.mxu0 %v3283_v20  ;;  %v4140_v18 = vld [vmem:[%s5775_s1 + $0x974] ss:$8 sps:$4 sm:$0xff]   ;;  %v5240_v20 = vld [vmem:[%s5776_s0 + $0x40] sm:$0xff] }
  0xc6   :  { %2849 = vmatprep.mubr.bf16.mxu1 %v3285_v27  ;;  %v3282_v27 = vcombine.low %v5040_v24, %v5040_v24  ;;  %v4143_v24 = vld [vmem:[%s5775_s1 + $0x864] ss:$8 sps:$4 sm:$0xff]  }
  0xc7   :  { %2779 = vmatpush1.bf16.msra.mxu0 %v4041_v28  ;;  %v3284_v28 = vcombine.low %v5045_v25, %v5045_v25  ;;  %v4146_v25 = vld [vmem:[%s5775_s1 + $0x964] ss:$8 sps:$4 sm:$0xff]  }
  0xc8   :  { %2820 = vmatpush1.bf16.msra.mxu1 %v4044_v29  ;;  %2780 = vmatprep.subr.bf16.mxu0 %v4049_v30  ;;  %v5249_v29 = vld [vmem:[%s5776_s0 + $0x48] sm:$0xff]  ;;  %v4133_v30 = vld [vmem:[%s5775_s1 + $0x870] ss:$8 sps:$4 sm:$0xff]  }
  0xc9   :  { %2821 = vmatprep.subr.bf16.mxu1 %v4052_v31  ;;  %v4138_v31 = vld [vmem:[%s5775_s1 + $0x970] ss:$8 sps:$4 sm:$0xff]  }
  0xcb   :  { %2781 = vmatpush1.bf16.msra.mxu0 %v4047_v32  ;;  %v3287_v32 = vcombine.high %v5240_v20, %v5240_v20 }
  0xcc   :  { %2822 = vmatpush1.bf16.msra.mxu1 %v4050_v33  ;;  %2782 = vmatprep.subr.bf16.mxu0 %v4055_v34  ;;  %v3289_v33 = vcombine.high %v5249_v29, %v5249_v29 }
  0xcd   :  { %2823 = vmatprep.subr.bf16.mxu1 %v4058_v35 }
  0xcf   :  { %2783 = vmatpush1.bf16.msra.mxu0 %v4053_v36  ;;  %v4141_v36 = vld [vmem:[%s5775_s1 + $0x860] ss:$8 sps:$4 sm:$0xff]  }
  0xd0   :  { %2824 = vmatpush1.bf16.msra.mxu1 %v4056_v37  ;;  %2784 = vmatprep.subr.bf16.mxu0 %v4061_v38  ;;  %v4144_v38 = vld [vmem:[%s5775_s1 + $0x960] ss:$8 sps:$4 sm:$0xff]  }
  0xd1   :  { %2825 = vmatprep.subr.bf16.mxu1 %v4064_v39  ;;  %v4149_v39 = vld [vmem:[%s5775_s1 + $0x854] ss:$8 sps:$4 sm:$0xff]  }
  0xd3   :  { %2785 = vmatpush1.bf16.msra.mxu0 %v4059_v40 }
  0xd4   :  { %2826 = vmatpush1.bf16.msra.mxu1 %v4062_v41  ;;  %2786 = vmatprep.subr.bf16.mxu0 %v4067_v42  ;;  %v4152_v42 = vld [vmem:[%s5775_s1 + $0x954] ss:$8 sps:$4 sm:$0xff]  }
  0xd5   :  { %2827 = vmatprep.subr.bf16.mxu1 %v4070_v43 }
  0xd7   :  { %2787 = vmatpush1.bf16.msra.mxu0 %v4065_v44  ;;  %v4147_v44 = vld [vmem:[%s5775_s1 + $0x850] ss:$8 sps:$4 sm:$0xff]  }
  0xd8   :  { %2828 = vmatpush1.bf16.msra.mxu1 %v4068_v45  ;;  %2788 = vmatprep.subr.bf16.mxu0 %v4073_v46  ;;  %v4150_v45 = vld [vmem:[%s5775_s1 + $0x950] ss:$8 sps:$4 sm:$0xff]  }
  0xd9   :  { %2829 = vmatprep.subr.bf16.mxu1 %v4076_v47 }
  0xdb   :  { %2789 = vmatpush1.bf16.msra.mxu0 %v4071_v48 }
  0xdc   :  { %2830 = vmatpush1.bf16.msra.mxu1 %v4074_v49  ;;  %2790 = vmatprep.subr.bf16.mxu0 %v4079_v50  ;;  %v4155_v49 = vld [vmem:[%s5775_s1 + $0x844] ss:$8 sps:$4 sm:$0xff]  }
  0xdd   :  { %2831 = vmatprep.subr.bf16.mxu1 %v4082_v51  ;;  %v4158_v50 = vld [vmem:[%s5775_s1 + $0x944] ss:$8 sps:$4 sm:$0xff]  }
  0xdf   :  { %2791 = vmatpush1.bf16.msra.mxu0 %v4077_v52  ;;  %v4153_v52 = vld [vmem:[%s5775_s1 + $0x840] ss:$8 sps:$4 sm:$0xff]  }
  0xe0   :  { %2832 = vmatpush1.bf16.msra.mxu1 %v4080_v53  ;;  %2792 = vmatprep.subr.bf16.mxu0 %v4085_v54  ;;  %v4156_v53 = vld [vmem:[%s5775_s1 + $0x940] ss:$8 sps:$4 sm:$0xff]   ;;  %v4161_v54 = vld [vmem:[%s5775_s1 + $0x834] ss:$8 sps:$4 sm:$0xff]  }
  0xe1   :  { %2833 = vmatprep.subr.bf16.mxu1 %v4088_v55  ;;  %v4164_v55 = vld [vmem:[%s5775_s1 + $0x934] ss:$8 sps:$4 sm:$0xff]  }
  0xe3   :  { %2793 = vmatpush2.bf16.msra.mxu0 %v4083_v56  ;;  %v4159_v56 = vld [vmem:[%s5775_s1 + $0x830] ss:$8 sps:$4 sm:$0xff]  }
  0xe4   :  { %2834 = vmatpush2.bf16.msra.mxu1 %v4086_v57  ;;  %2794 = vmatprep.subr.bf16.mxu0 %v4091_v58  ;;  %v4162_v57 = vld [vmem:[%s5775_s1 + $0x930] ss:$8 sps:$4 sm:$0xff]   ;;  %v4167_v58 = vld [vmem:[%s5775_s1 + $0x824] ss:$8 sps:$4 sm:$0xff]  }
  0xe5   :  { %2835 = vmatprep.subr.bf16.mxu1 %v4094_v59  ;;  %v4170_v59 = vld [vmem:[%s5775_s1 + $0x924] ss:$8 sps:$4 sm:$0xff]  }
  0xe7   :  { %2795 = vmatpush2.bf16.msra.mxu0 %v4089_v60  ;;  %v4165_v60 = vld [vmem:[%s5775_s1 + $0x820] ss:$8 sps:$4 sm:$0xff]  }
  0xe8   :  { %2836 = vmatpush2.bf16.msra.mxu1 %v4092_v61  ;;  %2796 = vmatprep.subr.bf16.mxu0 %v4097_v62  ;;  %v4168_v61 = vld [vmem:[%s5775_s1 + $0x920] ss:$8 sps:$4 sm:$0xff]   ;;  %v4173_v62 = vld [vmem:[%s5775_s1 + $0x814] ss:$8 sps:$4 sm:$0xff]  }
  0xe9   :  { %2837 = vmatprep.subr.bf16.mxu1 %v4100_v63  ;;  %v4176_v63 = vld [vmem:[%s5775_s1 + $0x914] ss:$8 sps:$4 sm:$0xff]  }
  0xeb   :  { %2797 = vmatpush2.bf16.msra.mxu0 %v4095_v0  ;;  %v4171_v0 = vld [vmem:[%s5775_s1 + $0x810] ss:$8 sps:$4 sm:$0xff]  }
  0xec   :  { %2838 = vmatpush2.bf16.msra.mxu1 %v4098_v1  ;;  %2798 = vmatprep.subr.bf16.mxu0 %v4103_v2  ;;  %v4174_v1 = vld [vmem:[%s5775_s1 + $0x910] ss:$8 sps:$4 sm:$0xff]   ;;  %v4179_v2 = vld [vmem:[%s5775_s1 + $0x804] ss:$8 sps:$4 sm:$0xff]  }
  0xed   :  { %2839 = vmatprep.subr.bf16.mxu1 %v4106_v3  ;;  %v4182_v3 = vld [vmem:[%s5775_s1 + $0x904] ss:$8 sps:$4 sm:$0xff]  }
  0xef   :  { %2799 = vmatpush2.bf16.msra.mxu0 %v4101_v4  ;;  %v4177_v4 = vld [vmem:[%s5775_s1 + $0x800] ss:$8 sps:$4 sm:$0xff]  }
  0xf0   :  { %2840 = vmatpush2.bf16.msra.mxu1 %v4104_v5  ;;  %2800 = vmatprep.subr.bf16.mxu0 %v4109_v6  ;;  %v4180_v5 = vld [vmem:[%s5775_s1 + $0x900] ss:$8 sps:$4 sm:$0xff]   ;;  %v4185_v6 = vld [vmem:[%s5775_s1 + $0x8f4] ss:$8 sps:$4 sm:$0xff]  }
  0xf1   :  { %2841 = vmatprep.subr.bf16.mxu1 %v4112_v7  ;;  %v4188_v7 = vld [vmem:[%s5775_s1 + $0x9f4] ss:$8 sps:$4 sm:$0xff]  }
  0xf3   :  { %2801 = vmatpush2.bf16.msra.mxu0 %v4107_v8  ;;  %v4183_v8 = vld [vmem:[%s5775_s1 + $0x8f0] ss:$8 sps:$4 sm:$0xff]  }
  0xf4   :  { %2842 = vmatpush2.bf16.msra.mxu1 %v4110_v9  ;;  %2802 = vmatprep.subr.bf16.mxu0 %v4115_v10  ;;  %v4186_v9 = vld [vmem:[%s5775_s1 + $0x9f0] ss:$8 sps:$4 sm:$0xff]   ;;  %v4191_v10 = vld [vmem:[%s5775_s1 + $0x8e4] ss:$8 sps:$4 sm:$0xff]  }
  0xf5   :  { %2843 = vmatprep.subr.bf16.mxu1 %v4118_v11  ;;  %v4194_v11 = vld [vmem:[%s5775_s1 + $0x9e4] ss:$8 sps:$4 sm:$0xff]  }
  0xf7   :  { %2803 = vmatpush2.bf16.msra.mxu0 %v4113_v12  ;;  %v4189_v12 = vld [vmem:[%s5775_s1 + $0x8e0] ss:$8 sps:$4 sm:$0xff]  }
  0xf8   :  { %2844 = vmatpush2.bf16.msra.mxu1 %v4116_v13  ;;  %2804 = vmatprep.subr.bf16.mxu0 %v4121_v14  ;;  %v4192_v13 = vld [vmem:[%s5775_s1 + $0x9e0] ss:$8 sps:$4 sm:$0xff]   ;;  %v4197_v14 = vld [vmem:[%s5775_s1 + $0x8d4] ss:$8 sps:$4 sm:$0xff]  }
  0xf9   :  { %2845 = vmatprep.subr.bf16.mxu1 %v4124_v15  ;;  %v4200_v15 = vld [vmem:[%s5775_s1 + $0x9d4] ss:$8 sps:$4 sm:$0xff]  }
  0xfb   :  { %2805 = vmatpush2.bf16.msra.mxu0 %v4119_v16  ;;  %v4195_v16 = vld [vmem:[%s5775_s1 + $0x8d0] ss:$8 sps:$4 sm:$0xff]  }
  0xfc   :  { %2846 = vmatpush2.bf16.msra.mxu1 %v4122_v17  ;;  %2806 = vmatprep.subr.bf16.mxu0 %v4127_v19  ;;  %v4198_v17 = vld [vmem:[%s5775_s1 + $0x9d0] ss:$8 sps:$4 sm:$0xff]   ;;  %v4203_v19 = vld [vmem:[%s5775_s1 + $0x8c4] ss:$8 sps:$4 sm:$0xff]  }
  0xfd   :  { %2847 = vmatprep.subr.bf16.mxu1 %v4130_v21  ;;  %v4206_v21 = vld [vmem:[%s5775_s1 + $0x9c4] ss:$8 sps:$4 sm:$0xff]  }
  0xff   :  { %2807 = vmatpush2.bf16.msra.mxu0 %v4125_v22  ;;  %v4201_v22 = vld [vmem:[%s5775_s1 + $0x8c0] ss:$8 sps:$4 sm:$0xff]  }
 0x100   :  { %2848 = vmatpush2.bf16.msra.mxu1 %v4128_v23  ;;  %2858 = vmatprep.subr.bf16.mxu0 %v4135_v26  ;;  %v4204_v23 = vld [vmem:[%s5775_s1 + $0x9c0] ss:$8 sps:$4 sm:$0xff]   ;;  %v4209_v26 = vld [vmem:[%s5775_s1 + $0x8b4] ss:$8 sps:$4 sm:$0xff]  }
 0x101   :  { %2899 = vmatprep.subr.bf16.mxu1 %v4140_v18  ;;  %v4212_v18 = vld [vmem:[%s5775_s1 + $0x9b4] ss:$8 sps:$4 sm:$0xff]  }
 0x102   :  { %v2564_v34 = vpop.f32.mrf.mxu0  ;;  %2809 = vmatmul.mubr.bf16.vlgmr.msra.gmra.mxu0 %v3282_v27  ;;  %v4207_v27 = vld [vmem:[%s5775_s1 + $0x8b0] ss:$8 sps:$4 sm:$0xff]  }
 0x103   :  { %v2605_v35 = vpop.f32.mrf.mxu1  ;;  %2850 = vmatmul.mubr.bf16.vlgmr.msra.gmra.mxu1 %v3284_v28  ;;  %2859 = vmatpush1.bf16.msra.mxu0 %v4133_v30  ;;  %v4210_v28 = vld [vmem:[%s5775_s1 + $0x9b0] ss:$8 sps:$4 sm:$0xff]   ;;  %v4215_v30 = vld [vmem:[%s5775_s1 + $0x8a4] ss:$8 sps:$4 sm:$0xff]  }
 0x104   :  { %v5270_v37 = vadd.f32 %v2605_v35, %v2564_v34  ;;  %2900 = vmatpush1.bf16.msra.mxu1 %v4138_v31  ;;  %v2566_v40 = vpop.f32.mrf.mxu0  ;;  %2860 = vmatprep.subr.bf16.mxu0 %v4143_v24  ;;  %v4218_v31 = vld [vmem:[%s5775_s1 + $0x9a4] ss:$8 sps:$4 sm:$0xff]   ;;  %v4213_v24 = vld [vmem:[%s5775_s1 + $0x8a0] ss:$8 sps:$4 sm:$0xff]   ;;  %v4219_v34 = vld [vmem:[%s5775_s1 + $0x890] ss:$8 sps:$4 sm:$0xff]  }
 0x105   :  { %v2607_v41 = vpop.f32.mrf.mxu1  ;;  %2901 = vmatprep.subr.bf16.mxu1 %v4146_v25  ;;  %2890 = vmatprep.mubr.bf16.mxu0 %v3287_v32  ;;  %v4216_v25 = vld [vmem:[%s5775_s1 + $0x9a0] ss:$8 sps:$4 sm:$0xff]   ;;  %v4221_v32 = vld [vmem:[%s5775_s1 + $0x894] ss:$8 sps:$4 sm:$0xff]   ;;  %v4222_v35 = vld [vmem:[%s5775_s1 + $0x990] ss:$8 sps:$4 sm:$0xff]  }
 0x106   :  { %v5281_v43 = vadd.f32 %v2607_v41, %v2566_v40  ;;  %2931 = vmatprep.mubr.bf16.mxu1 %v3289_v33  ;;  %v2568_v46 = vpop.f32.mrf.mxu0  ;;  %v4224_v33 = vld [vmem:[%s5775_s1 + $0x994] ss:$8 sps:$4 sm:$0xff]   ;;  %v4228_v40 = vld [vmem:[%s5775_s1 + $0x980] ss:$8 sps:$4 sm:$0xff]  }
 0x107   :  { %v2609_v47 = vpop.f32.mrf.mxu1  ;;  %2861 = vmatpush1.bf16.msra.mxu0 %v4141_v36  ;;  %v4227_v36 = vld [vmem:[%s5775_s1 + $0x884] ss:$8 sps:$4 sm:$0xff]   ;;  %v4235_v41 = vld [vmem:[%s5775_s1 + $0xa74] ss:$8 sps:$4 sm:$0xff]  }
 0x108   :  { %2902 = vmatpush1.bf16.msra.mxu1 %v4144_v38  ;;  %v2569_v48 = vpop.f32.mrf.mxu0  ;;  %2862 = vmatprep.subr.bf16.mxu0 %v4149_v39  ;;  %v4230_v38 = vld [vmem:[%s5775_s1 + $0x984] ss:$8 sps:$4 sm:$0xff]   ;;  %v4225_v39 = vld [vmem:[%s5775_s1 + $0x880] ss:$8 sps:$4 sm:$0xff]   ;;  %v5458_v46 = vld [vmem:[%s5776_s0 + $0x50] sm:$0xff] }
 0x109   :  { %2903 = vmatprep.subr.bf16.mxu1 %v4152_v42  ;;  %v2610_v51 = vpop.f32.mrf.mxu1  ;;  %v4240_v42 = vld [vmem:[%s5775_s1 + $0xb74] ss:$8 sps:$4 sm:$0xff]   ;;  %v4233_v48 = vld [vmem:[%s5775_s1 + $0xa70] ss:$8 sps:$4 sm:$0xff]  }
 0x10a   :  { %v5463_v47 = vld [vmem:[%s5776_s0 + $0x58] sm:$0xff] }
 0x10b   :  { %2863 = vmatpush1.bf16.msra.mxu0 %v4147_v44  ;;  %v3286_v44 = vcombine.low %v5240_v20, %v5240_v20  ;;  %v4238_v20 = vld [vmem:[%s5775_s1 + $0xb70] ss:$8 sps:$4 sm:$0xff]   ;;  %v3293_v51 = vcombine.high %v5463_v47, %v5463_v47 }
 0x10c   :  { %2904 = vmatpush1.bf16.msra.mxu1 %v4150_v45  ;;  %2864 = vmatprep.subr.bf16.mxu0 %v4155_v49  ;;  %v3288_v45 = vcombine.low %v5249_v29, %v5249_v29  ;;  %v4243_v29 = vld [vmem:[%s5775_s1 + $0xa64] ss:$8 sps:$4 sm:$0xff]  }
 0x10d   :  { %2905 = vmatprep.subr.bf16.mxu1 %v4158_v50  ;;  %v4246_v49 = vld [vmem:[%s5775_s1 + $0xb64] ss:$8 sps:$4 sm:$0xff]   ;;  %v3291_v50 = vcombine.high %v5458_v46, %v5458_v46 }
 0x10f   :  { %2865 = vmatpush1.bf16.msra.mxu0 %v4153_v52 }
 0x110   :  { %2906 = vmatpush1.bf16.msra.mxu1 %v4156_v53  ;;  %2866 = vmatprep.subr.bf16.mxu0 %v4161_v54 }
 0x111   :  { %2907 = vmatprep.subr.bf16.mxu1 %v4164_v55  ;;  %v4241_v55 = vld [vmem:[%s5775_s1 + $0xa60] ss:$8 sps:$4 sm:$0xff]  }
 0x113   :  { %2867 = vmatpush1.bf16.msra.mxu0 %v4159_v56  ;;  %v4244_v56 = vld [vmem:[%s5775_s1 + $0xb60] ss:$8 sps:$4 sm:$0xff]  }
 0x114   :  { %2908 = vmatpush1.bf16.msra.mxu1 %v4162_v57  ;;  %2868 = vmatprep.subr.bf16.mxu0 %v4167_v58 }
 0x115   :  { %2909 = vmatprep.subr.bf16.mxu1 %v4170_v59  ;;  %v4249_v59 = vld [vmem:[%s5775_s1 + $0xa54] ss:$8 sps:$4 sm:$0xff]  }
 0x117   :  { %2869 = vmatpush1.bf16.msra.mxu0 %v4165_v60 }
 0x118   :  { %2910 = vmatpush1.bf16.msra.mxu1 %v4168_v61  ;;  %2870 = vmatprep.subr.bf16.mxu0 %v4173_v62 }
 0x119   :  { %2911 = vmatprep.subr.bf16.mxu1 %v4176_v63 }
 0x11b   :  { %2871 = vmatpush1.bf16.msra.mxu0 %v4171_v0 }
 0x11c   :  { %2912 = vmatpush1.bf16.msra.mxu1 %v4174_v1  ;;  %2872 = vmatprep.subr.bf16.mxu0 %v4179_v2  ;;  %v4247_v1 = vld [vmem:[%s5775_s1 + $0xa50] ss:$8 sps:$4 sm:$0xff]  }
 0x11d   :  { %2913 = vmatprep.subr.bf16.mxu1 %v4182_v3  ;;  %v4250_v2 = vld [vmem:[%s5775_s1 + $0xb50] ss:$8 sps:$4 sm:$0xff]  }
 0x11f   :  { %2873 = vmatpush1.bf16.msra.mxu0 %v4177_v4  ;;  %v4258_v4 = vld [vmem:[%s5775_s1 + $0xb44] ss:$8 sps:$4 sm:$0xff]  }
 0x120   :  { %2914 = vmatpush1.bf16.msra.mxu1 %v4180_v5  ;;  %2874 = vmatprep.subr.bf16.mxu0 %v4185_v6  ;;  %v4253_v6 = vld [vmem:[%s5775_s1 + $0xa40] ss:$8 sps:$4 sm:$0xff]  }
 0x121   :  { %2915 = vmatprep.subr.bf16.mxu1 %v4188_v7  ;;  %v4256_v7 = vld [vmem:[%s5775_s1 + $0xb40] ss:$8 sps:$4 sm:$0xff]  }
 0x123   :  { %2875 = vmatpush2.bf16.msra.mxu0 %v4183_v8  ;;  %v4261_v8 = vld [vmem:[%s5775_s1 + $0xa34] ss:$8 sps:$4 sm:$0xff]  }
 0x124   :  { %2916 = vmatpush2.bf16.msra.mxu1 %v4186_v9  ;;  %2876 = vmatprep.subr.bf16.mxu0 %v4191_v10  ;;  %v4264_v9 = vld [vmem:[%s5775_s1 + $0xb34] ss:$8 sps:$4 sm:$0xff]   ;;  %v4259_v10 = vld [vmem:[%s5775_s1 + $0xa30] ss:$8 sps:$4 sm:$0xff]  }
 0x125   :  { %2917 = vmatprep.subr.bf16.mxu1 %v4194_v11  ;;  %v4262_v11 = vld [vmem:[%s5775_s1 + $0xb30] ss:$8 sps:$4 sm:$0xff]  }
 0x127   :  { %2877 = vmatpush2.bf16.msra.mxu0 %v4189_v12  ;;  %v4267_v12 = vld [vmem:[%s5775_s1 + $0xa24] ss:$8 sps:$4 sm:$0xff]  }
 0x128   :  { %2918 = vmatpush2.bf16.msra.mxu1 %v4192_v13  ;;  %2878 = vmatprep.subr.bf16.mxu0 %v4197_v14  ;;  %v4270_v13 = vld [vmem:[%s5775_s1 + $0xb24] ss:$8 sps:$4 sm:$0xff]   ;;  %v4265_v14 = vld [vmem:[%s5775_s1 + $0xa20] ss:$8 sps:$4 sm:$0xff]  }
 0x129   :  { %2919 = vmatprep.subr.bf16.mxu1 %v4200_v15  ;;  %v4268_v15 = vld [vmem:[%s5775_s1 + $0xb20] ss:$8 sps:$4 sm:$0xff]  }
 0x12b   :  { %2879 = vmatpush2.bf16.msra.mxu0 %v4195_v16  ;;  %v4273_v16 = vld [vmem:[%s5775_s1 + $0xa14] ss:$8 sps:$4 sm:$0xff]  }
 0x12c   :  { %2920 = vmatpush2.bf16.msra.mxu1 %v4198_v17  ;;  %2880 = vmatprep.subr.bf16.mxu0 %v4203_v19  ;;  %v4276_v17 = vld [vmem:[%s5775_s1 + $0xb14] ss:$8 sps:$4 sm:$0xff]   ;;  %v4271_v19 = vld [vmem:[%s5775_s1 + $0xa10] ss:$8 sps:$4 sm:$0xff]  }
 0x12d   :  { %2921 = vmatprep.subr.bf16.mxu1 %v4206_v21  ;;  %v4274_v21 = vld [vmem:[%s5775_s1 + $0xb10] ss:$8 sps:$4 sm:$0xff]  }
 0x12f   :  { %2881 = vmatpush2.bf16.msra.mxu0 %v4201_v22  ;;  %v4279_v22 = vld [vmem:[%s5775_s1 + $0xa04] ss:$8 sps:$4 sm:$0xff]  }
 0x130   :  { %2922 = vmatpush2.bf16.msra.mxu1 %v4204_v23  ;;  %2882 = vmatprep.subr.bf16.mxu0 %v4209_v26  ;;  %v4282_v23 = vld [vmem:[%s5775_s1 + $0xb04] ss:$8 sps:$4 sm:$0xff]   ;;  %v4277_v26 = vld [vmem:[%s5775_s1 + $0xa00] ss:$8 sps:$4 sm:$0xff]  }
 0x131   :  { %2923 = vmatprep.subr.bf16.mxu1 %v4212_v18  ;;  %v4280_v18 = vld [vmem:[%s5775_s1 + $0xb00] ss:$8 sps:$4 sm:$0xff]  }
 0x133   :  { %2883 = vmatpush2.bf16.msra.mxu0 %v4207_v27  ;;  %v4285_v27 = vld [vmem:[%s5775_s1 + $0xaf4] ss:$8 sps:$4 sm:$0xff]  }
 0x134   :  { %2924 = vmatpush2.bf16.msra.mxu1 %v4210_v28  ;;  %2884 = vmatprep.subr.bf16.mxu0 %v4215_v30  ;;  %v4288_v28 = vld [vmem:[%s5775_s1 + $0xbf4] ss:$8 sps:$4 sm:$0xff]   ;;  %v4283_v30 = vld [vmem:[%s5775_s1 + $0xaf0] ss:$8 sps:$4 sm:$0xff]  }
 0x135   :  { %2925 = vmatprep.subr.bf16.mxu1 %v4218_v31  ;;  %v4286_v31 = vld [vmem:[%s5775_s1 + $0xbf0] ss:$8 sps:$4 sm:$0xff]  }
 0x137   :  { %2885 = vmatpush2.bf16.msra.mxu0 %v4213_v24  ;;  %v4291_v24 = vld [vmem:[%s5775_s1 + $0xae4] ss:$8 sps:$4 sm:$0xff]  }
 0x138   :  { %2926 = vmatpush2.bf16.msra.mxu1 %v4216_v25  ;;  %2886 = vmatprep.subr.bf16.mxu0 %v4221_v32  ;;  %v4294_v25 = vld [vmem:[%s5775_s1 + $0xbe4] ss:$8 sps:$4 sm:$0xff]   ;;  %v4289_v32 = vld [vmem:[%s5775_s1 + $0xae0] ss:$8 sps:$4 sm:$0xff]  }
 0x139   :  { %2927 = vmatprep.subr.bf16.mxu1 %v4224_v33  ;;  %v4292_v33 = vld [vmem:[%s5775_s1 + $0xbe0] ss:$8 sps:$4 sm:$0xff]  }
 0x13b   :  { %2887 = vmatpush2.bf16.msra.mxu0 %v4219_v34  ;;  %v4297_v34 = vld [vmem:[%s5775_s1 + $0xad4] ss:$8 sps:$4 sm:$0xff]  }
 0x13c   :  { %2928 = vmatpush2.bf16.msra.mxu1 %v4222_v35  ;;  %2888 = vmatprep.subr.bf16.mxu0 %v4227_v36  ;;  %v4300_v35 = vld [vmem:[%s5775_s1 + $0xbd4] ss:$8 sps:$4 sm:$0xff]   ;;  %v4295_v36 = vld [vmem:[%s5775_s1 + $0xad0] ss:$8 sps:$4 sm:$0xff]  }
 0x13d   :  { %2929 = vmatprep.subr.bf16.mxu1 %v4230_v38  ;;  %v4298_v38 = vld [vmem:[%s5775_s1 + $0xbd0] ss:$8 sps:$4 sm:$0xff]  }
 0x13f   :  { %2889 = vmatpush2.bf16.msra.mxu0 %v4225_v39  ;;  %v4303_v39 = vld [vmem:[%s5775_s1 + $0xac4] ss:$8 sps:$4 sm:$0xff]  }
 0x140   :  { %2930 = vmatpush2.bf16.msra.mxu1 %v4228_v40  ;;  %2940 = vmatprep.subr.bf16.mxu0 %v4235_v41  ;;  %v4306_v40 = vld [vmem:[%s5775_s1 + $0xbc4] ss:$8 sps:$4 sm:$0xff]   ;;  %v4301_v41 = vld [vmem:[%s5775_s1 + $0xac0] ss:$8 sps:$4 sm:$0xff]  }
 0x141   :  { %2981 = vmatprep.subr.bf16.mxu1 %v4240_v42  ;;  %v4304_v42 = vld [vmem:[%s5775_s1 + $0xbc0] ss:$8 sps:$4 sm:$0xff]  }
 0x142   :  { %v2646_v52 = vpop.f32.mrf.mxu0  ;;  %2891 = vmatmul.mubr.bf16.vlgmr.msra.gmra.mxu0 %v3286_v44  ;;  %v4309_v44 = vld [vmem:[%s5775_s1 + $0xab4] ss:$8 sps:$4 sm:$0xff]  }
 0x143   :  { %v2687_v53 = vpop.f32.mrf.mxu1  ;;  %2932 = vmatmul.mubr.bf16.vlgmr.msra.gmra.mxu1 %v3288_v45  ;;  %v2647_v54 = vadd.f32 %v2646_v52, %v5270_v37  ;;  %2941 = vmatpush1.bf16.msra.mxu0 %v4233_v48  ;;  %v4252_v37 = vld [vmem:[%s5775_s1 + $0xb54] ss:$8 sps:$4 sm:$0xff]   ;;  %v4307_v48 = vld [vmem:[%s5775_s1 + $0xab0] ss:$8 sps:$4 sm:$0xff]  }
 0x144   :  { %2982 = vmatpush1.bf16.msra.mxu1 %v4238_v20  ;;  %v2648_v57 = vpop.f32.mrf.mxu0  ;;  %2942 = vmatprep.subr.bf16.mxu0 %v4243_v29  ;;  %v4312_v45 = vld [vmem:[%s5775_s1 + $0xbb4] ss:$8 sps:$4 sm:$0xff]   ;;  %v4310_v20 = vld [vmem:[%s5775_s1 + $0xbb0] ss:$8 sps:$4 sm:$0xff]   ;;  %v4315_v29 = vld [vmem:[%s5775_s1 + $0xaa4] ss:$8 sps:$4 sm:$0xff]  }
 0x145   :  { %v2689_v58 = vpop.f32.mrf.mxu1  ;;  %2983 = vmatprep.subr.bf16.mxu1 %v4246_v49  ;;  %v2649_v60 = vadd.f32 %v2648_v57, %v5281_v43  ;;  %v5495_v61 = vadd.f32 %v2687_v53, %v2647_v54  ;;  %2972 = vmatprep.mubr.bf16.mxu0 %v3291_v50  ;;  %v4255_v43 = vld [vmem:[%s5775_s1 + $0xa44] ss:$8 sps:$4 sm:$0xff]   ;;  %v4313_v50 = vld [vmem:[%s5775_s1 + $0xaa0] ss:$8 sps:$4 sm:$0xff]   ;;  %v4321_v52 = vld [vmem:[%s5775_s1 + $0xa94] ss:$8 sps:$4 sm:$0xff]  }
 0x146   :  { %3013 = vmatprep.mubr.bf16.mxu1 %v3293_v51  ;;  %v2650_v62 = vpop.f32.mrf.mxu0  ;;  %v4318_v49 = vld [vmem:[%s5775_s1 + $0xba4] ss:$8 sps:$4 sm:$0xff]   ;;  %v4316_v51 = vld [vmem:[%s5775_s1 + $0xba0] ss:$8 sps:$4 sm:$0xff]   ;;  %v4324_v53 = vld [vmem:[%s5775_s1 + $0xb94] ss:$8 sps:$4 sm:$0xff]  }
 0x147   :  { %v2691_v63 = vpop.f32.mrf.mxu1  ;;  %v5497_v0 = vadd.f32 %v2689_v58, %v2649_v60  ;;  %2943 = vmatpush1.bf16.msra.mxu0 %v4241_v55  ;;  %v4319_v54 = vld [vmem:[%s5775_s1 + $0xa90] ss:$8 sps:$4 sm:$0xff]   ;;  %v4330_v57 = vld [vmem:[%s5775_s1 + $0xb84] ss:$8 sps:$4 sm:$0xff]   ;;  %v4325_v58 = vld [vmem:[%s5775_s1 + $0xa80] ss:$8 sps:$4 sm:$0xff]   ;;  %v3290_v60 = vcombine.low %v5458_v46, %v5458_v46  ;;  %v3292_v62 = vcombine.low %v5463_v47, %v5463_v47 }
 0x148   :  { %2984 = vmatpush1.bf16.msra.mxu1 %v4244_v56  ;;  %v2651_v3 = vpop.f32.mrf.mxu0  ;;  %2944 = vmatprep.subr.bf16.mxu0 %v4249_v59  ;;  %v4322_v55 = vld [vmem:[%s5775_s1 + $0xb90] ss:$8 sps:$4 sm:$0xff]   ;;  %v4327_v56 = vld [vmem:[%s5775_s1 + $0xa84] ss:$8 sps:$4 sm:$0xff]   ;;  %v4328_v59 = vld [vmem:[%s5775_s1 + $0xb80] ss:$8 sps:$4 sm:$0xff]  }
 0x149   :  { %2985 = vmatprep.subr.bf16.mxu1 %v4252_v37  ;;  %v2692_v5 = vpop.f32.mrf.mxu1  ;;  %v4335_v37 = vld [vmem:[%s5775_s1 + $0xc74] ss:$8 sps:$4 sm:$0xff]   ;;  %v4333_v63 = vld [vmem:[%s5775_s1 + $0xc70] ss:$8 sps:$4 sm:$0xff]   ;;  %v4338_v47 = vld [vmem:[%s5775_s1 + $0xc60] ss:$8 sps:$4 sm:$0xff]  }
 0x14b   :  { %2945 = vmatpush1.bf16.msra.mxu0 %v4247_v1  ;;  %v4340_v1 = vld [vmem:[%s5775_s1 + $0xc64] ss:$8 sps:$4 sm:$0xff]  }
 0x14c   :  { %2986 = vmatpush1.bf16.msra.mxu1 %v4250_v2  ;;  %2946 = vmatprep.subr.bf16.mxu0 %v4255_v43  ;;  %v4376_v43 = vmov 0  }
 0x14d   :  { %2987 = vmatprep.subr.bf16.mxu1 %v4258_v4 }
 0x14f   :  { %2947 = vmatpush1.bf16.msra.mxu0 %v4253_v6  ;;  %v4343_v6 = vld [vmem:[%s5775_s1 + $0xc54] ss:$8 sps:$4 sm:$0xff]  }
 0x150   :  { %2988 = vmatpush1.bf16.msra.mxu1 %v4256_v7  ;;  %2948 = vmatprep.subr.bf16.mxu0 %v4261_v8 }
 0x151   :  { %2989 = vmatprep.subr.bf16.mxu1 %v4264_v9 }
 0x153   :  { %2949 = vmatpush1.bf16.msra.mxu0 %v4259_v10 }
 0x154   :  { %2990 = vmatpush1.bf16.msra.mxu1 %v4262_v11  ;;  %2950 = vmatprep.subr.bf16.mxu0 %v4267_v12  ;;  %v4341_v11 = vld [vmem:[%s5775_s1 + $0xc50] ss:$8 sps:$4 sm:$0xff]  }
 0x155   :  { %2991 = vmatprep.subr.bf16.mxu1 %v4270_v13  ;;  %v4346_v13 = vld [vmem:[%s5775_s1 + $0xc44] ss:$8 sps:$4 sm:$0xff]  }
 0x157   :  { %2951 = vmatpush1.bf16.msra.mxu0 %v4265_v14 }
 0x158   :  { %2992 = vmatpush1.bf16.msra.mxu1 %v4268_v15  ;;  %2952 = vmatprep.subr.bf16.mxu0 %v4273_v16  ;;  %v4349_v15 = vld [vmem:[%s5775_s1 + $0xc34] ss:$8 sps:$4 sm:$0xff]   ;;  %v4347_v16 = vld [vmem:[%s5775_s1 + $0xc30] ss:$8 sps:$4 sm:$0xff]  }
 0x159   :  { %2993 = vmatprep.subr.bf16.mxu1 %v4276_v17  ;;  %v4352_v17 = vld [vmem:[%s5775_s1 + $0xc24] ss:$8 sps:$4 sm:$0xff]  }
 0x15b   :  { %2953 = vmatpush1.bf16.msra.mxu0 %v4271_v19  ;;  %v4350_v19 = vld [vmem:[%s5775_s1 + $0xc20] ss:$8 sps:$4 sm:$0xff]  }
 0x15c   :  { %2994 = vmatpush1.bf16.msra.mxu1 %v4274_v21  ;;  %2954 = vmatprep.subr.bf16.mxu0 %v4279_v22  ;;  %v4355_v21 = vld [vmem:[%s5775_s1 + $0xc14] ss:$8 sps:$4 sm:$0xff]   ;;  %v4353_v22 = vld [vmem:[%s5775_s1 + $0xc10] ss:$8 sps:$4 sm:$0xff]  }
 0x15d   :  { %2995 = vmatprep.subr.bf16.mxu1 %v4282_v23  ;;  %v4358_v23 = vld [vmem:[%s5775_s1 + $0xc04] ss:$8 sps:$4 sm:$0xff]  }
 0x15f   :  { %2955 = vmatpush1.bf16.msra.mxu0 %v4277_v26  ;;  %v4356_v26 = vld [vmem:[%s5775_s1 + $0xc00] ss:$8 sps:$4 sm:$0xff]  }
 0x160   :  { %2996 = vmatpush1.bf16.msra.mxu1 %v4280_v18  ;;  %2956 = vmatprep.subr.bf16.mxu0 %v4285_v27  ;;  %v4359_v18 = vld [vmem:[%s5776_s0 + $0x60] ss:$0 sps:$4 sm:$0xff]  }
 0x161   :  { %2997 = vmatprep.subr.bf16.mxu1 %v4288_v28 }
 0x163   :  { %2957 = vmatpush2.bf16.msra.mxu0 %v4283_v30 }
 0x164   :  { %2998 = vmatpush2.bf16.msra.mxu1 %v4286_v31  ;;  %2958 = vmatprep.subr.bf16.mxu0 %v4291_v24 }
 0x165   :  { %2999 = vmatprep.subr.bf16.mxu1 %v4294_v25 }
 0x167   :  { %2959 = vmatpush2.bf16.msra.mxu0 %v4289_v32 }
 0x168   :  { %3000 = vmatpush2.bf16.msra.mxu1 %v4292_v33  ;;  %2960 = vmatprep.subr.bf16.mxu0 %v4297_v34 }
 0x169   :  { %3001 = vmatprep.subr.bf16.mxu1 %v4300_v35 }
 0x16b   :  { %2961 = vmatpush2.bf16.msra.mxu0 %v4295_v36 }
 0x16c   :  { %3002 = vmatpush2.bf16.msra.mxu1 %v4298_v38  ;;  %2962 = vmatprep.subr.bf16.mxu0 %v4303_v39  ;;  %v4360_v39 = vld [vmem:[%s5777_s3 + $0x78] sm:$0xff]  }
 0x16d   :  { %3003 = vmatprep.subr.bf16.mxu1 %v4306_v40  ;;  %v4361_v40 = vld [vmem:[%s5777_s3 + $0x38] sm:$0xff]  }
 0x16f   :  { %2963 = vmatpush2.bf16.msra.mxu0 %v4301_v41  ;;  %v4362_v41 = vld [vmem:[%s5777_s3 + $0x70] sm:$0xff]  }
 0x170   :  { %3004 = vmatpush2.bf16.msra.mxu1 %v4304_v42  ;;  %2964 = vmatprep.subr.bf16.mxu0 %v4309_v44  ;;  %v4363_v42 = vld [vmem:[%s5777_s3 + $0x30] sm:$0xff]   ;;  %v4364_v44 = vld [vmem:[%s5777_s3 + $0x68] sm:$0xff]  }
 0x171   :  { %3005 = vmatprep.subr.bf16.mxu1 %v4312_v45  ;;  %v4365_v45 = vld [vmem:[%s5777_s3 + $0x28] sm:$0xff]  }
 0x173   :  { %2965 = vmatpush2.bf16.msra.mxu0 %v4307_v48  ;;  %v4366_v48 = vld [vmem:[%s5777_s3 + $0x60] sm:$0xff]  }
 0x174   :  { %3006 = vmatpush2.bf16.msra.mxu1 %v4310_v20  ;;  %2966 = vmatprep.subr.bf16.mxu0 %v4315_v29  ;;  %v4367_v20 = vld [vmem:[%s5777_s3 + $0x20] sm:$0xff]   ;;  %v4368_v29 = vld [vmem:[%s5777_s3 + $0x58] sm:$0xff]  }
 0x175   :  { %3007 = vmatprep.subr.bf16.mxu1 %v4318_v49  ;;  %v4369_v49 = vld [vmem:[%s5777_s3 + $0x18] sm:$0xff]  }
 0x177   :  { %2967 = vmatpush2.bf16.msra.mxu0 %v4313_v50  ;;  %v4370_v50 = vld [vmem:[%s5777_s3 + $0x50] sm:$0xff]  }
 0x178   :  { %3008 = vmatpush2.bf16.msra.mxu1 %v4316_v51  ;;  %2968 = vmatprep.subr.bf16.mxu0 %v4321_v52  ;;  %v4371_v51 = vld [vmem:[%s5777_s3 + $0x10] sm:$0xff]   ;;  %v4372_v52 = vld [vmem:[%s5777_s3 + $0x48] sm:$0xff]  }
 0x179   :  { %3009 = vmatprep.subr.bf16.mxu1 %v4324_v53  ;;  %v4373_v53 = vld [vmem:[%s5777_s3 + $0x8] sm:$0xff]  }
 0x17b   :  { %2969 = vmatpush2.bf16.msra.mxu0 %v4319_v54  ;;  %v4374_v54 = vld [vmem:[%s5777_s3 + $0x40] sm:$0xff]  }
 0x17c   :  { %3010 = vmatpush2.bf16.msra.mxu1 %v4322_v55  ;;  %2970 = vmatprep.subr.bf16.mxu0 %v4327_v56  ;;  %v4375_v55 = vld [vmem:[%s5777_s3] sm:$0xff]  }
 0x17d   :  { %3011 = vmatprep.subr.bf16.mxu1 %v4330_v57 }
 0x17f   :  { %2971 = vmatpush2.bf16.msra.mxu0 %v4325_v58 }
 0x180   :  { %3012 = vmatpush2.bf16.msra.mxu1 %v4328_v59  ;;  %3022 = vmatprep.subr.bf16.mxu0 %v4335_v37 }
 0x181   :  { %3712 = vmatprep.subr.bf16.mxu1 %v4360_v39 }
 0x182   :  { %v2728_v2 = vpop.f32.mrf.mxu0  ;;  %2973 = vmatmul.mubr.bf16.vlgmr.msra.gmra.mxu0 %v3290_v60 }
 0x183   :  { %v2769_v3 = vpop.f32.mrf.mxu1  ;;  %3014 = vmatmul.mubr.bf16.vlgmr.msra.gmra.mxu1 %v3292_v62  ;;  %v2729_v46 = vadd.f32 %v2728_v2, %v5495_v61  ;;  %3023 = vmatpush1.bf16.msra.mxu0 %v4333_v63 }
 0x184   :  { %3054 = vmatprep.mubr.bf16.mxu0 %v4376_v43  ;;  %v2730_v4 = vpop.f32.mrf.mxu0  ;;  %3024 = vmatprep.subr.bf16.mxu0 %v4340_v1 }
 0x185   :  { %v2771_v5 = vpop.f32.mrf.mxu1  ;;  %v2731_v7 = vadd.f32 %v2730_v4, %v5497_v0  ;;  %v2770_v8 = vadd.f32 %v2769_v3, %v2729_v46  ;;  %v4344_v0 = vld [vmem:[%s5775_s1 + $0xc40] ss:$8 sps:$4 sm:$0xff]   ;;  %3713 = vmatpush3.bf16.msra.mxu1 %v4361_v40 }
 0x186   :  { %v2732_v9 = vpop.f32.mrf.mxu0  ;;  %3714 = vmatprep.subr.bf16.mxu1 %v4362_v41 }
 0x187   :  { %v2773_v10 = vpop.f32.mrf.mxu1  ;;  %v2772_v61 = vadd.f32 %v2771_v5, %v2731_v7  ;;  %3025 = vmatpush1.bf16.msra.mxu0 %v4338_v47 }
 0x188   :  { %v2733_v12 = vpop.f32.mrf.mxu0  ;;  %3026 = vmatprep.subr.bf16.mxu0 %v4343_v6  ;;  %v3074_v10 = vlaneseq }
 0x189   :  { %v2774_v14 = vpop.f32.mrf.mxu1  ;;  %3715 = vmatpush3.bf16.msra.mxu1 %v4363_v42 }
 0x18a   :  { %3716 = vmatprep.subr.bf16.mxu1 %v4364_v44 }
 0x18b   :  { %3027 = vmatpush1.bf16.msra.mxu0 %v4341_v11 }
 0x18c   :  { %3028 = vmatprep.subr.bf16.mxu0 %v4346_v13  ;;  %v3072_v13 = vld [vmem:[%s5778_s2] sm:$0x3] }
 0x18d   :  { %3717 = vmatpush3.bf16.msra.mxu1 %v4365_v45 }
 0x18e   :  { %3718 = vmatprep.subr.bf16.mxu1 %v4366_v48 }
 0x18f   :  { %3029 = vmatpush1.bf16.msra.mxu0 %v4344_v0 }
 0x190   :  { %3030 = vmatprep.subr.bf16.mxu0 %v4349_v15 }
 0x191   :  { %3719 = vmatpush3.bf16.msra.mxu1 %v4367_v20 }
 0x192   :  { %3720 = vmatprep.subr.bf16.mxu1 %v4368_v29 }
 0x193   :  { %3031 = vmatpush1.bf16.msra.mxu0 %v4347_v16 }
 0x194   :  { %3032 = vmatprep.subr.bf16.mxu0 %v4352_v17 }
 0x195   :  { %3721 = vmatpush3.bf16.msra.mxu1 %v4369_v49 }
 0x196   :  { %3722 = vmatprep.subr.bf16.mxu1 %v4370_v50 }
 0x197   :  { %3033 = vmatpush1.bf16.msra.mxu0 %v4350_v19 }
 0x198   :  { %3034 = vmatprep.subr.bf16.mxu0 %v4355_v21 }
 0x199   :  { %3723 = vmatpush3.bf16.msra.mxu1 %v4371_v51 }
 0x19a   :  { %3724 = vmatprep.subr.bf16.mxu1 %v4372_v52 }
 0x19b   :  { %3035 = vmatpush1.bf16.msra.mxu0 %v4353_v22 }
 0x19c   :  { %3036 = vmatprep.subr.bf16.mxu0 %v4358_v23 }
 0x19d   :  { %3725 = vmatpush3.bf16.msra.mxu1 %v4373_v53 }
 0x19e   :  { %3726 = vmatprep.subr.bf16.mxu1 %v4374_v54 }
 0x19f   :  { %3037 = vmatpush1.bf16.msra.mxu0 %v4356_v26 }
 0x1a1   :  { %3727 = vmatpush3.bf16.msra.mxu1 %v4375_v55 }
 0x1a2   :  { %3055 = vmatmul.mubr.bf16.vlgmr.msra.gmra.mxu0 %v4359_v18 }
 0x1c2   :  { %v2810_v27 = vpop.f32.mrf.mxu0 }
 0x1c3   :  { %v2851_v28 = vpop.f32.mrf.mxu1  ;;  %v2811_v30 = vadd.f32 %v2810_v27, %v2770_v8 }
 0x1c4   :  { %v2812_v31 = vpop.f32.mrf.mxu0 }
 0x1c5   :  { %v2853_v24 = vpop.f32.mrf.mxu1  ;;  %v2813_v25 = vadd.f32 %v2812_v31, %v2772_v61  ;;  %v2852_v32 = vadd.f32 %v2851_v28, %v2811_v30  ;;  %v3075_v61 = vshrl.u32 %v3074_v10, 7 }
 0x1c6   :  { %v2814_v33 = vpop.f32.mrf.mxu0 }
 0x1c7   :  { %v2855_v34 = vpop.f32.mrf.mxu1  ;;  %v2854_v35 = vadd.f32 %v2853_v24, %v2813_v25  ;;  %v3076_v12 = vsub.s32 0, %v3075_v61  ;;  %v3080_v0 = vsub.s32 1, %v3075_v61 }
 0x1c8   :  { %v2815_v36 = vpop.f32.mrf.mxu0  ;;  %v3695_v34 = vld [vmem:[%s5779_s4] ss:$0 sm:$0xff] }
 0x1c9   :  { %v2856_v38 = vpop.f32.mrf.mxu1  ;;  %v3077_v16 = vrot.slane %v3072_v13, %v3076_v12  ;;  %v3081_v22 = vrot.slane %v3072_v13, %v3080_v0 }
 0x202   :  { %v2892_v56 = vpop.f32.mrf.mxu0 }
 0x203   :  { %v2933_v57 = vpop.f32.mrf.mxu1  ;;  %v2893_v58 = vadd.f32 %v2892_v56, %v2852_v32 }
 0x204   :  { %v2894_v59 = vpop.f32.mrf.mxu0 }
 0x205   :  { %v2935_v37 = vpop.f32.mrf.mxu1  ;;  %v2895_v60 = vadd.f32 %v2894_v59, %v2854_v35  ;;  %v2934_v62 = vadd.f32 %v2933_v57, %v2893_v58 }
 0x206   :  { %v2896_v63 = vpop.f32.mrf.mxu0 }
 0x207   :  { %v2937_v1 = vpop.f32.mrf.mxu1  ;;  %v2936_v2 = vadd.f32 %v2935_v37, %v2895_v60 }
 0x208   :  { %v2897_v3 = vpop.f32.mrf.mxu0 }
 0x209   :  { %v2938_v46 = vpop.f32.mrf.mxu1 }
 0x242   :  { %v2974_v47 = vpop.f32.mrf.mxu0 }
 0x243   :  { %v3015_v43 = vpop.f32.mrf.mxu1  ;;  %v2975_v11 = vadd.f32 %v2974_v47, %v2934_v62 }
 0x244   :  { %v2976_v4 = vpop.f32.mrf.mxu0 }
 0x245   :  { %v3017_v5 = vpop.f32.mrf.mxu1  ;;  %v2977_v14 = vadd.f32 %v2976_v4, %v2936_v2  ;;  %v3016_v15 = vadd.f32 %v3015_v43, %v2975_v11 }
 0x246   :  { %v2978_v6 = vpop.f32.mrf.mxu0 }
 0x247   :  { %v3019_v7 = vpop.f32.mrf.mxu1  ;;  %v3018_v19 = vadd.f32 %v3017_v5, %v2977_v14 }
 0x248   :  { %v2979_v8 = vpop.f32.mrf.mxu0 }
 0x249   :  { %v3020_v9 = vpop.f32.mrf.mxu1 }
 0x262   :  { %v3056_v17 = vpop.f32.mrf.mxu0 }
 0x263   :  { %v3057_v21 = vadd.f32 %v3056_v17, %v3016_v15 }
 0x264   :  { %v3058_v23 = vpop.f32.mrf.mxu0 }
 0x265   :  { %v3084_v26 = vadd.f32 %v3077_v16, %v3057_v21  ;;  %v3059_v18 = vadd.f32 %v3058_v23, %v3018_v19 }
 0x266   :  { %v3060_v27 = vpop.f32.mrf.mxu0 }
 0x267   :  { %v3085_v28 = vadd.f32 %v3081_v22, %v3059_v18  ;;  %v3086_v30 = vmax.f32 %v3084_v26, 0.0 }
 0x268   :  { %v3061_v31 = vpop.f32.mrf.mxu0 }
 0x269   :  { %v3087_v24 = vmax.f32 %v3085_v28, 0.0  ;;  %v3088_v32 = vpack.c.bf16 %v3086_v30, %v3086_v30 }
 0x26b   :  { %v3089_v25 = vpack.c.bf16 %v3087_v24, %v3087_v24 }
 0x26d   :  { %3257 = vmatprep.mubr.bf16.mxu1 %v3089_v25 }
 0x26e   :  { %3258 = vmatmul.mubr.bf16.vlgmr.msra.gmra.mxu1 %v3088_v32 }
 0x32e   :  { %v3728_v33 = vpop.f32.mrf.mxu1 }
 0x330   :  { %v3729_v35 = vpop.f32.mrf.mxu1 }
 0x331   :  { %v3730_v36 = vadd.f32 %v3729_v35, %v3728_v33 }
 0x332   :  { %v3731_v38 = vpop.f32.mrf.mxu1 }
 0x333   :  { %v3260_v39 = vadd.f32 %v3730_v36, %v3695_v34 }
 0x334   :  { %v3732_v40 = vpop.f32.mrf.mxu1 }
 0x335   :  { %3265 = vst [vmem:[%s5780_s5] sm:$0xff] %v3260_v39 }

</bundles_post_ra>
